<compile_context>
chip_gen: v7x
topology: tpu7x:2x2x1
jax: 0.10.0
libtpu: 0.0.40
codegen_flags: <defaults>
</compile_context>

<pallas_src>
import jax
import jax.numpy as jnp
from jax.experimental import pallas as pl
from jax.experimental.pallas import tpu as pltpu

CP = 128  # lane-padded channel width (all channel dims <= 128 here)


# ------------------------------ fused forward kernel ------------------------------
def _build_fused_kernel(depth, bt, h1, w1, ksizes, pads, pool_type, mxu_dtype):
    """Kernel closure running the whole network for `bt` batch samples per grid step."""
    n_in = 3 * depth + 5

    def kernel(*refs):
        in_refs = refs[:n_in]
        o_ref = refs[n_in]
        scratch = refs[n_in + 1:]

        p1_ref, w1_ref, s1_ref, b1_ref = in_refs[0:4]
        blk_refs = in_refs[4:4 + 3 * (depth - 1)]
        fw1_ref, fb1_ref, fw2_ref, fb2_ref = in_refs[4 + 3 * (depth - 1):n_in]

        # ---------- block 1: one lane-dense im2col matmul + folded BN + ReLU ----------
        h, w = h1, w1
        patches = p1_ref[...].reshape(bt * h * w, p1_ref.shape[-1])   # (bt*Ho*Wo, KPAD)
        y = jnp.dot(patches, w1_ref[...], preferred_element_type=jnp.float32)
        y = jnp.maximum(y * s1_ref[...] + b1_ref[...], 0.0)           # (bt*h*w, CP) f32

        # ---------- blocks 2..depth: 2x2 pool + conv (single im2col matmul) ----------
        for i in range(1, depth):
            x = y.reshape(bt, h, w, CP)
            # 2x2 / stride-2 pooling with floor semantics (nn.MaxPool2d(2, 2)).
            h2, w2 = (h // 2) * 2, (w // 2) * 2
            xe = x[:, :h2, :w2, :]
            xe = xe.reshape(bt, h2, w2 // 2, 2, CP)
            xe = jnp.max(xe, axis=3) if pool_type == 'max' else jnp.mean(xe, axis=3)
            xe = xe.reshape(bt, h2 // 2, 2, w2 // 2, CP)
            xe = jnp.max(xe, axis=2) if pool_type == 'max' else jnp.mean(xe, axis=2)
            h, w = h2 // 2, w2 // 2                                    # (bt, h, w, CP)

            K, p = ksizes[i], pads[i]
            wk_ref, sc_ref, bs_ref = blk_refs[3 * (i - 1): 3 * i]

            # Zero-pad spatially via a lane-dense VMEM scratch (unmasked 128-lane stores).
            pad_ref = scratch[i - 1]                                   # (bt, hp, wp, CP)
            if p > 0:
                pad_ref[...] = jnp.zeros(pad_ref.shape, jnp.float32)
            pad_ref[:, p:p + h, p:p + w, :] = xe

            ho = h + 2 * p - K + 1
            wo = w + 2 * p - K + 1
            # In-register im2col: K*K taps, each a full 128-lane slab, one MXU push.
            taps = [pad_ref[:, kh:kh + ho, kw:kw + wo, :]
                    for kh in range(K) for kw in range(K)]
            pm = jnp.concatenate(taps, axis=-1)                        # (bt,ho,wo,K*K*CP)
            pm = pm.reshape(bt * ho * wo, K * K * CP).astype(mxu_dtype)
            acc = jnp.dot(pm, wk_ref[...], preferred_element_type=jnp.float32)
            y = jnp.maximum(acc * sc_ref[...] + bs_ref[...], 0.0)      # (bt*ho*wo, CP)
            h, w = ho, wo

        # ---------- global average pool + fc1 + ReLU + fc2 (all lane-dense) ----------
        feat = jnp.mean(y.reshape(bt, h * w, CP), axis=1)              # (bt, CP) f32
        hid = jnp.dot(feat.astype(mxu_dtype), fw1_ref[...],
                      preferred_element_type=jnp.float32) + fb1_ref[...]
        hid = jnp.maximum(hid, 0.0)
        out = jnp.dot(hid.astype(mxu_dtype), fw2_ref[...],
                      preferred_element_type=jnp.float32) + fb2_ref[...]
        o_ref[0] = out                                                 # (bt, CP)

    return kernel


# --------------------------------- wrapper / driver ---------------------------------
def model_forward(x_nchw, params, w, eps=1e-5, mxu_dtype=jnp.bfloat16):
    # TODO(synk): only stride=1 is implemented; BatchNorm is inference-mode (running
    #             stats folded into scale/shift); dropout acts as identity (eval mode).
    depth = int(params['depth'])
    stride = int(params['stride'])
    pool_type = params['pool']
    B, C0, H, W = x_nchw.shape

    # Per-block static config + fold conv bias and BN into per-channel scale/shift.
    ws, scales, shifts, ksizes, pads = [], [], [], [], []
    channels = [C0]
    for i in range(depth):
        wk, bk, gamma, beta, mean, var = w[f'block{i + 1}']
        K = wk.shape[0]
        cin, cout = wk.shape[2], wk.shape[3]
        if params['padding'] == 'same':
            p = int((cin * stride - cin - stride + K) / 2)   # exact PyTorch-module formula
        else:
            p = 0
        if params['bn']:
            scale = gamma / jnp.sqrt(var + eps)
            shift = scale * (bk - mean) + beta
        else:
            scale = jnp.ones((cout,), jnp.float32)
            shift = bk
        ws.append(wk)
        scales.append(scale)
        shifts.append(shift)
        ksizes.append(K)
        pads.append(p)
        channels.append(cout)

    fw1, fb1 = w['fc1']
    fw2, fb2 = w['fc2']
    neurons = fw1.shape[1]
    n_out = fw2.shape[1]
    assert max(channels[1:]) <= CP and neurons <= CP and n_out <= CP

    # ---- block-1 im2col in the wrapper (tiny input), contraction lane-padded ----
    # TODO(synk): for large H*W move this tap construction into the kernel to avoid the
    #             K^2-expanded patch tensor in HBM (not a win at 16x16).
    K1, p1 = ksizes[0], pads[0]
    Ho = H + 2 * p1 - K1 + 1
    Wo = W + 2 * p1 - K1 + 1
    Kdim = K1 * K1 * C0
    KPAD = max(CP, ((Kdim + CP - 1) // CP) * CP)
    xp = jnp.pad(x_nchw, ((0, 0), (0, 0), (p1, p1), (p1, p1)))
    taps = [xp[:, :, kh:kh + Ho, kw:kw + Wo] for kh in range(K1) for kw in range(K1)]
    patches = jnp.stack(taps, axis=1)                            # (B, K1*K1, C0, Ho, Wo)
    patches = patches.transpose(0, 3, 4, 1, 2).reshape(B, Ho * Wo, Kdim)
    patches = jnp.pad(patches, ((0, 0), (0, 0), (0, KPAD - Kdim))).astype(mxu_dtype)

    def pad2(a, r, c):
        return jnp.pad(a, ((0, r - a.shape[0]), (0, c - a.shape[1])))

    def padc(v):                                                 # (c,) -> (1, 128) f32
        return jnp.pad(v, (0, CP - v.shape[0])).reshape(1, CP).astype(jnp.float32)

    w1_mat = pad2(ws[0].reshape(Kdim, channels[1]), KPAD, CP).astype(mxu_dtype)
    inputs = [patches, w1_mat, padc(scales[0]), padc(shifts[0])]
    for i in range(1, depth):
        K = ksizes[i]
        cin, cout = channels[i], channels[i + 1]
        wk = jnp.pad(ws[i], ((0, 0), (0, 0), (0, CP - cin), (0, CP - cout)))
        inputs.append(wk.reshape(K * K * CP, CP).astype(mxu_dtype))
        inputs.append(padc(scales[i]))
        inputs.append(padc(shifts[i]))
    inputs.append(pad2(fw1, CP, CP).astype(mxu_dtype))
    inputs.append(padc(fb1))
    inputs.append(pad2(fw2, CP, CP).astype(mxu_dtype))
    inputs.append(padc(fb2))

    # ---- grid: single step for the whole batch; 2-way parallel only on v7x ----
    G = 1
    try:
        kind = jax.devices()[0].device_kind.lower()
        if ('v7' in kind or '7x' in kind) and B >= 2 and B % 2 == 0:
            G = 2
    except Exception:
        G = 1
    Bt = B // G

    # Spatial evolution -> scratch shapes for in-kernel padding, plus a FLOP estimate.
    scratch_shapes = []
    flops = 2 * B * Ho * Wo * KPAD * CP
    h_i, w_i = Ho, Wo
    for i in range(1, depth):
        h_i, w_i = h_i // 2, w_i // 2
        hp, wp = h_i + 2 * pads[i], w_i + 2 * pads[i]
        scratch_shapes.append(pltpu.VMEM((Bt, hp, wp, CP), jnp.float32))
        h_i = hp - ksizes[i] + 1
        w_i = wp - ksizes[i] + 1
        flops += 2 * B * h_i * w_i * (ksizes[i] ** 2 * CP) * CP
    flops += 2 * B * (CP * CP + CP * CP)

    def _bcast_spec(shape):
        nd = len(shape)
        return pl.BlockSpec(shape, lambda g, _nd=nd: (0,) * _nd)

    in_specs = [pl.BlockSpec((Bt, Ho * Wo, KPAD), lambda g: (g, 0, 0))]
    in_specs += [_bcast_spec(tuple(a.shape)) for a in inputs[1:]]

    kernel = _build_fused_kernel(depth, Bt, Ho, Wo, ksizes, pads, pool_type, mxu_dtype)
    bytes_accessed = sum(int(a.size) * a.dtype.itemsize for a in inputs) + B * CP * 4

    out = pl.pallas_call(
        kernel,
        out_shape=jax.ShapeDtypeStruct((G, Bt, CP), jnp.float32),
        grid=(G,),
        in_specs=in_specs,
        out_specs=pl.BlockSpec((1, Bt, CP), lambda g: (g, 0, 0)),
        scratch_shapes=scratch_shapes,
        compiler_params=pltpu.CompilerParams(dimension_semantics=("parallel",)),
        cost_estimate=pl.CostEstimate(flops=int(flops), transcendentals=0,
                                      bytes_accessed=int(bytes_accessed)),
    )(*inputs)
    return out.reshape(B, CP)[:, :n_out]


# ------------------------------- pure-JAX reference --------------------------------
def reference_forward(x, params, w, eps=1e-5):
    depth = int(params['depth'])
    stride = int(params['stride'])
    y = x
    for i in range(depth):
        wk, bk, gamma, beta, mean, var = w[f'block{i + 1}']
        K, cin = wk.shape[0], wk.shape[2]
        p = int((cin * stride - cin - stride + K) / 2) if params['padding'] == 'same' else 0
        if i > 0:
            if params['pool'] == 'max':
                y = jax.lax.reduce_window(y, -jnp.inf, jax.lax.max,
                                          (1, 1, 2, 2), (1, 1, 2, 2), 'VALID')
            else:
                y = jax.lax.reduce_window(y, 0.0, jax.lax.add,
                                          (1, 1, 2, 2), (1, 1, 2, 2), 'VALID') / 4.0
        y = jax.lax.conv_general_dilated(y, wk, (stride, stride), [(p, p), (p, p)],
                                         dimension_numbers=('NCHW', 'HWIO', 'NCHW'))
        y = y + bk.reshape(1, -1, 1, 1)
        if params['bn']:
            y = ((y - mean.reshape(1, -1, 1, 1)) / jnp.sqrt(var.reshape(1, -1, 1, 1) + eps)
                 * gamma.reshape(1, -1, 1, 1) + beta.reshape(1, -1, 1, 1))
        y = jnp.maximum(y, 0.0)
    y = jnp.mean(y, axis=(2, 3))
    fw1, fb1 = w['fc1']
    fw2, fb2 = w['fc2']
    y = jnp.maximum(y @ fw1 + fb1, 0.0)
    return y @ fw2 + fb2


# ------------------------------- parameter init -------------------------------------
def init_conv_block(key, cin, cout, k):
    ks = jax.random.split(key, 4)
    bound = 1.0 / float((cin * k * k) ** 0.5)
    w = jax.random.uniform(ks[0], (k, k, cin, cout), jnp.float32, -bound, bound)
    b = jax.random.uniform(ks[1], (cout,), jnp.float32, -bound, bound)
    gamma = 1.0 + 0.1 * jax.random.normal(ks[2], (cout,), jnp.float32)
    beta = 0.1 * jax.random.normal(ks[3], (cout,), jnp.float32)
    run_mean = jnp.zeros((cout,), jnp.float32)        # BN running stats (inference mode)
    run_var = jnp.ones((cout,), jnp.float32)
    return (w, b, gamma, beta, run_mean, run_var)


def init_linear(key, cin, cout):
    k1, k2 = jax.random.split(key)
    bound = 1.0 / float(cin ** 0.5)
    w = jax.random.uniform(k1, (cin, cout), jnp.float32, -bound, bound)
    b = jax.random.uniform(k2, (cout,), jnp.float32, -bound, bound)
    return w, b


def init_weights(params, key):
    depth = int(params['depth'])
    filters = [3, int(params['n_filters_1']), int(params['n_filters_2']),
               int(params['n_filters_3']), int(params['n_filters_4'])]
    ksizes = [int(params['kernel_size_1']), int(params['kernel_size_2']),
              int(params['kernel_size_3']), int(params['kernel_size_4'])]
    keys = jax.random.split(key, depth + 2)
    weights = {}
    for i in range(depth):
        weights[f'block{i + 1}'] = init_conv_block(keys[i], filters[i], filters[i + 1],
                                                   ksizes[i])
    output_size = filters[depth]
    weights['fc1'] = init_linear(keys[depth], output_size, int(params['neurons']))
    weights['fc2'] = init_linear(keys[depth + 1], int(params['neurons']),
                                 int(params['output']))
    return weights


if __name__ == "__main__":
    params = dict(
        depth=2,
        n_filters_1=8, n_filters_2=16, n_filters_3=32, n_filters_4=64,
        kernel_size_1=3, kernel_size_2=3, kernel_size_3=3, kernel_size_4=3,
        stride=1, padding='same', pool='max', bn=True, dropout=0.0,
        neurons=32, output=10,
    )
    key = jax.random.PRNGKey(0)
    k_x, k_w = jax.random.split(key)
    x_nchw = jax.random.normal(k_x, (2, 3, 16, 16), jnp.float32)   # NCHW like PyTorch
    weights = init_weights(params, k_w)

    fwd = jax.jit(lambda x, w: model_forward(x, params, w))
    y = jax.block_until_ready(fwd(x_nchw, weights))
    assert y.shape == (2, params['output']), y.shape
    assert bool(jnp.all(jnp.isfinite(y)))

    y_ref = reference_forward(x_nchw, params, weights)
    assert bool(jnp.allclose(y, y_ref, rtol=5e-2, atol=5e-2)), (y, y_ref)
    print("KERNEL_OK")
</pallas_src>

<mosaic_0001>
module attributes {stable_mosaic.version = 11 : i64} {
  func.func @kernel(%arg0: i32, %arg1: memref<2x256x128xbf16, #tpu.memory_space<vmem>>, %arg2: memref<128x128xbf16, #tpu.memory_space<vmem>>, %arg3: memref<1x128xf32, #tpu.memory_space<vmem>>, %arg4: memref<1x128xf32, #tpu.memory_space<vmem>>, %arg5: memref<1152x128xbf16, #tpu.memory_space<vmem>>, %arg6: memref<1x128xf32, #tpu.memory_space<vmem>>, %arg7: memref<1x128xf32, #tpu.memory_space<vmem>>, %arg8: memref<128x128xbf16, #tpu.memory_space<vmem>>, %arg9: memref<1x128xf32, #tpu.memory_space<vmem>>, %arg10: memref<128x128xbf16, #tpu.memory_space<vmem>>, %arg11: memref<1x128xf32, #tpu.memory_space<vmem>>, %arg12: memref<1x2x128xf32, #tpu.memory_space<vmem>>, %arg13: memref<2x10x10x128xf32, #tpu.memory_space<vmem>>) attributes {dimension_semantics = [#tpu.dimension_semantics<parallel>], iteration_bounds = array<i64: 1>, scalar_prefetch = 0 : i64, scratch_operands = 1 : i64, tpu.core_type = #tpu.core_type<tc>, window_params = [{transform_indices = @transform_0, window_bounds = array<i64: 2, 256, 128>}, {pipeline_mode = #tpu.pipeline_mode<synchronous>, transform_indices = @transform_1, window_bounds = array<i64: 128, 128>}, {pipeline_mode = #tpu.pipeline_mode<synchronous>, transform_indices = @transform_2, window_bounds = array<i64: 1, 128>}, {pipeline_mode = #tpu.pipeline_mode<synchronous>, transform_indices = @transform_3, window_bounds = array<i64: 1, 128>}, {pipeline_mode = #tpu.pipeline_mode<synchronous>, transform_indices = @transform_4, window_bounds = array<i64: 1152, 128>}, {pipeline_mode = #tpu.pipeline_mode<synchronous>, transform_indices = @transform_5, window_bounds = array<i64: 1, 128>}, {pipeline_mode = #tpu.pipeline_mode<synchronous>, transform_indices = @transform_6, window_bounds = array<i64: 1, 128>}, {pipeline_mode = #tpu.pipeline_mode<synchronous>, transform_indices = @transform_7, window_bounds = array<i64: 128, 128>}, {pipeline_mode = #tpu.pipeline_mode<synchronous>, transform_indices = @transform_8, window_bounds = array<i64: 1, 128>}, {pipeline_mode = #tpu.pipeline_mode<synchronous>, transform_indices = @transform_9, window_bounds = array<i64: 128, 128>}, {pipeline_mode = #tpu.pipeline_mode<synchronous>, transform_indices = @transform_10, window_bounds = array<i64: 1, 128>}, {transform_indices = @transform_11, window_bounds = array<i64: 1, 2, 128>}]} {
    %c0 = arith.constant 0 : index
    %c0_0 = arith.constant 0 : index
    %c0_1 = arith.constant 0 : index
    %0 = vector.load %arg1[%c0, %c0_0, %c0_1] : memref<2x256x128xbf16, #tpu.memory_space<vmem>>, vector<2x256x128xbf16>
    %1 = vector.shape_cast %0 : vector<2x256x128xbf16> to vector<512x128xbf16>
    %c0_2 = arith.constant 0 : index
    %c0_3 = arith.constant 0 : index
    %2 = vector.load %arg2[%c0_2, %c0_3] : memref<128x128xbf16, #tpu.memory_space<vmem>>, vector<128x128xbf16>
    %cst = arith.constant dense<0.000000e+00> : vector<512x128xf32>
    %3 = tpu.matmul %1, %2, %cst {dimension_numbers = #tpu.dot_dimension_numbers<[1], [0], [0], [1], [0, 0, 1, 1], [], []>} : vector<512x128xbf16>, vector<128x128xbf16>, vector<512x128xf32> -> vector<512x128xf32>
    %c0_4 = arith.constant 0 : index
    %c0_5 = arith.constant 0 : index
    %4 = vector.load %arg3[%c0_4, %c0_5] : memref<1x128xf32, #tpu.memory_space<vmem>>, vector<1x128xf32>
    %5 = vector.broadcast %4 : vector<1x128xf32> to vector<512x128xf32>
    %6 = arith.mulf %3, %5 : vector<512x128xf32>
    %c0_6 = arith.constant 0 : index
    %c0_7 = arith.constant 0 : index
    %7 = vector.load %arg4[%c0_6, %c0_7] : memref<1x128xf32, #tpu.memory_space<vmem>>, vector<1x128xf32>
    %8 = vector.broadcast %7 : vector<1x128xf32> to vector<512x128xf32>
    %9 = arith.addf %6, %8 : vector<512x128xf32>
    %cst_8 = arith.constant 0.000000e+00 : f32
    %10 = vector.broadcast %cst_8 : f32 to vector<512x128xf32>
    %11 = arith.maximumf %9, %10 : vector<512x128xf32>
    %12 = vector.shape_cast %11 : vector<512x128xf32> to vector<2x16x16x128xf32>
    %13 = vector.shape_cast %12 : vector<2x16x16x128xf32> to vector<2x16x8x2x128xf32>
    %cst_9 = arith.constant dense<0xFF800000> : vector<2x16x8x128xf32>
    %14 = vector.multi_reduction <maximumf>, %13, %cst_9 [3] : vector<2x16x8x2x128xf32> to vector<2x16x8x128xf32>
    %15 = vector.shape_cast %14 : vector<2x16x8x128xf32> to vector<2x8x2x8x128xf32>
    %cst_10 = arith.constant dense<0xFF800000> : vector<2x8x8x128xf32>
    %16 = vector.multi_reduction <maximumf>, %15, %cst_10 [2] : vector<2x8x2x8x128xf32> to vector<2x8x8x128xf32>
    %cst_11 = arith.constant 0.000000e+00 : f32
    %17 = vector.broadcast %cst_11 : f32 to vector<2x10x10x128xf32>
    %c0_12 = arith.constant 0 : index
    %c0_13 = arith.constant 0 : index
    %c0_14 = arith.constant 0 : index
    %c0_15 = arith.constant 0 : index
    %18 = vector.load %arg13[%c0_12, %c0_13, %c0_14, %c0_15] : memref<2x10x10x128xf32, #tpu.memory_space<vmem>>, vector<2x10x10x128xf32>
    tpu.vector_store %arg13[%c0_12, %c0_13, %c0_14, %c0_15], %17 {strides = array<i32>} : memref<2x10x10x128xf32, #tpu.memory_space<vmem>>, vector<2x10x10x128xf32>,
    %c0_16 = arith.constant 0 : index
    %c1 = arith.constant 1 : index
    %c1_17 = arith.constant 1 : index
    %c0_18 = arith.constant 0 : index
    %19 = vector.load %arg13[%c0_16, %c1, %c1_17, %c0_18] : memref<2x10x10x128xf32, #tpu.memory_space<vmem>>, vector<2x8x8x128xf32>
    tpu.vector_store %arg13[%c0_16, %c1, %c1_17, %c0_18], %16 {strides = array<i32>} : memref<2x10x10x128xf32, #tpu.memory_space<vmem>>, vector<2x8x8x128xf32>,
    %c0_19 = arith.constant 0 : index
    %c0_20 = arith.constant 0 : index
    %c0_21 = arith.constant 0 : index
    %c0_22 = arith.constant 0 : index
    %20 = vector.load %arg13[%c0_19, %c0_20, %c0_21, %c0_22] : memref<2x10x10x128xf32, #tpu.memory_space<vmem>>, vector<2x8x8x128xf32>
    %c0_23 = arith.constant 0 : index
    %c0_24 = arith.constant 0 : index
    %c1_25 = arith.constant 1 : index
    %c0_26 = arith.constant 0 : index
    %21 = vector.load %arg13[%c0_23, %c0_24, %c1_25, %c0_26] : memref<2x10x10x128xf32, #tpu.memory_space<vmem>>, vector<2x8x8x128xf32>
    %c0_27 = arith.constant 0 : index
    %c0_28 = arith.constant 0 : index
    %c2 = arith.constant 2 : index
    %c0_29 = arith.constant 0 : index
    %22 = vector.load %arg13[%c0_27, %c0_28, %c2, %c0_29] : memref<2x10x10x128xf32, #tpu.memory_space<vmem>>, vector<2x8x8x128xf32>
    %c0_30 = arith.constant 0 : index
    %c1_31 = arith.constant 1 : index
    %c0_32 = arith.constant 0 : index
    %c0_33 = arith.constant 0 : index
    %23 = vector.load %arg13[%c0_30, %c1_31, %c0_32, %c0_33] : memref<2x10x10x128xf32, #tpu.memory_space<vmem>>, vector<2x8x8x128xf32>
    %c0_34 = arith.constant 0 : index
    %c1_35 = arith.constant 1 : index
    %c1_36 = arith.constant 1 : index
    %c0_37 = arith.constant 0 : index
    %24 = vector.load %arg13[%c0_34, %c1_35, %c1_36, %c0_37] : memref<2x10x10x128xf32, #tpu.memory_space<vmem>>, vector<2x8x8x128xf32>
    %c0_38 = arith.constant 0 : index
    %c1_39 = arith.constant 1 : index
    %c2_40 = arith.constant 2 : index
    %c0_41 = arith.constant 0 : index
    %25 = vector.load %arg13[%c0_38, %c1_39, %c2_40, %c0_41] : memref<2x10x10x128xf32, #tpu.memory_space<vmem>>, vector<2x8x8x128xf32>
    %c0_42 = arith.constant 0 : index
    %c2_43 = arith.constant 2 : index
    %c0_44 = arith.constant 0 : index
    %c0_45 = arith.constant 0 : index
    %26 = vector.load %arg13[%c0_42, %c2_43, %c0_44, %c0_45] : memref<2x10x10x128xf32, #tpu.memory_space<vmem>>, vector<2x8x8x128xf32>
    %c0_46 = arith.constant 0 : index
    %c2_47 = arith.constant 2 : index
    %c1_48 = arith.constant 1 : index
    %c0_49 = arith.constant 0 : index
    %27 = vector.load %arg13[%c0_46, %c2_47, %c1_48, %c0_49] : memref<2x10x10x128xf32, #tpu.memory_space<vmem>>, vector<2x8x8x128xf32>
    %c0_50 = arith.constant 0 : index
    %c2_51 = arith.constant 2 : index
    %c2_52 = arith.constant 2 : index
    %c0_53 = arith.constant 0 : index
    %28 = vector.load %arg13[%c0_50, %c2_51, %c2_52, %c0_53] : memref<2x10x10x128xf32, #tpu.memory_space<vmem>>, vector<2x8x8x128xf32>
    %29 = tpu.concatenate %20, %21, %22, %23, %24, %25, %26, %27, %28 in 3 : vector<2x8x8x128xf32>, vector<2x8x8x128xf32>, vector<2x8x8x128xf32>, vector<2x8x8x128xf32>, vector<2x8x8x128xf32>, vector<2x8x8x128xf32>, vector<2x8x8x128xf32>, vector<2x8x8x128xf32>, vector<2x8x8x128xf32> -> vector<2x8x8x1152xf32>
    %30 = vector.shape_cast %29 : vector<2x8x8x1152xf32> to vector<128x1152xf32>
    %31 = arith.truncf %30 : vector<128x1152xf32> to vector<128x1152xbf16>
    %c0_54 = arith.constant 0 : index
    %c0_55 = arith.constant 0 : index
    %32 = vector.load %arg5[%c0_54, %c0_55] : memref<1152x128xbf16, #tpu.memory_space<vmem>>, vector<1152x128xbf16>
    %cst_56 = arith.constant dense<0.000000e+00> : vector<128x128xf32>
    %33 = tpu.matmul %31, %32, %cst_56 {dimension_numbers = #tpu.dot_dimension_numbers<[1], [0], [0], [1], [0, 0, 1, 1], [], []>} : vector<128x1152xbf16>, vector<1152x128xbf16>, vector<128x128xf32> -> vector<128x128xf32>
    %c0_57 = arith.constant 0 : index
    %c0_58 = arith.constant 0 : index
    %34 = vector.load %arg6[%c0_57, %c0_58] : memref<1x128xf32, #tpu.memory_space<vmem>>, vector<1x128xf32>
    %35 = vector.broadcast %34 : vector<1x128xf32> to vector<128x128xf32>
    %36 = arith.mulf %33, %35 : vector<128x128xf32>
    %c0_59 = arith.constant 0 : index
    %c0_60 = arith.constant 0 : index
    %37 = vector.load %arg7[%c0_59, %c0_60] : memref<1x128xf32, #tpu.memory_space<vmem>>, vector<1x128xf32>
    %38 = vector.broadcast %37 : vector<1x128xf32> to vector<128x128xf32>
    %39 = arith.addf %36, %38 : vector<128x128xf32>
    %cst_61 = arith.constant 0.000000e+00 : f32
    %40 = vector.broadcast %cst_61 : f32 to vector<128x128xf32>
    %41 = arith.maximumf %39, %40 : vector<128x128xf32>
    %42 = vector.shape_cast %41 : vector<128x128xf32> to vector<2x64x128xf32>
    %cst_62 = arith.constant dense<0.000000e+00> : vector<2x128xf32>
    %43 = vector.multi_reduction <add>, %42, %cst_62 [1] : vector<2x64x128xf32> to vector<2x128xf32>
    %cst_63 = arith.constant 6.400000e+01 : f32
    %44 = vector.broadcast %cst_63 : f32 to vector<2x128xf32>
    %45 = arith.divf %43, %44 : vector<2x128xf32>
    %46 = arith.truncf %45 : vector<2x128xf32> to vector<2x128xbf16>
    %c0_64 = arith.constant 0 : index
    %c0_65 = arith.constant 0 : index
    %47 = vector.load %arg8[%c0_64, %c0_65] : memref<128x128xbf16, #tpu.memory_space<vmem>>, vector<128x128xbf16>
    %cst_66 = arith.constant dense<0.000000e+00> : vector<2x128xf32>
    %48 = tpu.matmul %46, %47, %cst_66 {dimension_numbers = #tpu.dot_dimension_numbers<[1], [0], [0], [1], [0, 0, 1, 1], [], []>} : vector<2x128xbf16>, vector<128x128xbf16>, vector<2x128xf32> -> vector<2x128xf32>
    %c0_67 = arith.constant 0 : index
    %c0_68 = arith.constant 0 : index
    %49 = vector.load %arg9[%c0_67, %c0_68] : memref<1x128xf32, #tpu.memory_space<vmem>>, vector<1x128xf32>
    %50 = vector.broadcast %49 : vector<1x128xf32> to vector<2x128xf32>
    %51 = arith.addf %48, %50 : vector<2x128xf32>
    %cst_69 = arith.constant 0.000000e+00 : f32
    %52 = vector.broadcast %cst_69 : f32 to vector<2x128xf32>
    %53 = arith.maximumf %51, %52 : vector<2x128xf32>
    %54 = arith.truncf %53 : vector<2x128xf32> to vector<2x128xbf16>
    %c0_70 = arith.constant 0 : index
    %c0_71 = arith.constant 0 : index
    %55 = vector.load %arg10[%c0_70, %c0_71] : memref<128x128xbf16, #tpu.memory_space<vmem>>, vector<128x128xbf16>
    %cst_72 = arith.constant dense<0.000000e+00> : vector<2x128xf32>
    %56 = tpu.matmul %54, %55, %cst_72 {dimension_numbers = #tpu.dot_dimension_numbers<[1], [0], [0], [1], [0, 0, 1, 1], [], []>} : vector<2x128xbf16>, vector<128x128xbf16>, vector<2x128xf32> -> vector<2x128xf32>
    %c0_73 = arith.constant 0 : index
    %c0_74 = arith.constant 0 : index
    %57 = vector.load %arg11[%c0_73, %c0_74] : memref<1x128xf32, #tpu.memory_space<vmem>>, vector<1x128xf32>
    %58 = vector.broadcast %57 : vector<1x128xf32> to vector<2x128xf32>
    %59 = arith.addf %56, %58 : vector<2x128xf32>
    %c0_75 = arith.constant 0 : index
    %c0_76 = arith.constant 0 : index
    %c0_77 = arith.constant 0 : index
    %60 = vector.load %arg12[%c0_75, %c0_76, %c0_77] : memref<1x2x128xf32, #tpu.memory_space<vmem>>, vector<1x2x128xf32>
    %61 = vector.shape_cast %60 : vector<1x2x128xf32> to vector<2x128xf32>
    %62 = vector.shape_cast %59 : vector<2x128xf32> to vector<1x2x128xf32>
    tpu.vector_store %arg12[%c0_75, %c0_76, %c0_77], %62 {strides = array<i32>} : memref<1x2x128xf32, #tpu.memory_space<vmem>>, vector<1x2x128xf32>,
    return
  }
  func.func @transform_0(%arg0: i32) -> (i32, i32, i32) {
    %c0_i32 = arith.constant 0 : i32
    %c0_i32_0 = arith.constant 0 : i32
    %c0_i32_1 = arith.constant 0 : i32
    return %arg0, %c0_i32, %c0_i32_0 : i32, i32, i32
  }
  func.func @transform_1(%arg0: i32) -> (i32, i32) {
    %c0_i32 = arith.constant 0 : i32
    %c0_i32_0 = arith.constant 0 : i32
    %c0_i32_1 = arith.constant 0 : i32
    return %c0_i32, %c0_i32_0 : i32, i32
  }
  func.func @transform_2(%arg0: i32) -> (i32, i32) {
    %c0_i32 = arith.constant 0 : i32
    %c0_i32_0 = arith.constant 0 : i32
    %c0_i32_1 = arith.constant 0 : i32
    return %c0_i32, %c0_i32_0 : i32, i32
  }
  func.func @transform_3(%arg0: i32) -> (i32, i32) {
    %c0_i32 = arith.constant 0 : i32
    %c0_i32_0 = arith.constant 0 : i32
    %c0_i32_1 = arith.constant 0 : i32
    return %c0_i32, %c0_i32_0 : i32, i32
  }
  func.func @transform_4(%arg0: i32) -> (i32, i32) {
    %c0_i32 = arith.constant 0 : i32
    %c0_i32_0 = arith.constant 0 : i32
    %c0_i32_1 = arith.constant 0 : i32
    return %c0_i32, %c0_i32_0 : i32, i32
  }
  func.func @transform_5(%arg0: i32) -> (i32, i32) {
    %c0_i32 = arith.constant 0 : i32
    %c0_i32_0 = arith.constant 0 : i32
    %c0_i32_1 = arith.constant 0 : i32
    return %c0_i32, %c0_i32_0 : i32, i32
  }
  func.func @transform_6(%arg0: i32) -> (i32, i32) {
    %c0_i32 = arith.constant 0 : i32
    %c0_i32_0 = arith.constant 0 : i32
    %c0_i32_1 = arith.constant 0 : i32
    return %c0_i32, %c0_i32_0 : i32, i32
  }
  func.func @transform_7(%arg0: i32) -> (i32, i32) {
    %c0_i32 = arith.constant 0 : i32
    %c0_i32_0 = arith.constant 0 : i32
    %c0_i32_1 = arith.constant 0 : i32
    return %c0_i32, %c0_i32_0 : i32, i32
  }
  func.func @transform_8(%arg0: i32) -> (i32, i32) {
    %c0_i32 = arith.constant 0 : i32
    %c0_i32_0 = arith.constant 0 : i32
    %c0_i32_1 = arith.constant 0 : i32
    return %c0_i32, %c0_i32_0 : i32, i32
  }
  func.func @transform_9(%arg0: i32) -> (i32, i32) {
    %c0_i32 = arith.constant 0 : i32
    %c0_i32_0 = arith.constant 0 : i32
    %c0_i32_1 = arith.constant 0 : i32
    return %c0_i32, %c0_i32_0 : i32, i32
  }
  func.func @transform_10(%arg0: i32) -> (i32, i32) {
    %c0_i32 = arith.constant 0 : i32
    %c0_i32_0 = arith.constant 0 : i32
    %c0_i32_1 = arith.constant 0 : i32
    return %c0_i32, %c0_i32_0 : i32, i32
  }
  func.func @transform_11(%arg0: i32) -> (i32, i32, i32) {
    %c0_i32 = arith.constant 0 : i32
    %c0_i32_0 = arith.constant 0 : i32
    %c0_i32_1 = arith.constant 0 : i32
    return %arg0, %c0_i32, %c0_i32_0 : i32, i32, i32
  }
}

</mosaic_0001>

<bundles_post_ra>
// kernel: _lambda_.1
= control target key start
LH: loop header
LB: loop body
LE: loop exit
PB: predicated region body
PF: predicated region fallthrough
CT: control target
= control target key end

     0   :  { %s8965_s0 = inlined_call_operand.vmem [shape: bf16[2,256,128], index: 0, kind: input, shape index: {}]   ;;  %s8966_s1 = inlined_call_operand.vmem [shape: bf16[128,128], index: 1, kind: input, shape index: {}]   ;;  %s8967_s2 = inlined_call_operand.vmem [shape: f32[1,128], index: 2, kind: input, shape index: {}]   ;;  %s8968_s3 = inlined_call_operand.vmem [shape: f32[1,128], index: 3, kind: input, shape index: {}]   ;;  %s8969_s4 = inlined_call_operand.vmem [shape: bf16[1152,128], index: 4, kind: input, shape index: {}]   ;;  %s8970_s5 = inlined_call_operand.vmem [shape: f32[1,128], index: 5, kind: input, shape index: {}]   ;;  %s8971_s6 = inlined_call_operand.vmem [shape: f32[1,128], index: 6, kind: input, shape index: {}]   ;;  %s8972_s7 = inlined_call_operand.vmem [shape: bf16[128,128], index: 7, kind: input, shape index: {}]   ;;  %s8973_s8 = inlined_call_operand.vmem [shape: f32[1,128], index: 8, kind: input, shape index: {}]   ;;  %s8974_s9 = inlined_call_operand.vmem [shape: bf16[128,128], index: 9, kind: input, shape index: {}]   ;;  %s8975_s10 = inlined_call_operand.vmem [shape: f32[1,128], index: 10, kind: input, shape index: {}]   ;;  %s8976_s11 = inlined_call_operand.hbm [shape: f32[1,2,128], index: 11, kind: output, shape index: {}]  }
   0x1   :  { %v6741_v0 = vld [vmem:[%s8966_s1] sm:$0xff]   ;;  %v6742_v1 = vld [vmem:[%s8966_s1 + $0x8] sm:$0xff]   ;;  %v6743_v2 = vld [vmem:[%s8966_s1 + $0x10] sm:$0xff]  }
   0x2   :  { %6585 = vmatprep.subr.bf16.mxu0 %v6741_v0  ;;  %v6744_v3 = vld [vmem:[%s8966_s1 + $0x18] sm:$0xff]   ;;  %v6749_v4 = vld [vmem:[%s8965_s0] sm:$0xff]   ;;  %v6746_v6 = vld [vmem:[%s8966_s1 + $0x28] sm:$0xff]  }
   0x3   :  { %6586 = vmatpush3.bf16.msra.mxu0 %v6741_v0  ;;  %6601 = vmatprep.mubr.bf16.mxu0 %v6749_v4  ;;  %v6745_v5 = vld [vmem:[%s8966_s1 + $0x20] sm:$0xff]   ;;  %v6747_v7 = vld [vmem:[%s8966_s1 + $0x30] sm:$0xff]   ;;  %v6748_v8 = vld [vmem:[%s8966_s1 + $0x38] sm:$0xff]  }
   0x4   :  { %6587 = vmatprep.subr.bf16.mxu0 %v6742_v1  ;;  %v6750_v9 = vld [vmem:[%s8965_s0 + $0x8] sm:$0xff]   ;;  %v6751_v10 = vld [vmem:[%s8965_s0 + $0x10] sm:$0xff]   ;;  %v6752_v11 = vld [vmem:[%s8965_s0 + $0x18] sm:$0xff]  }
   0x5   :  { %v6753_v12 = vld [vmem:[%s8965_s0 + $0x20] sm:$0xff]   ;;  %v6754_v13 = vld [vmem:[%s8965_s0 + $0x28] sm:$0xff]   ;;  %v6755_v14 = vld [vmem:[%s8965_s0 + $0x30] sm:$0xff]  }
   0x6   :  { %v6756_v15 = vld [vmem:[%s8965_s0 + $0x38] sm:$0xff]   ;;  %v6757_v16 = vld [vmem:[%s8965_s0 + $0x40] sm:$0xff]   ;;  %v6758_v17 = vld [vmem:[%s8965_s0 + $0x48] sm:$0xff]  }
   0x7   :  { %6588 = vmatpush3.bf16.msra.mxu0 %v6742_v1  ;;  %v6759_v18 = vld [vmem:[%s8965_s0 + $0x50] sm:$0xff]   ;;  %v6760_v19 = vld [vmem:[%s8965_s0 + $0x58] sm:$0xff]   ;;  %v6761_v20 = vld [vmem:[%s8965_s0 + $0x60] sm:$0xff]  }
   0x8   :  { %6589 = vmatprep.subr.bf16.mxu0 %v6743_v2  ;;  %v6762_v21 = vld [vmem:[%s8965_s0 + $0x68] sm:$0xff]   ;;  %v6763_v22 = vld [vmem:[%s8965_s0 + $0x70] sm:$0xff]   ;;  %v6764_v23 = vld [vmem:[%s8965_s0 + $0x78] sm:$0xff]  }
   0x9   :  { %v6765_v24 = vld [vmem:[%s8965_s0 + $0x80] sm:$0xff]   ;;  %v6766_v25 = vld [vmem:[%s8965_s0 + $0x88] sm:$0xff]   ;;  %v6767_v26 = vld [vmem:[%s8965_s0 + $0x90] sm:$0xff]  }
   0xb   :  { %6590 = vmatpush3.bf16.msra.mxu0 %v6743_v2 }
   0xc   :  { %6591 = vmatprep.subr.bf16.mxu0 %v6744_v3 }
   0xf   :  { %6592 = vmatpush3.bf16.msra.mxu0 %v6744_v3 }
  0x10   :  { %6593 = vmatprep.subr.bf16.mxu0 %v6745_v5 }
  0x13   :  { %6594 = vmatpush3.bf16.msra.mxu0 %v6745_v5 }
  0x14   :  { %6595 = vmatprep.subr.bf16.mxu0 %v6746_v6 }
  0x17   :  { %6596 = vmatpush3.bf16.msra.mxu0 %v6746_v6 }
  0x18   :  { %6597 = vmatprep.subr.bf16.mxu0 %v6747_v7 }
  0x1b   :  { %6598 = vmatpush3.bf16.msra.mxu0 %v6747_v7 }
  0x1c   :  { %6599 = vmatprep.subr.bf16.mxu0 %v6748_v8 }
  0x1f   :  { %6600 = vmatpush3.bf16.msra.mxu0 %v6748_v8 }
  0x22   :  { %6602 = vmatmul.mubr.bf16.vlgmr.msra.gmra.mrb[0].mxu0 %v6750_v9 }
  0x23   :  { %6605 = vmatprep.mubr.bf16.mxu0 %v6751_v10 }
  0x2a   :  { %6606 = vmatmul.mubr.bf16.gmra.mrb[4].mxu0 %v6752_v11 }
  0x2b   :  { %6609 = vmatprep.mubr.bf16.mxu0 %v6753_v12 }
  0x32   :  { %6610 = vmatmul.mubr.bf16.gmra.mrb[8].mxu0 %v6754_v13 }
  0x33   :  { %6613 = vmatprep.mubr.bf16.mxu0 %v6755_v14 }
  0x3a   :  { %6614 = vmatmul.mubr.bf16.gmra.mrb[12].mxu0 %v6756_v15 }
  0x3b   :  { %6617 = vmatprep.mubr.bf16.mxu0 %v6757_v16 }
  0x42   :  { %6618 = vmatmul.mubr.bf16.gmra.mrb[16].mxu0 %v6758_v17 }
  0x43   :  { %6621 = vmatprep.mubr.bf16.mxu0 %v6759_v18 }
  0x4a   :  { %6622 = vmatmul.mubr.bf16.gmra.mrb[20].mxu0 %v6760_v19 }
  0x4b   :  { %6625 = vmatprep.mubr.bf16.mxu0 %v6761_v20 }
  0x52   :  { %6626 = vmatmul.mubr.bf16.gmra.mrb[24].mxu0 %v6762_v21 }
  0x53   :  { %6629 = vmatprep.mubr.bf16.mxu0 %v6763_v22 }
  0x5a   :  { %6630 = vmatmul.mubr.bf16.gmra.mrb[28].mxu0 %v6764_v23 }
  0x5b   :  { %6633 = vmatprep.mubr.bf16.mxu0 %v6765_v24 }
  0x62   :  { %6634 = vmatmul.mubr.bf16.gmra.mrb[32].mxu0 %v6766_v25 }
  0x63   :  { %16 = vsyncpa [#allocation4], 0  ;;  %6637 = vmatprep.mubr.bf16.mxu0 %v6767_v26  ;;  %v6768_v27 = vld [vmem:[%s8965_s0 + $0x98] sm:$0xff]   ;;  %v6769_v28 = vld [vmem:[%s8965_s0 + $0xa0] sm:$0xff]   ;;  %v6904_v40 = vmov 0.0   ;;  %v923_v53 = vlaneseq  ;;  %vm2263_vm0 = vcmask 1041408  }
  0x64   :  { %v6770_v29 = vld [vmem:[%s8965_s0 + $0xa8] sm:$0xff]   ;;  %v6771_v30 = vld [vmem:[%s8965_s0 + $0xb0] sm:$0xff]   ;;  %v6772_v31 = vld [vmem:[%s8965_s0 + $0xb8] sm:$0xff]   ;;  %4186 = vst [vmem:[#allocation2 + $0x10] sm:$0xff] %v6904_v40  ;;  %v6905_v51 = vmov 1983009808  }
  0x65   :  { %v6773_v32 = vld [vmem:[%s8965_s0 + $0xc0] sm:$0xff]   ;;  %v6774_v33 = vld [vmem:[%s8965_s0 + $0xc8] sm:$0xff]   ;;  %v6775_v34 = vld [vmem:[%s8965_s0 + $0xd0] sm:$0xff]   ;;  %4187 = vst [vmem:[#allocation2 + $0x18] sm:$0x3] %v6904_v40  ;;  %v921_v52 = vunpack.c.l.s4 %v6905_v51  ;;  %v924_v56 = vshrl.u32 %v923_v53, 7 }
  0x66   :  { %v6776_v35 = vld [vmem:[%s8965_s0 + $0xd8] sm:$0xff]   ;;  %v6777_v36 = vld [vmem:[%s8965_s0 + $0xe0] sm:$0xff]   ;;  %v6778_v37 = vld [vmem:[%s8965_s0 + $0xe8] sm:$0xff]   ;;  %4184 = vst [vmem:[#allocation2] sm:$0xff] %v6904_v40  ;;  %vm4352_vm1 = vcmask 1041409   ;;  %vm4354_vm2 = vcmask 1042434  }
  0x67   :  { %v6779_v38 = vld [vmem:[%s8965_s0 + $0xf0] sm:$0xff]   ;;  %v6780_v39 = vld [vmem:[%s8965_s0 + $0xf8] sm:$0xff]   ;;  %4185 = vst [vmem:[#allocation2 + $0x8] sm:$0x3] %v6904_v40  ;;  %4188 = vst [vmem:[#allocation2 + $0x20] sm:$0xff] %v6904_v40  ;;  %v922_v55 = vunpack.c.0.s8 %v921_v52  ;;  %vm4356_vm3 = vcmask 1043459  }
  0x68   :  { %4189 = vst [vmem:[#allocation2 + $0x28] sm:$0x3] %v6904_v40  ;;  %4190 = vst [vmem:[#allocation2 + $0x30] sm:$0xff] %v6904_v40  ;;  %v6781_v41 = vld [vmem:[%s8969_s4 + $0x40] sm:$0xff]   ;;  %v6783_v43 = vld [vmem:[%s8969_s4 + $0x48] sm:$0xff]   ;;  %vm4358_vm4 = vcmask 1044484  }
  0x69   :  { %4191 = vst [vmem:[#allocation2 + $0x38] sm:$0x3] %v6904_v40  ;;  %4192 = vst [vmem:[#allocation2 + $0x40] sm:$0xff] %v6904_v40  ;;  %v6782_v42 = vld [vmem:[%s8969_s4] sm:$0xff]   ;;  %6295 = vmatprep.subr.bf16.mxu1 %v6781_v41  ;;  %v6784_v44 = vld [vmem:[%s8969_s4 + $0x8] sm:$0xff]   ;;  %v7131_v0 = vsub.s32 %v922_v55, %v924_v56  ;;  %vm4360_vm5 = vcmask 1045509  }
  0x6a   :  { %6638 = vmatmul.mubr.bf16.gmra.mrb[36].mxu0 %v6768_v27  ;;  %4193 = vst [vmem:[#allocation2 + $0x48] sm:$0x3] %v6904_v40  ;;  %4194 = vst [vmem:[#allocation2 + $0x50] sm:$0xff] %v6904_v40  ;;  %6296 = vmatpush3.bf16.msra.mxu1 %v6782_v42  ;;  %v6785_v45 = vld [vmem:[%s8969_s4 + $0x50] sm:$0xff]   ;;  %v6786_v46 = vld [vmem:[%s8969_s4 + $0x140] sm:$0xff]   ;;  %vm4362_vm6 = vcmask 1046534  }
  0x6b   :  { %6641 = vmatprep.mubr.bf16.mxu0 %v6769_v28  ;;  %4195 = vst [vmem:[#allocation2 + $0x58] sm:$0x3] %v6904_v40  ;;  %4196 = vst [vmem:[#allocation2 + $0x60] sm:$0xff] %v6904_v40  ;;  %6297 = vmatprep.subr.bf16.mxu1 %v6783_v43  ;;  %v6787_v47 = vld [vmem:[%s8969_s4 + $0x10] sm:$0xff]   ;;  %v6788_v48 = vld [vmem:[%s8969_s4 + $0x100] sm:$0xff]   ;;  %vm4364_vm7 = vcmask 1047559  }
  0x6c   :  { %4197 = vst [vmem:[#allocation2 + $0x68] sm:$0x3] %v6904_v40  ;;  %4198 = vst [vmem:[#allocation2 + $0x70] sm:$0xff] %v6904_v40  ;;  %6423 = vmatprep.subr.bf16.mxu0 %v6786_v46  ;;  %v6789_v49 = vld [vmem:[%s8969_s4 + $0x58] sm:$0xff]   ;;  %v6790_v50 = vld [vmem:[%s8969_s4 + $0x148] sm:$0xff]   ;;  %vm6906_vm8 = vmmov 0  }
  0x6d   :  { %4199 = vst [vmem:[#allocation2 + $0x78] sm:$0x3] %v6904_v40  ;;  %4200 = vst [vmem:[#allocation2 + $0x80] sm:$0xff] %v6904_v40  ;;  %6424 = vmatpush3.bf16.msra.mxu0 %v6788_v48  ;;  %v7121_v54 = vld [vmem:[%s8967_s2] ss:$0 sm:$0xff]  ;;  %v6791_v7 = vld [vmem:[%s8969_s4 + $0x18] sm:$0xff]  }
  0x6e   :  { %4201 = vst [vmem:[#allocation2 + $0x88] sm:$0x3] %v6904_v40  ;;  %4202 = vst [vmem:[#allocation2 + $0x90] sm:$0xff] %v6904_v40  ;;  %6298 = vmatpush3.bf16.msra.mxu1 %v6784_v44  ;;  %6425 = vmatprep.subr.bf16.mxu0 %v6790_v50  ;;  %v7126_v58 = vld [vmem:[%s8968_s3] ss:$0 sm:$0xff]  ;;  %v6792_v8 = vld [vmem:[%s8969_s4 + $0x108] sm:$0xff]  }
  0x6f   :  { %4203 = vst [vmem:[#allocation2 + $0x98] sm:$0x3] %v6904_v40  ;;  %4204 = vst [vmem:[#allocation2 + $0xa0] sm:$0xff] %v6904_v40  ;;  %6299 = vmatprep.subr.bf16.mxu1 %v6785_v45  ;;  %v6793_v55 = vld [vmem:[%s8969_s4 + $0x60] sm:$0xff]   ;;  %v6794_v56 = vld [vmem:[%s8969_s4 + $0x150] sm:$0xff]   ;;  %s6907_s0 = smov [#allocation3]  }
  0x70   :  { %4205 = vst [vmem:[#allocation2 + $0xa8] sm:$0x3] %v6904_v40  ;;  %4206 = vst [vmem:[#allocation2 + $0xb0] sm:$0xff] %v6904_v40  ;;  %s6113_s18 = sshll.u32 %s6907_s0, 4  ;;  %s6114_s18 = int_to_ptr.vmem [resolvable:$true] %s6113_s18 }
  0x71   :  { %4207 = vst [vmem:[#allocation2 + $0xb8] sm:$0x3] %v6904_v40  ;;  %4208 = vst [vmem:[#allocation2 + $0xc0] sm:$0xff] %v6904_v40  ;;  %6426 = vmatpush3.bf16.msra.mxu0 %v6792_v8  ;;  %p6885_p1 = scmp.lt.s32.totalorder %s6114_s18, %s6114_s18 }
  0x72   :  { %6642 = vmatmul.mubr.bf16.gmra.mrb[40].mxu0 %v6770_v29  ;;  %4209 = vst [vmem:[#allocation2 + $0xc8] sm:$0x3] %v6904_v40  ;;  %4210 = vst [vmem:[#allocation2 + $0xd0] sm:$0xff] %v6904_v40  ;;  %6300 = vmatpush3.bf16.msra.mxu1 %v6787_v47 }
  0x73   :  { %6645 = vmatprep.mubr.bf16.mxu0 %v6771_v30  ;;  %4211 = vst [vmem:[#allocation2 + $0xd8] sm:$0x3] %v6904_v40  ;;  %4212 = vst [vmem:[#allocation2 + $0xe0] sm:$0xff] %v6904_v40  ;;  %6301 = vmatprep.subr.bf16.mxu1 %v6789_v49 }
  0x74   :  { %4213 = vst [vmem:[#allocation2 + $0xe8] sm:$0x3] %v6904_v40  ;;  %4214 = vst [vmem:[#allocation2 + $0xf0] sm:$0xff] %v6904_v40  ;;  %6427 = vmatprep.subr.bf16.mxu0 %v6794_v56 }
  0x75   :  { %4215 = vst [vmem:[#allocation2 + $0xf8] sm:$0x3] %v6904_v40  ;;  %4216 = vst [vmem:[#allocation2 + $0x100] sm:$0xff] %v6904_v40 }
  0x76   :  { %4217 = vst [vmem:[#allocation2 + $0x108] sm:$0x3] %v6904_v40  ;;  %4218 = vst [vmem:[#allocation2 + $0x110] sm:$0xff] %v6904_v40  ;;  %6302 = vmatpush3.bf16.msra.mxu1 %v6791_v7 }
  0x77   :  { %4219 = vst [vmem:[#allocation2 + $0x118] sm:$0x3] %v6904_v40  ;;  %4220 = vst [vmem:[#allocation2 + $0x120] sm:$0xff] %v6904_v40  ;;  %6303 = vmatprep.subr.bf16.mxu1 %v6793_v55 }
  0x78   :  { %4221 = vst [vmem:[#allocation2 + $0x128] sm:$0x3] %v6904_v40  ;;  %4222 = vst [vmem:[#allocation2 + $0x130] sm:$0xff] %v6904_v40 }
  0x79   :  { %4223 = vst [vmem:[#allocation2 + $0x138] sm:$0x3] %v6904_v40 }
  0x7a   :  { %6646 = vmatmul.mubr.bf16.gmra.mrb[44].mxu0 %v6772_v31 }
  0x7b   :  { %6649 = vmatprep.mubr.bf16.mxu0 %v6773_v32 }
  0x82   :  { %6650 = vmatmul.mubr.bf16.gmra.mrb[48].mxu0 %v6774_v33 }
  0x83   :  { %6653 = vmatprep.mubr.bf16.mxu0 %v6775_v34 }
  0x8a   :  { %6654 = vmatmul.mubr.bf16.gmra.mrb[52].mxu0 %v6776_v35 }
  0x8b   :  { %6657 = vmatprep.mubr.bf16.mxu0 %v6777_v36 }
  0x92   :  { %6658 = vmatmul.mubr.bf16.gmra.mrb[56].mxu0 %v6778_v37 }
  0x93   :  { %6661 = vmatprep.mubr.bf16.mxu0 %v6779_v38 }
  0x9a   :  { %6662 = vmatmul.mubr.bf16.gmra.mrb[60].mxu0 %v6780_v39 }
  0xf5   :  { %v6603_v57 = vpop.f32.mrb[0].mxu0 }
  0xf6   :  { %v658_v59 = vmul.f32 %v6603_v57, %v7121_v54  ;;  %v394_v60 = vpop.f32.mrb[1].mxu0 }
  0xf7   :  { %v656_v61 = vmul.f32 %v7121_v54, %v394_v60  ;;  %v6604_v62 = vpop.f32.mrb[2].mxu0 }
  0xf8   :  { %v729_v63 = vadd.f32 %v7126_v58, %v658_v59  ;;  %v659_v1 = vmul.f32 %v6604_v62, %v7121_v54  ;;  %v397_v2 = vpop.f32.mrb[3].mxu0 }
  0xf9   :  { %v727_v3 = vadd.f32 %v7126_v58, %v656_v61  ;;  %v657_v4 = vmul.f32 %v7121_v54, %v397_v2 }
  0xfa   :  { %v793_v5 = vmax.f32 %v729_v63, 0.0  ;;  %v730_v6 = vadd.f32 %v7126_v58, %v659_v1  ;;  %v6795_v63 = vld [vmem:[%s8969_s4 + $0x20] sm:$0xff]   ;;  %v6796_v1 = vld [vmem:[%s8969_s4 + $0x110] sm:$0xff]  }
  0xfb   :  { %v791_v9 = vmax.f32 %v727_v3, 0.0  ;;  %v728_v10 = vadd.f32 %v7126_v58, %v657_v4  ;;  %6304 = vmatpush3.bf16.msra.mxu1 %v6795_v63  ;;  %6428 = vmatpush3.bf16.msra.mxu0 %v6796_v1 }
  0xfc   :  { %v953_v11 = vcombine.high %v793_v5, %v793_v5  ;;  %v960_v12 = vrot.slane %v793_v5, %v7131_v0  ;;  %v7145_v13 = vmax.f32 %v730_v6, 0.0 }
  0xfd   :  { %v919_v14 = vcombine.high %v791_v9, %v791_v9  ;;  %v926_v15 = vrot.slane %v791_v9, %v7131_v0  ;;  %v7148_v16 = vmax.f32 %v728_v10, 0.0  ;;  %v7150_v17 = vpop.f32.mrb[4].mxu0 }
  0xfe   :  { %v967_v18 = vrot.slane %v953_v11, %v7131_v0  ;;  %v968_v19 = vcombine.high %v960_v12, %v960_v12  ;;  %v2320_v20 = vsel %vm2263_vm0, %v960_v12, -inf  ;;  %v970_v21 = vcombine.high %v7145_v13, %v7145_v13  ;;  %v7156_v22 = vpop.f32.mrb[5].mxu0 }
  0xff   :  { %v2321_v23 = vrot.slane %v2320_v20, 4  ;;  %v933_v24 = vrot.slane %v919_v14, %v7131_v0  ;;  %v934_v25 = vcombine.high %v926_v15, %v926_v15  ;;  %v2264_v26 = vsel %vm2263_vm0, %v926_v15, -inf  ;;  %v7160_v27 = vpop.f32.mrb[6].mxu0 }
 0x100   :  { %v969_v28 = vcombine.high %v967_v18, %v967_v18  ;;  %v2327_v29 = vsel %vm2263_vm0, %v968_v19, -inf  ;;  %v2334_v30 = vsel %vm2263_vm0, %v967_v18, -inf  ;;  %v2265_v31 = vrot.slane %v2264_v26, 4  ;;  %v7164_v32 = vpop.f32.mrb[7].mxu0 }
 0x101   :  { %v2322_v33 = vmax.f32 %v2320_v20, %v2321_v23  ;;  %v2328_v34 = vrot.slane %v2327_v29, 4  ;;  %v2335_v35 = vrot.slane %v2334_v30, 4  ;;  %v935_v36 = vcombine.high %v933_v24, %v933_v24 }
 0x102   :  { %v2341_v37 = vsel %vm2263_vm0, %v969_v28, -inf  ;;  %v2266_v38 = vmax.f32 %v2264_v26, %v2265_v31  ;;  %v2271_v39 = vsel %vm2263_vm0, %v934_v25, -inf  ;;  %v2278_v40 = vsel %vm2263_vm0, %v933_v24, -inf }
 0x103   :  { %v2323_v41 = vrot.slane %v2322_v33, 2  ;;  %v2329_v42 = vmax.f32 %v2327_v29, %v2328_v34  ;;  %v2336_v43 = vmax.f32 %v2334_v30, %v2335_v35  ;;  %v2342_v44 = vrot.slane %v2341_v37, 4 }
 0x104   :  { %v2267_v45 = vrot.slane %v2266_v38, 2  ;;  %v2272_v46 = vrot.slane %v2271_v39, 4  ;;  %v2279_v47 = vrot.slane %v2278_v40, 4  ;;  %v2285_v48 = vsel %vm2263_vm0, %v935_v36, -inf }
 0x105   :  { %v2324_v49 = vmax.f32 %v2322_v33, %v2323_v41  ;;  %v2330_v50 = vrot.slane %v2329_v42, 2  ;;  %v2337_v51 = vrot.slane %v2336_v43, 2  ;;  %v2343_v52 = vmax.f32 %v2341_v37, %v2342_v44  ;;  %v7170_v53 = vpop.f32.mrb[8].mxu0 }
 0x106   :  { %v2268_v57 = vmax.f32 %v2266_v38, %v2267_v45  ;;  %v2273_v59 = vmax.f32 %v2271_v39, %v2272_v46  ;;  %v2280_v60 = vmax.f32 %v2278_v40, %v2279_v47  ;;  %v2286_v61 = vrot.slane %v2285_v48, 4  ;;  %v7178_v62 = vpop.f32.mrb[9].mxu0 }
 0x107   :  { %v2325_v2 = vrot.slane %v2324_v49, 1  ;;  %v2331_v3 = vmax.f32 %v2329_v42, %v2330_v50  ;;  %v2338_v4 = vmax.f32 %v2336_v43, %v2337_v51  ;;  %v2344_v5 = vrot.slane %v2343_v52, 2  ;;  %v7186_v6 = vpop.f32.mrb[10].mxu0 }
 0x108   :  { %v2269_v7 = vrot.slane %v2268_v57, 1  ;;  %v2274_v8 = vrot.slane %v2273_v59, 2  ;;  %v2281_v9 = vrot.slane %v2280_v60, 2  ;;  %v2287_v10 = vmax.f32 %v2285_v48, %v2286_v61  ;;  %v7188_v11 = vpop.f32.mrb[11].mxu0 }
 0x109   :  { %v2326_v12 = vmax.f32 %v2324_v49, %v2325_v2  ;;  %v2332_v14 = vrot.slane %v2331_v3, 1  ;;  %v2339_v15 = vrot.slane %v2338_v4, 1  ;;  %v2345_v18 = vmax.f32 %v2343_v52, %v2344_v5 }
 0x10a   :  { %v2270_v19 = vmax.f32 %v2268_v57, %v2269_v7  ;;  %v2275_v20 = vmax.f32 %v2273_v59, %v2274_v8  ;;  %v2282_v23 = vmax.f32 %v2280_v60, %v2281_v9  ;;  %v2288_v24 = vrot.slane %v2287_v10, 2 }
 0x10b   :  { %v2333_v25 = vmax.f32 %v2331_v3, %v2332_v14  ;;  %v2340_v26 = vmax.f32 %v2338_v4, %v2339_v15  ;;  %v2346_v28 = vrot.slane %v2345_v18, 1  ;;  %v977_v29 = vrot.slane %v7145_v13, %v7131_v0 }
 0x10c   :  { %v2276_v30 = vrot.slane %v2275_v20, 1  ;;  %v2283_v31 = vrot.slane %v2282_v23, 1  ;;  %v2289_v33 = vmax.f32 %v2287_v10, %v2288_v24  ;;  %v4056_v34 = vmax.f32 %v2270_v19, %v2326_v12 }
 0x10d   :  { %v7192_v35 = vmax.f32 %v2345_v18, %v2346_v28  ;;  %v984_v36 = vrot.slane %v970_v21, %v7131_v0  ;;  %v985_v37 = vcombine.high %v977_v29, %v977_v29  ;;  %v2348_v38 = vsel %vm2263_vm0, %v977_v29, -inf  ;;  %v7199_v39 = vpop.f32.mrb[12].mxu0 }
 0x10e   :  { %v2277_v40 = vmax.f32 %v2275_v20, %v2276_v30  ;;  %v2284_v41 = vmax.f32 %v2282_v23, %v2283_v31  ;;  %v2290_v42 = vrot.slane %v2289_v33, 1  ;;  %v2349_v43 = vrot.slane %v2348_v38, 4  ;;  %v7201_v44 = vpop.f32.mrb[13].mxu0 }
 0x10f   :  { %v986_v45 = vcombine.high %v984_v36, %v984_v36  ;;  %v2355_v46 = vsel %vm2263_vm0, %v985_v37, -inf  ;;  %v2362_v47 = vsel %vm2263_vm0, %v984_v36, -inf  ;;  %v936_v13 = vcombine.high %v7148_v16, %v7148_v16  ;;  %v7207_v21 = vpop.f32.mrb[14].mxu0  ;;  %v6797_v36 = vld [vmem:[%s8969_s4 + $0x68] sm:$0xff]   ;;  %v6798_v37 = vld [vmem:[%s8969_s4 + $0x158] sm:$0xff]  }
 0x110   :  { %v2291_v48 = vmax.f32 %v2289_v33, %v2290_v42  ;;  %v4057_v49 = vmax.f32 %v2277_v40, %v2333_v25  ;;  %v4058_v50 = vmax.f32 %v2284_v41, %v2340_v26  ;;  %v2350_v51 = vmax.f32 %v2348_v38, %v2349_v43  ;;  %v7209_v52 = vpop.f32.mrb[15].mxu0  ;;  %6305 = vmatprep.subr.bf16.mxu1 %v6797_v36 }
 0x111   :  { %v2356_v55 = vrot.slane %v2355_v46, 4  ;;  %v2363_v56 = vrot.slane %v2362_v47, 4  ;;  %v2369_v57 = vsel %vm2263_vm0, %v986_v45, -inf  ;;  %v943_v59 = vrot.slane %v7148_v16, %v7131_v0  ;;  %6429 = vmatprep.subr.bf16.mxu0 %v6798_v37 }
 0x112   :  { %v4059_v60 = vmax.f32 %v2291_v48, %v7192_v35  ;;  %v4353_v61 = vsel %vm4352_vm1, %v4057_v49, %v4056_v34  ;;  %v2351_v63 = vrot.slane %v2350_v51, 2  ;;  %v2370_v1 = vrot.slane %v2369_v57, 4 }
 0x113   :  { %v4355_v2 = vsel %vm4354_vm2, %v4058_v50, %v4353_v61  ;;  %v2357_v3 = vmax.f32 %v2355_v46, %v2356_v55  ;;  %v2364_v4 = vmax.f32 %v2362_v47, %v2363_v56  ;;  %v950_v5 = vrot.slane %v936_v13, %v7131_v0 }
 0x114   :  { %v2352_v7 = vmax.f32 %v2350_v51, %v2351_v63  ;;  %v2371_v8 = vmax.f32 %v2369_v57, %v2370_v1  ;;  %v951_v9 = vcombine.high %v943_v59, %v943_v59  ;;  %v2292_v10 = vsel %vm2263_vm0, %v943_v59, -inf }
 0x115   :  { %v2358_v12 = vrot.slane %v2357_v3, 2  ;;  %v2365_v14 = vrot.slane %v2364_v4, 2  ;;  %v952_v16 = vcombine.high %v950_v5, %v950_v5  ;;  %v2293_v15 = vrot.slane %v2292_v10, 4  ;;  %v7219_v18 = vpop.f32.mrb[16].mxu0 }
 0x116   :  { %v2353_v19 = vrot.slane %v2352_v7, 1  ;;  %v2372_v20 = vrot.slane %v2371_v8, 2  ;;  %v2299_v23 = vsel %vm2263_vm0, %v951_v9, -inf  ;;  %v2306_v24 = vsel %vm2263_vm0, %v950_v5, -inf  ;;  %v7223_v25 = vpop.f32.mrb[17].mxu0 }
 0x117   :  { %v2359_v26 = vmax.f32 %v2357_v3, %v2358_v12  ;;  %v2366_v28 = vmax.f32 %v2364_v4, %v2365_v14  ;;  %v2294_v29 = vmax.f32 %v2292_v10, %v2293_v15  ;;  %v2300_v30 = vrot.slane %v2299_v23, 4  ;;  %v7233_v51 = vpop.f32.mrb[18].mxu0 }
 0x118   :  { %v2354_v31 = vmax.f32 %v2352_v7, %v2353_v19  ;;  %v2373_v33 = vmax.f32 %v2371_v8, %v2372_v20  ;;  %v2307_v34 = vrot.slane %v2306_v24, 4  ;;  %v2313_v35 = vsel %vm2263_vm0, %v952_v16, -inf  ;;  %v6800_v7 = vld [vmem:[%s8969_s4 + $0x118] sm:$0xff]  }
 0x119   :  { %v2360_v38 = vrot.slane %v2359_v26, 1  ;;  %v2367_v40 = vrot.slane %v2366_v28, 1  ;;  %v2295_v41 = vrot.slane %v2294_v29, 2  ;;  %v2301_v42 = vmax.f32 %v2299_v23, %v2300_v30  ;;  %6430 = vmatpush3.bf16.msra.mxu0 %v6800_v7  ;;  %v7257_v23 = vpop.f32.mrb[19].mxu0 }
 0x11a   :  { %v2374_v43 = vrot.slane %v2373_v33, 1  ;;  %v2308_v45 = vmax.f32 %v2306_v24, %v2307_v34  ;;  %v2314_v46 = vrot.slane %v2313_v35, 4  ;;  %v4357_v47 = vsel %vm4356_vm3, %v4059_v60, %v4355_v2 }
 0x11b   :  { %v2361_v13 = vmax.f32 %v2359_v26, %v2360_v38  ;;  %v2368_v48 = vmax.f32 %v2366_v28, %v2367_v40  ;;  %v2296_v49 = vmax.f32 %v2294_v29, %v2295_v41  ;;  %v2302_v50 = vrot.slane %v2301_v42, 2 }
 0x11c   :  { %v2375_v55 = vmax.f32 %v2373_v33, %v2374_v43  ;;  %v2309_v56 = vrot.slane %v2308_v45, 2  ;;  %v2315_v57 = vmax.f32 %v2313_v35, %v2314_v46  ;;  %v662_v59 = vmul.f32 %v7150_v17, %v7121_v54  ;;  %v6799_v17 = vld [vmem:[%s8969_s4 + $0x28] sm:$0xff]  }
 0x11d   :  { %v2297_v61 = vrot.slane %v2296_v49, 1  ;;  %v2303_v63 = vmax.f32 %v2301_v42, %v2302_v50  ;;  %v660_v60 = vmul.f32 %v7121_v54, %v7156_v22  ;;  %v663_v1 = vmul.f32 %v7160_v27, %v7121_v54  ;;  %6306 = vmatpush3.bf16.msra.mxu1 %v6799_v17 }
 0x11e   :  { %v2310_v2 = vmax.f32 %v2308_v45, %v2309_v56  ;;  %v2316_v3 = vrot.slane %v2315_v57, 2  ;;  %v733_v4 = vadd.f32 %v7126_v58, %v662_v59  ;;  %v661_v5 = vmul.f32 %v7121_v54, %v7164_v32 }
 0x11f   :  { %v2298_v8 = vmax.f32 %v2296_v49, %v2297_v61  ;;  %v2304_v22 = vrot.slane %v2303_v63, 1  ;;  %v731_v9 = vadd.f32 %v7126_v58, %v660_v60  ;;  %v734_v27 = vadd.f32 %v7126_v58, %v663_v1 }
 0x120   :  { %v2311_v10 = vrot.slane %v2310_v2, 1  ;;  %v2317_v12 = vmax.f32 %v2315_v57, %v2316_v3  ;;  %v797_v14 = vmax.f32 %v733_v4, 0.0  ;;  %v7253_v16 = vadd.f32 %v7126_v58, %v661_v5 }
 0x121   :  { %v2305_v32 = vmax.f32 %v2303_v63, %v2304_v22  ;;  %v4060_v15 = vmax.f32 %v2298_v8, %v2354_v31  ;;  %v795_v19 = vmax.f32 %v731_v9, 0.0  ;;  %v7255_v20 = vmax.f32 %v734_v27, 0.0 }
 0x122   :  { %v2312_v24 = vmax.f32 %v2310_v2, %v2311_v10  ;;  %v2318_v26 = vrot.slane %v2317_v12, 1  ;;  %v1021_v28 = vcombine.high %v797_v14, %v797_v14  ;;  %v1028_v29 = vrot.slane %v797_v14, %v7131_v0 }
 0x123   :  { %v4061_v30 = vmax.f32 %v2305_v32, %v2361_v13  ;;  %v4359_v33 = vsel %vm4358_vm4, %v4060_v15, %v4357_v47  ;;  %v987_v34 = vcombine.high %v795_v19, %v795_v19  ;;  %v994_v35 = vrot.slane %v795_v19, %v7131_v0 }
 0x124   :  { %v2319_v36 = vmax.f32 %v2317_v12, %v2318_v26  ;;  %v4062_v37 = vmax.f32 %v2312_v24, %v2368_v48  ;;  %v1035_v31 = vrot.slane %v1021_v28, %v7131_v0  ;;  %v1036_v38 = vcombine.high %v1028_v29, %v1028_v29 }
 0x125   :  { %v4361_v40 = vsel %vm4360_vm5, %v4061_v30, %v4359_v33  ;;  %v2432_v41 = vsel %vm2263_vm0, %v1028_v29, -inf  ;;  %v1001_v42 = vrot.slane %v987_v34, %v7131_v0  ;;  %v1002_v43 = vcombine.high %v994_v35, %v994_v35 }
 0x126   :  { %v4063_v45 = vmax.f32 %v2319_v36, %v2375_v55  ;;  %v4363_v46 = vsel %vm4362_vm6, %v4062_v37, %v4361_v40  ;;  %v1037_v13 = vcombine.high %v1035_v31, %v1035_v31  ;;  %v2433_v47 = vrot.slane %v2432_v41, 4 }
 0x127   :  { %v2439_v49 = vsel %vm2263_vm0, %v1036_v38, -inf  ;;  %v2446_v50 = vsel %vm2263_vm0, %v1035_v31, -inf  ;;  %v1003_v48 = vcombine.high %v1001_v42, %v1001_v42  ;;  %v2376_v56 = vsel %vm2263_vm0, %v994_v35, -inf }
 0x128   :  { %v4365_v57 = vsel %vm4364_vm7, %v4063_v45, %v4363_v46  ;;  %v2434_v59 = vmax.f32 %v2432_v41, %v2433_v47  ;;  %v2440_v61 = vrot.slane %v2439_v49, 4  ;;  %v2447_v63 = vrot.slane %v2446_v50, 4  ;;  %v6801_v41 = vld [vmem:[%s8969_s4 + $0x70] sm:$0xff]  }
 0x129   :  { %4488 = vst [vmem:[#allocation2 + $0x11] sm:$0xff] %v4365_v57  ;;  %v2453_v60 = vsel %vm2263_vm0, %v1037_v13, -inf  ;;  %v2377_v55 = vrot.slane %v2376_v56, 4  ;;  %v2383_v1 = vsel %vm2263_vm0, %v1002_v43, -inf  ;;  %v2390_v2 = vsel %vm2263_vm0, %v1001_v42, -inf  ;;  %v6802_v42 = vld [vmem:[%s8969_s4 + $0x160] sm:$0xff]   ;;  %6307 = vmatprep.subr.bf16.mxu1 %v6801_v41 }
 0x12a   :  { %v2435_v3 = vrot.slane %v2434_v59, 2  ;;  %v2441_v4 = vmax.f32 %v2439_v49, %v2440_v61  ;;  %v2448_v5 = vmax.f32 %v2446_v50, %v2447_v63  ;;  %v2454_v17 = vrot.slane %v2453_v60, 4  ;;  %v6803_v47 = vld [vmem:[%s8969_s4 + $0x30] sm:$0xff]   ;;  %v6804_v49 = vld [vmem:[%s8969_s4 + $0x120] sm:$0xff]   ;;  %6431 = vmatprep.subr.bf16.mxu0 %v6802_v42 }
 0x12b   :  { %v2378_v7 = vmax.f32 %v2376_v56, %v2377_v55  ;;  %v2384_v8 = vrot.slane %v2383_v1, 4  ;;  %v2391_v22 = vrot.slane %v2390_v2, 4  ;;  %v2397_v9 = vsel %vm2263_vm0, %v1003_v48, -inf  ;;  %6308 = vmatpush3.bf16.msra.mxu1 %v6803_v47  ;;  %6432 = vmatpush3.bf16.msra.mxu0 %v6804_v49 }
 0x12c   :  { %v2436_v27 = vmax.f32 %v2434_v59, %v2435_v3  ;;  %v2442_v10 = vrot.slane %v2441_v4, 2  ;;  %v2449_v12 = vrot.slane %v2448_v5, 2  ;;  %v2455_v14 = vmax.f32 %v2453_v60, %v2454_v17 }
 0x12d   :  { %v2379_v32 = vrot.slane %v2378_v7, 2  ;;  %v2385_v15 = vmax.f32 %v2383_v1, %v2384_v8  ;;  %v2392_v19 = vmax.f32 %v2390_v2, %v2391_v22  ;;  %v2398_v24 = vrot.slane %v2397_v9, 4  ;;  %v7293_v8 = vpop.f32.mrb[20].mxu0 }
 0x12e   :  { %v2437_v26 = vrot.slane %v2436_v27, 1  ;;  %v2443_v28 = vmax.f32 %v2441_v4, %v2442_v10  ;;  %v2450_v29 = vmax.f32 %v2448_v5, %v2449_v12  ;;  %v2456_v30 = vrot.slane %v2455_v14, 2  ;;  %v7297_v12 = vpop.f32.mrb[21].mxu0 }
 0x12f   :  { %v2380_v33 = vmax.f32 %v2378_v7, %v2379_v32  ;;  %v2386_v34 = vrot.slane %v2385_v15, 2  ;;  %v2393_v35 = vrot.slane %v2392_v19, 2  ;;  %v2399_v36 = vmax.f32 %v2397_v9, %v2398_v24 }
 0x130   :  { %v2438_v37 = vmax.f32 %v2436_v27, %v2437_v26  ;;  %v2444_v31 = vrot.slane %v2443_v28, 1  ;;  %v2451_v38 = vrot.slane %v2450_v29, 1  ;;  %v2457_v40 = vmax.f32 %v2455_v14, %v2456_v30 }
 0x131   :  { %v2381_v43 = vrot.slane %v2380_v33, 1  ;;  %v2387_v45 = vmax.f32 %v2385_v15, %v2386_v34  ;;  %v2394_v46 = vmax.f32 %v2392_v19, %v2393_v35  ;;  %v2400_v13 = vrot.slane %v2399_v36, 2 }
 0x132   :  { %v2445_v50 = vmax.f32 %v2443_v28, %v2444_v31  ;;  %v2452_v48 = vmax.f32 %v2450_v29, %v2451_v38  ;;  %v2458_v56 = vrot.slane %v2457_v40, 1  ;;  %v1038_v57 = vcombine.high %v7255_v20, %v7255_v20 }
 0x133   :  { %v2382_v59 = vmax.f32 %v2380_v33, %v2381_v43  ;;  %v2388_v61 = vrot.slane %v2387_v45, 1  ;;  %v2395_v63 = vrot.slane %v2394_v46, 1  ;;  %v2401_v60 = vmax.f32 %v2399_v36, %v2400_v13 }
 0x134   :  { %v2459_v55 = vmax.f32 %v2457_v40, %v2458_v56  ;;  %v1045_v1 = vrot.slane %v7255_v20, %v7131_v0  ;;  %v1052_v2 = vrot.slane %v1038_v57, %v7131_v0  ;;  %v796_v3 = vmax.f32 %v7253_v16, 0.0 }
 0x135   :  { %v2389_v4 = vmax.f32 %v2387_v45, %v2388_v61  ;;  %v2396_v5 = vmax.f32 %v2394_v46, %v2395_v63  ;;  %v2402_v17 = vrot.slane %v2401_v60, 1  ;;  %v4064_v7 = vmax.f32 %v2382_v59, %v2438_v37 }
 0x136   :  { %v1053_v22 = vcombine.high %v1045_v1, %v1045_v1  ;;  %v1054_v9 = vcombine.high %v1052_v2, %v1052_v2  ;;  %v2460_v27 = vsel %vm2263_vm0, %v1045_v1, -inf  ;;  %v2474_v10 = vsel %vm2263_vm0, %v1052_v2, -inf }
 0x137   :  { %v2403_v14 = vmax.f32 %v2401_v60, %v2402_v17  ;;  %v4065_v20 = vmax.f32 %v2389_v4, %v2445_v50  ;;  %v4066_v32 = vmax.f32 %v2396_v5, %v2452_v48  ;;  %v2461_v15 = vrot.slane %v2460_v27, 4 }
 0x138   :  { %v2467_v16 = vsel %vm2263_vm0, %v1053_v22, -inf  ;;  %v2475_v19 = vrot.slane %v2474_v10, 4  ;;  %v2481_v24 = vsel %vm2263_vm0, %v1054_v9, -inf  ;;  %v1004_v26 = vcombine.high %v796_v3, %v796_v3  ;;  %v6805_v9 = vld [vmem:[%s8969_s4 + $0x78] sm:$0xff]  }
 0x139   :  { %v4067_v28 = vmax.f32 %v2403_v14, %v2459_v55  ;;  %v4366_v29 = vsel %vm4352_vm1, %v4065_v20, %v4064_v7  ;;  %v2462_v30 = vmax.f32 %v2460_v27, %v2461_v15  ;;  %v2468_v33 = vrot.slane %v2467_v16, 4  ;;  %v6806_v27 = vld [vmem:[%s8969_s4 + $0x168] sm:$0xff]   ;;  %6309 = vmatprep.subr.bf16.mxu1 %v6805_v9 }
 0x13a   :  { %v4367_v34 = vsel %vm4354_vm2, %v4066_v32, %v4366_v29  ;;  %v2476_v35 = vmax.f32 %v2474_v10, %v2475_v19  ;;  %v2482_v36 = vrot.slane %v2481_v24, 4  ;;  %v1011_v37 = vrot.slane %v796_v3, %v7131_v0  ;;  %6433 = vmatprep.subr.bf16.mxu0 %v6806_v27 }
 0x13b   :  { %v2463_v31 = vrot.slane %v2462_v30, 2  ;;  %v2469_v38 = vmax.f32 %v2467_v16, %v2468_v33  ;;  %v1018_v40 = vrot.slane %v1004_v26, %v7131_v0  ;;  %v7306_v41 = vsel %vm4356_vm3, %v4067_v28, %v4367_v34  ;;  %v7322_v33 = vpop.f32.mrb[22].mxu0 }
 0x13c   :  { %v2477_v42 = vrot.slane %v2476_v35, 2  ;;  %v2483_v43 = vmax.f32 %v2481_v24, %v2482_v36  ;;  %v1019_v45 = vcombine.high %v1011_v37, %v1011_v37  ;;  %v2404_v46 = vsel %vm2263_vm0, %v1011_v37, -inf }
 0x13d   :  { %v2464_v13 = vmax.f32 %v2462_v30, %v2463_v31  ;;  %v2470_v47 = vrot.slane %v2469_v38, 2  ;;  %v1020_v49 = vcombine.high %v1018_v40, %v1018_v40  ;;  %v2405_v50 = vrot.slane %v2404_v46, 4 }
 0x13e   :  { %v2478_v48 = vmax.f32 %v2476_v35, %v2477_v42  ;;  %v2484_v56 = vrot.slane %v2483_v43, 2  ;;  %v2411_v57 = vsel %vm2263_vm0, %v1019_v45, -inf  ;;  %v2418_v59 = vsel %vm2263_vm0, %v1018_v40, -inf }
 0x13f   :  { %v2465_v61 = vrot.slane %v2464_v13, 1  ;;  %v2471_v63 = vmax.f32 %v2469_v38, %v2470_v47  ;;  %v2406_v60 = vmax.f32 %v2404_v46, %v2405_v50  ;;  %v2412_v55 = vrot.slane %v2411_v57, 4 }
 0x140   :  { %v2479_v1 = vrot.slane %v2478_v48, 1  ;;  %v2485_v2 = vmax.f32 %v2483_v43, %v2484_v56  ;;  %v2419_v3 = vrot.slane %v2418_v59, 4  ;;  %v2425_v4 = vsel %vm2263_vm0, %v1020_v49, -inf }
 0x141   :  { %v2466_v5 = vmax.f32 %v2464_v13, %v2465_v61  ;;  %v2472_v17 = vrot.slane %v2471_v63, 1  ;;  %v2407_v7 = vrot.slane %v2406_v60, 2  ;;  %v2413_v22 = vmax.f32 %v2411_v57, %v2412_v55 }
 0x142   :  { %v2480_v10 = vmax.f32 %v2478_v48, %v2479_v1  ;;  %v2486_v14 = vrot.slane %v2485_v2, 1  ;;  %v2420_v20 = vmax.f32 %v2418_v59, %v2419_v3  ;;  %v2426_v32 = vrot.slane %v2425_v4, 4 }
 0x143   :  { %v2473_v15 = vmax.f32 %v2471_v63, %v2472_v17  ;;  %v2408_v16 = vmax.f32 %v2406_v60, %v2407_v7  ;;  %v2414_v19 = vrot.slane %v2413_v22, 2  ;;  %v666_v24 = vmul.f32 %v7170_v53, %v7121_v54 }
 0x144   :  { %v2487_v26 = vmax.f32 %v2485_v2, %v2486_v14  ;;  %v2421_v28 = vrot.slane %v2420_v20, 2  ;;  %v2427_v29 = vmax.f32 %v2425_v4, %v2426_v32  ;;  %v664_v30 = vmul.f32 %v7121_v54, %v7178_v62  ;;  %v7347_v2 = vpop.f32.mrb[23].mxu0 }
 0x145   :  { %v2409_v34 = vrot.slane %v2408_v16, 1  ;;  %v2415_v35 = vmax.f32 %v2413_v22, %v2414_v19  ;;  %v737_v36 = vadd.f32 %v7126_v58, %v666_v24  ;;  %v667_v37 = vmul.f32 %v7186_v6, %v7121_v54  ;;  %v6807_v6 = vld [vmem:[%s8969_s4 + $0x38] sm:$0xff]  }
 0x146   :  { %v2422_v31 = vmax.f32 %v2420_v20, %v2421_v28  ;;  %v2428_v38 = vrot.slane %v2427_v29, 2  ;;  %v735_v53 = vadd.f32 %v7126_v58, %v664_v30  ;;  %v665_v40 = vmul.f32 %v7121_v54, %v7188_v11  ;;  %v6808_v54 = vld [vmem:[%s8969_s4 + $0x128] sm:$0xff]   ;;  %6310 = vmatpush3.bf16.msra.mxu1 %v6807_v6 }
 0x147   :  { %v2410_v42 = vmax.f32 %v2408_v16, %v2409_v34  ;;  %v2416_v43 = vrot.slane %v2415_v35, 1  ;;  %v801_v45 = vmax.f32 %v737_v36, 0.0  ;;  %v7331_v62 = vadd.f32 %v7126_v58, %v667_v37  ;;  %6434 = vmatpush3.bf16.msra.mxu0 %v6808_v54 }
 0x148   :  { %v2423_v46 = vrot.slane %v2422_v31, 1  ;;  %v2429_v13 = vmax.f32 %v2427_v29, %v2428_v38  ;;  %v799_v47 = vmax.f32 %v735_v53, 0.0  ;;  %v7334_v49 = vadd.f32 %v7126_v58, %v665_v40 }
 0x149   :  { %v2417_v11 = vmax.f32 %v2415_v35, %v2416_v43  ;;  %v4068_v50 = vmax.f32 %v2410_v42, %v2466_v5  ;;  %v1089_v48 = vcombine.high %v801_v45, %v801_v45  ;;  %v1096_v56 = vrot.slane %v801_v45, %v7131_v0 }
 0x14a   :  { %v2424_v57 = vmax.f32 %v2422_v31, %v2423_v46  ;;  %v2430_v59 = vrot.slane %v2429_v13, 1  ;;  %v1055_v61 = vcombine.high %v799_v47, %v799_v47  ;;  %v1062_v63 = vrot.slane %v799_v47, %v7131_v0 }
 0x14b   :  { %v4069_v58 = vmax.f32 %v2417_v11, %v2473_v15  ;;  %v4369_v60 = vsel %vm4358_vm4, %v4068_v50, %v7306_v41  ;;  %v1103_v55 = vrot.slane %v1089_v48, %v7131_v0  ;;  %v1104_v1 = vcombine.high %v1096_v56, %v1096_v56 }
 0x14c   :  { %v2431_v3 = vmax.f32 %v2429_v13, %v2430_v59  ;;  %v4070_v4 = vmax.f32 %v2424_v57, %v2480_v10  ;;  %v2544_v5 = vsel %vm2263_vm0, %v1096_v56, -inf  ;;  %v1069_v17 = vrot.slane %v1055_v61, %v7131_v0 }
 0x14d   :  { %v4370_v7 = vsel %vm4360_vm5, %v4069_v58, %v4369_v60  ;;  %v1105_v22 = vcombine.high %v1103_v55, %v1103_v55  ;;  %v2545_v9 = vrot.slane %v2544_v5, 4  ;;  %v2551_v27 = vsel %vm2263_vm0, %v1104_v1, -inf }
 0x14e   :  { %v4071_v14 = vmax.f32 %v2431_v3, %v2487_v26  ;;  %v4371_v41 = vsel %vm4362_vm6, %v4070_v4, %v4370_v7  ;;  %v2552_v20 = vrot.slane %v2551_v27, 4  ;;  %v2558_v32 = vsel %vm2263_vm0, %v1103_v55, -inf  ;;  %v6810_v3 = vld [vmem:[%s8969_s4 + $0x130] sm:$0xff]  }
 0x14f   :  { %v2546_v15 = vmax.f32 %v2544_v5, %v2545_v9  ;;  %v2559_v16 = vrot.slane %v2558_v32, 4  ;;  %v2565_v10 = vsel %vm2263_vm0, %v1105_v22, -inf  ;;  %v1070_v19 = vcombine.high %v1062_v63, %v1062_v63 }
 0x150   :  { %v4372_v24 = vsel %vm4364_vm7, %v4071_v14, %v4371_v41  ;;  %v2553_v28 = vmax.f32 %v2551_v27, %v2552_v20  ;;  %v2566_v29 = vrot.slane %v2565_v10, 4  ;;  %v1071_v30 = vcombine.high %v1069_v17, %v1069_v17 }
 0x151   :  { %4489 = vst [vmem:[#allocation2 + $0x21] sm:$0xff] %v4372_v24  ;;  %v2547_v34 = vrot.slane %v2546_v15, 2  ;;  %v2560_v35 = vmax.f32 %v2558_v32, %v2559_v16  ;;  %v2488_v26 = vsel %vm2263_vm0, %v1062_v63, -inf  ;;  %v2495_v36 = vsel %vm2263_vm0, %v1070_v19, -inf  ;;  %v6809_v63 = vld [vmem:[%s8969_s4 + $0x170] sm:$0xff]  }
 0x152   :  { %v2554_v37 = vrot.slane %v2553_v28, 2  ;;  %v2567_v31 = vmax.f32 %v2565_v10, %v2566_v29  ;;  %v2489_v38 = vrot.slane %v2488_v26, 4  ;;  %v2496_v53 = vrot.slane %v2495_v36, 4  ;;  %6435 = vmatprep.subr.bf16.mxu0 %v6809_v63 }
 0x153   :  { %v2548_v40 = vmax.f32 %v2546_v15, %v2547_v34  ;;  %v2561_v42 = vrot.slane %v2560_v35, 2  ;;  %v2502_v43 = vsel %vm2263_vm0, %v1069_v17, -inf  ;;  %v2509_v45 = vsel %vm2263_vm0, %v1071_v30, -inf  ;;  %6436 = vmatpush3.bf16.msra.mxu0 %v6810_v3 }
 0x154   :  { %v2555_v46 = vmax.f32 %v2553_v28, %v2554_v37  ;;  %v2568_v13 = vrot.slane %v2567_v31, 2  ;;  %v2490_v47 = vmax.f32 %v2488_v26, %v2489_v38  ;;  %v2497_v6 = vmax.f32 %v2495_v36, %v2496_v53  ;;  %v7372_v28 = vpop.f32.mrb[24].mxu0 }
 0x155   :  { %v2549_v54 = vrot.slane %v2548_v40, 1  ;;  %v2562_v11 = vmax.f32 %v2560_v35, %v2561_v42  ;;  %v2503_v50 = vrot.slane %v2502_v43, 4  ;;  %v2510_v48 = vrot.slane %v2509_v45, 4 }
 0x156   :  { %v2556_v56 = vrot.slane %v2555_v46, 1  ;;  %v2569_v57 = vmax.f32 %v2567_v31, %v2568_v13  ;;  %v2491_v59 = vrot.slane %v2490_v47, 2  ;;  %v2498_v61 = vrot.slane %v2497_v6, 2 }
 0x157   :  { %v2550_v58 = vmax.f32 %v2548_v40, %v2549_v54  ;;  %v2563_v60 = vrot.slane %v2562_v11, 1  ;;  %v2504_v55 = vmax.f32 %v2502_v43, %v2503_v50  ;;  %v2511_v1 = vmax.f32 %v2509_v45, %v2510_v48  ;;  %v7378_v40 = vpop.f32.mrb[25].mxu0 }
 0x158   :  { %v2557_v4 = vmax.f32 %v2555_v46, %v2556_v56  ;;  %v2570_v5 = vrot.slane %v2569_v57, 1  ;;  %v2492_v17 = vmax.f32 %v2490_v47, %v2491_v59  ;;  %v2499_v7 = vmax.f32 %v2497_v6, %v2498_v61 }
 0x159   :  { %v2564_v22 = vmax.f32 %v2562_v11, %v2563_v60  ;;  %v2505_v9 = vrot.slane %v2504_v55, 2  ;;  %v2512_v27 = vrot.slane %v2511_v1, 2  ;;  %v802_v14 = vmax.f32 %v7331_v62, 0.0 }
 0x15a   :  { %v7368_v41 = vmax.f32 %v2569_v57, %v2570_v5  ;;  %v2493_v20 = vrot.slane %v2492_v17, 1  ;;  %v2500_v32 = vrot.slane %v2499_v7, 1  ;;  %v800_v15 = vmax.f32 %v7334_v49, 0.0 }
 0x15b   :  { %v2506_v16 = vmax.f32 %v2504_v55, %v2505_v9  ;;  %v2513_v10 = vmax.f32 %v2511_v1, %v2512_v27  ;;  %v1106_v19 = vcombine.high %v802_v14, %v802_v14  ;;  %v1113_v24 = vrot.slane %v802_v14, %v7131_v0 }
 0x15c   :  { %v2494_v29 = vmax.f32 %v2492_v17, %v2493_v20  ;;  %v2501_v30 = vmax.f32 %v2499_v7, %v2500_v32  ;;  %v1072_v34 = vcombine.high %v800_v15, %v800_v15  ;;  %v1079_v35 = vrot.slane %v800_v15, %v7131_v0 }
 0x15d   :  { %v2507_v62 = vrot.slane %v2506_v16, 1  ;;  %v2514_v26 = vrot.slane %v2513_v10, 1  ;;  %v1120_v36 = vrot.slane %v1106_v19, %v7131_v0  ;;  %v1121_v37 = vcombine.high %v1113_v24, %v1113_v24 }
 0x15e   :  { %v4072_v31 = vmax.f32 %v2494_v29, %v2550_v58  ;;  %v4073_v38 = vmax.f32 %v2501_v30, %v2557_v4  ;;  %v2572_v49 = vsel %vm2263_vm0, %v1113_v24, -inf  ;;  %v1086_v53 = vrot.slane %v1072_v34, %v7131_v0 }
 0x15f   :  { %v2508_v42 = vmax.f32 %v2506_v16, %v2507_v62  ;;  %v2515_v43 = vmax.f32 %v2513_v10, %v2514_v26  ;;  %v1122_v45 = vcombine.high %v1120_v36, %v1120_v36  ;;  %v2573_v46 = vrot.slane %v2572_v49, 4 }
 0x160   :  { %v4373_v13 = vsel %vm4352_vm1, %v4073_v38, %v4072_v31  ;;  %v2579_v47 = vsel %vm2263_vm0, %v1121_v37, -inf  ;;  %v2586_v6 = vsel %vm2263_vm0, %v1120_v36, -inf  ;;  %v1087_v54 = vcombine.high %v1079_v35, %v1079_v35 }
 0x161   :  { %v4074_v11 = vmax.f32 %v2508_v42, %v2564_v22  ;;  %v4075_v50 = vmax.f32 %v2515_v43, %v7368_v41  ;;  %v2574_v48 = vmax.f32 %v2572_v49, %v2573_v46  ;;  %v2580_v56 = vrot.slane %v2579_v47, 4  ;;  %v6811_v46 = vld [vmem:[%s8969_s4 + $0x178] sm:$0xff]  }
 0x162   :  { %v2587_v57 = vrot.slane %v2586_v6, 4  ;;  %v2593_v59 = vsel %vm2263_vm0, %v1122_v45, -inf  ;;  %v1088_v61 = vcombine.high %v1086_v53, %v1086_v53  ;;  %v2516_v63 = vsel %vm2263_vm0, %v1079_v35, -inf  ;;  %6437 = vmatprep.subr.bf16.mxu0 %v6811_v46 }
 0x163   :  { %v4374_v58 = vsel %vm4354_vm2, %v4074_v11, %v4373_v13  ;;  %v2575_v60 = vrot.slane %v2574_v48, 2  ;;  %v2581_v55 = vmax.f32 %v2579_v47, %v2580_v56  ;;  %v2594_v1 = vrot.slane %v2593_v59, 4  ;;  %v7397_v56 = vld [vmem:[%s8967_s2] ss:$0 sm:$0xff] }
 0x164   :  { %v2588_v3 = vmax.f32 %v2586_v6, %v2587_v57  ;;  %v2517_v4 = vrot.slane %v2516_v63, 4  ;;  %v2523_v5 = vsel %vm2263_vm0, %v1087_v54, -inf  ;;  %v2530_v17 = vsel %vm2263_vm0, %v1086_v53, -inf }
 0x165   :  { %v2576_v7 = vmax.f32 %v2574_v48, %v2575_v60  ;;  %v2582_v22 = vrot.slane %v2581_v55, 2  ;;  %v2595_v9 = vmax.f32 %v2593_v59, %v2594_v1  ;;  %v2524_v27 = vrot.slane %v2523_v5, 4  ;;  %v7405_v60 = vpop.f32.mrb[26].mxu0 }
 0x166   :  { %v2589_v14 = vrot.slane %v2588_v3, 2  ;;  %v2518_v41 = vmax.f32 %v2516_v63, %v2517_v4  ;;  %v2531_v20 = vrot.slane %v2530_v17, 4  ;;  %v2537_v32 = vsel %vm2263_vm0, %v1088_v61, -inf }
 0x167   :  { %v2577_v15 = vrot.slane %v2576_v7, 1  ;;  %v2583_v16 = vmax.f32 %v2581_v55, %v2582_v22  ;;  %v2596_v10 = vrot.slane %v2595_v9, 2  ;;  %v2525_v19 = vmax.f32 %v2523_v5, %v2524_v27  ;;  %v6812_v55 = vld [vmem:[%s8969_s4 + $0x138] sm:$0xff]  }
 0x168   :  { %v2590_v24 = vmax.f32 %v2588_v3, %v2589_v14  ;;  %v2519_v29 = vrot.slane %v2518_v41, 2  ;;  %v2532_v30 = vmax.f32 %v2530_v17, %v2531_v20  ;;  %v2538_v34 = vrot.slane %v2537_v32, 4  ;;  %6438 = vmatpush3.bf16.msra.mxu0 %v6812_v55 }
 0x169   :  { %v2578_v35 = vmax.f32 %v2576_v7, %v2577_v15  ;;  %v2584_v62 = vrot.slane %v2583_v16, 1  ;;  %v2597_v26 = vmax.f32 %v2595_v9, %v2596_v10  ;;  %v2526_v36 = vrot.slane %v2525_v19, 2 }
 0x16a   :  { %v2591_v37 = vrot.slane %v2590_v24, 1  ;;  %v2520_v31 = vmax.f32 %v2518_v41, %v2519_v29  ;;  %v2533_v38 = vrot.slane %v2532_v30, 2  ;;  %v2539_v49 = vmax.f32 %v2537_v32, %v2538_v34  ;;  %v7423_v41 = vpop.f32.mrb[27].mxu0 }
 0x16b   :  { %v2585_v53 = vmax.f32 %v2583_v16, %v2584_v62  ;;  %v2598_v42 = vrot.slane %v2597_v26, 1  ;;  %v2527_v43 = vmax.f32 %v2525_v19, %v2526_v36  ;;  %v4375_v45 = vsel %vm4356_vm3, %v4075_v50, %v4374_v58 }
 0x16c   :  { %v2592_v13 = vmax.f32 %v2590_v24, %v2591_v37  ;;  %v2521_v47 = vrot.slane %v2520_v31, 1  ;;  %v2534_v6 = vmax.f32 %v2532_v30, %v2533_v38  ;;  %v2540_v54 = vrot.slane %v2539_v49, 2 }
 0x16d   :  { %v2599_v11 = vmax.f32 %v2597_v26, %v2598_v42  ;;  %v2528_v48 = vrot.slane %v2527_v43, 1  ;;  %v670_v57 = vmul.f32 %v7397_v56, %v7199_v39  ;;  %v668_v50 = vmul.f32 %v7397_v56, %v7201_v44  ;;  %v7413_v39 = vld [vmem:[%s8968_s3] ss:$0 sm:$0xff] }
 0x16e   :  { %v2522_v59 = vmax.f32 %v2520_v31, %v2521_v47  ;;  %v2535_v61 = vrot.slane %v2534_v6, 1  ;;  %v2541_v63 = vmax.f32 %v2539_v49, %v2540_v54  ;;  %v671_v58 = vmul.f32 %v7397_v56, %v7207_v21 }
 0x16f   :  { %v2529_v1 = vmax.f32 %v2527_v43, %v2528_v48  ;;  %v741_v44 = vadd.f32 %v7413_v39, %v670_v57  ;;  %v739_v3 = vadd.f32 %v7413_v39, %v668_v50  ;;  %v669_v4 = vmul.f32 %v7397_v56, %v7209_v52 }
 0x170   :  { %v2536_v21 = vmax.f32 %v2534_v6, %v2535_v61  ;;  %v2542_v5 = vrot.slane %v2541_v63, 1  ;;  %v4076_v17 = vmax.f32 %v2522_v59, %v2578_v35  ;;  %v742_v7 = vadd.f32 %v7413_v39, %v671_v58 }
 0x171   :  { %v4077_v22 = vmax.f32 %v2529_v1, %v2585_v53  ;;  %v805_v9 = vmax.f32 %v741_v44, 0.0  ;;  %v803_v27 = vmax.f32 %v739_v3, 0.0  ;;  %v7421_v14 = vadd.f32 %v7413_v39, %v669_v4 }
 0x172   :  { %v2543_v20 = vmax.f32 %v2541_v63, %v2542_v5  ;;  %v4078_v32 = vmax.f32 %v2536_v21, %v2592_v13  ;;  %v4376_v15 = vsel %vm4358_vm4, %v4076_v17, %v4375_v45  ;;  %v7426_v16 = vmax.f32 %v742_v7, 0.0 }
 0x173   :  { %v4377_v52 = vsel %vm4360_vm5, %v4077_v22, %v4376_v15  ;;  %v1157_v10 = vcombine.high %v805_v9, %v805_v9  ;;  %v1164_v19 = vrot.slane %v805_v9, %v7131_v0  ;;  %v1123_v24 = vcombine.high %v803_v27, %v803_v27 }
 0x174   :  { %v4079_v29 = vmax.f32 %v2543_v20, %v2599_v11  ;;  %v4378_v30 = vsel %vm4362_vm6, %v4078_v32, %v4377_v52  ;;  %v1130_v34 = vrot.slane %v803_v27, %v7131_v0  ;;  %v1174_v35 = vcombine.high %v7426_v16, %v7426_v16 }
 0x175   :  { %v1171_v62 = vrot.slane %v1157_v10, %v7131_v0  ;;  %v1172_v26 = vcombine.high %v1164_v19, %v1164_v19  ;;  %v2656_v36 = vsel %vm2263_vm0, %v1164_v19, -inf  ;;  %v1137_v37 = vrot.slane %v1123_v24, %v7131_v0 }
 0x176   :  { %v4379_v31 = vsel %vm4364_vm7, %v4079_v29, %v4378_v30  ;;  %v2657_v38 = vrot.slane %v2656_v36, 4  ;;  %v1138_v49 = vcombine.high %v1130_v34, %v1130_v34  ;;  %v2600_v53 = vsel %vm2263_vm0, %v1130_v34, -inf }
 0x177   :  { %4490 = vst [vmem:[#allocation2 + $0x31] sm:$0xff] %v4379_v31  ;;  %v1173_v42 = vcombine.high %v1171_v62, %v1171_v62  ;;  %v2663_v43 = vsel %vm2263_vm0, %v1172_v26, -inf  ;;  %v2670_v45 = vsel %vm2263_vm0, %v1171_v62, -inf  ;;  %v1139_v46 = vcombine.high %v1137_v37, %v1137_v37 }
 0x178   :  { %v2658_v13 = vmax.f32 %v2656_v36, %v2657_v38  ;;  %v2664_v47 = vrot.slane %v2663_v43, 4  ;;  %v2671_v6 = vrot.slane %v2670_v45, 4  ;;  %v2601_v54 = vrot.slane %v2600_v53, 4 }
 0x179   :  { %v2677_v11 = vsel %vm2263_vm0, %v1173_v42, -inf  ;;  %v2607_v48 = vsel %vm2263_vm0, %v1138_v49, -inf  ;;  %v2614_v57 = vsel %vm2263_vm0, %v1137_v37, -inf  ;;  %v2621_v50 = vsel %vm2263_vm0, %v1139_v46, -inf }
 0x17a   :  { %v2659_v59 = vrot.slane %v2658_v13, 2  ;;  %v2665_v61 = vmax.f32 %v2663_v43, %v2664_v47  ;;  %v2672_v63 = vmax.f32 %v2670_v45, %v2671_v6  ;;  %v2678_v58 = vrot.slane %v2677_v11, 4  ;;  %v7447_v6 = vpop.f32.mrb[28].mxu0 }
 0x17b   :  { %v2602_v55 = vmax.f32 %v2600_v53, %v2601_v54  ;;  %v2608_v1 = vrot.slane %v2607_v48, 4  ;;  %v2615_v44 = vrot.slane %v2614_v57, 4  ;;  %v2622_v3 = vrot.slane %v2621_v50, 4 }
 0x17c   :  { %v2660_v4 = vmax.f32 %v2658_v13, %v2659_v59  ;;  %v2666_v21 = vrot.slane %v2665_v61, 2  ;;  %v2673_v5 = vrot.slane %v2672_v63, 2  ;;  %v2679_v17 = vmax.f32 %v2677_v11, %v2678_v58 }
 0x17d   :  { %v2603_v7 = vrot.slane %v2602_v55, 2  ;;  %v2609_v22 = vmax.f32 %v2607_v48, %v2608_v1  ;;  %v2616_v9 = vmax.f32 %v2614_v57, %v2615_v44  ;;  %v2623_v27 = vmax.f32 %v2621_v50, %v2622_v3 }
 0x17e   :  { %v2661_v20 = vrot.slane %v2660_v4, 1  ;;  %v2667_v32 = vmax.f32 %v2665_v61, %v2666_v21  ;;  %v2674_v15 = vmax.f32 %v2672_v63, %v2673_v5  ;;  %v2680_v52 = vrot.slane %v2679_v17, 2 }
 0x17f   :  { %v2604_v10 = vmax.f32 %v2602_v55, %v2603_v7  ;;  %v2610_v19 = vrot.slane %v2609_v22, 2  ;;  %v2617_v24 = vrot.slane %v2616_v9, 2  ;;  %v2624_v29 = vrot.slane %v2623_v27, 2 }
 0x180   :  { %v2662_v30 = vmax.f32 %v2660_v4, %v2661_v20  ;;  %v2668_v34 = vrot.slane %v2667_v32, 1  ;;  %v2675_v62 = vrot.slane %v2674_v15, 1  ;;  %v2681_v26 = vmax.f32 %v2679_v17, %v2680_v52 }
 0x181   :  { %v2605_v36 = vrot.slane %v2604_v10, 1  ;;  %v2611_v37 = vmax.f32 %v2609_v22, %v2610_v19  ;;  %v2618_v31 = vmax.f32 %v2616_v9, %v2617_v24  ;;  %v2625_v38 = vmax.f32 %v2623_v27, %v2624_v29 }
 0x182   :  { %v2669_v49 = vmax.f32 %v2667_v32, %v2668_v34  ;;  %v2676_v53 = vmax.f32 %v2674_v15, %v2675_v62  ;;  %v2682_v42 = vrot.slane %v2681_v26, 1  ;;  %v1181_v43 = vrot.slane %v7426_v16, %v7131_v0  ;;  %v7461_v32 = vpop.f32.mrb[29].mxu0 }
 0x183   :  { %v2606_v45 = vmax.f32 %v2604_v10, %v2605_v36  ;;  %v2612_v46 = vrot.slane %v2611_v37, 1  ;;  %v2619_v13 = vrot.slane %v2618_v31, 1  ;;  %v2626_v47 = vrot.slane %v2625_v38, 1 }
 0x184   :  { %v2683_v54 = vmax.f32 %v2681_v26, %v2682_v42  ;;  %v1188_v11 = vrot.slane %v1174_v35, %v7131_v0  ;;  %v1189_v48 = vcombine.high %v1181_v43, %v1181_v43  ;;  %v2684_v57 = vsel %vm2263_vm0, %v1181_v43, -inf }
 0x185   :  { %v2613_v50 = vmax.f32 %v2611_v37, %v2612_v46  ;;  %v2620_v59 = vmax.f32 %v2618_v31, %v2619_v13  ;;  %v2627_v61 = vmax.f32 %v2625_v38, %v2626_v47  ;;  %v4080_v63 = vmax.f32 %v2606_v45, %v2662_v30 }
 0x186   :  { %v1190_v58 = vcombine.high %v1188_v11, %v1188_v11  ;;  %v2685_v55 = vrot.slane %v2684_v57, 4  ;;  %v2691_v1 = vsel %vm2263_vm0, %v1189_v48, -inf  ;;  %v2698_v44 = vsel %vm2263_vm0, %v1188_v11, -inf }
 0x187   :  { %v4081_v3 = vmax.f32 %v2613_v50, %v2669_v49  ;;  %v4082_v4 = vmax.f32 %v2620_v59, %v2676_v53  ;;  %v4083_v21 = vmax.f32 %v2627_v61, %v2683_v54  ;;  %v2692_v5 = vrot.slane %v2691_v1, 4 }
 0x188   :  { %v2686_v17 = vmax.f32 %v2684_v57, %v2685_v55  ;;  %v2699_v16 = vrot.slane %v2698_v44, 4  ;;  %v2705_v35 = vsel %vm2263_vm0, %v1190_v58, -inf  ;;  %v804_v7 = vmax.f32 %v7421_v14, 0.0 }
 0x189   :  { %v4380_v22 = vsel %vm4352_vm1, %v4081_v3, %v4080_v63  ;;  %v2693_v9 = vmax.f32 %v2691_v1, %v2692_v5  ;;  %v2706_v27 = vrot.slane %v2705_v35, 4  ;;  %v674_v20 = vmul.f32 %v7397_v56, %v7219_v18 }
 0x18a   :  { %v4381_v15 = vsel %vm4354_vm2, %v4082_v4, %v4380_v22  ;;  %v2687_v52 = vrot.slane %v2686_v17, 2  ;;  %v2700_v10 = vmax.f32 %v2698_v44, %v2699_v16  ;;  %v1140_v19 = vcombine.high %v804_v7, %v804_v7  ;;  %v7478_v22 = vpop.f32.mrb[30].mxu0 }
 0x18b   :  { %v2694_v24 = vrot.slane %v2693_v9, 2  ;;  %v2707_v29 = vmax.f32 %v2705_v35, %v2706_v27  ;;  %v1147_v30 = vrot.slane %v804_v7, %v7131_v0  ;;  %v7466_v14 = vsel %vm4356_vm3, %v4083_v21, %v4381_v15 }
 0x18c   :  { %v2688_v34 = vmax.f32 %v2686_v17, %v2687_v52  ;;  %v2701_v62 = vrot.slane %v2700_v10, 2  ;;  %v1154_v26 = vrot.slane %v1140_v19, %v7131_v0  ;;  %v745_v18 = vadd.f32 %v7413_v39, %v674_v20 }
 0x18d   :  { %v2695_v36 = vmax.f32 %v2693_v9, %v2694_v24  ;;  %v2708_v37 = vrot.slane %v2707_v29, 2  ;;  %v1155_v31 = vcombine.high %v1147_v30, %v1147_v30  ;;  %v2628_v38 = vsel %vm2263_vm0, %v1147_v30, -inf }
 0x18e   :  { %v2689_v49 = vrot.slane %v2688_v34, 1  ;;  %v2702_v53 = vmax.f32 %v2700_v10, %v2701_v62  ;;  %v1156_v42 = vcombine.high %v1154_v26, %v1154_v26  ;;  %v2629_v43 = vrot.slane %v2628_v38, 4 }
 0x18f   :  { %v2696_v45 = vrot.slane %v2695_v36, 1  ;;  %v2709_v46 = vmax.f32 %v2707_v29, %v2708_v37  ;;  %v2635_v13 = vsel %vm2263_vm0, %v1155_v31, -inf  ;;  %v2642_v47 = vsel %vm2263_vm0, %v1154_v26, -inf }
 0x190   :  { %v2690_v54 = vmax.f32 %v2688_v34, %v2689_v49  ;;  %v2703_v11 = vrot.slane %v2702_v53, 1  ;;  %v2630_v48 = vmax.f32 %v2628_v38, %v2629_v43  ;;  %v2636_v57 = vrot.slane %v2635_v13, 4 }
 0x191   :  { %v2697_v50 = vmax.f32 %v2695_v36, %v2696_v45  ;;  %v2710_v59 = vrot.slane %v2709_v46, 1  ;;  %v2643_v61 = vrot.slane %v2642_v47, 4  ;;  %v2649_v63 = vsel %vm2263_vm0, %v1156_v42, -inf }
 0x192   :  { %v2704_v58 = vmax.f32 %v2702_v53, %v2703_v11  ;;  %v2631_v55 = vrot.slane %v2630_v48, 2  ;;  %v2637_v1 = vmax.f32 %v2635_v13, %v2636_v57  ;;  %v2650_v44 = vrot.slane %v2649_v63, 4  ;;  %v7488_v11 = vpop.f32.mrb[31].mxu0 }
 0x193   :  { %v2711_v3 = vmax.f32 %v2709_v46, %v2710_v59  ;;  %v2644_v4 = vmax.f32 %v2642_v47, %v2643_v61  ;;  %v809_v21 = vmax.f32 %v745_v18, 0.0  ;;  %v672_v5 = vmul.f32 %v7397_v56, %v7223_v25 }
 0x194   :  { %v2632_v17 = vmax.f32 %v2630_v48, %v2631_v55  ;;  %v2638_v16 = vrot.slane %v2637_v1, 2  ;;  %v2651_v35 = vmax.f32 %v2649_v63, %v2650_v44  ;;  %v675_v7 = vmul.f32 %v7397_v56, %v7233_v51 }
 0x195   :  { %v2645_v9 = vrot.slane %v2644_v4, 2  ;;  %v1225_v27 = vcombine.high %v809_v21, %v809_v21  ;;  %v1232_v20 = vrot.slane %v809_v21, %v7131_v0  ;;  %v743_v15 = vadd.f32 %v7413_v39, %v672_v5 }
 0x196   :  { %v2633_v52 = vrot.slane %v2632_v17, 1  ;;  %v2639_v10 = vmax.f32 %v2637_v1, %v2638_v16  ;;  %v2652_v19 = vrot.slane %v2651_v35, 2  ;;  %v746_v24 = vadd.f32 %v7413_v39, %v675_v7 }
 0x197   :  { %v2646_v25 = vmax.f32 %v2644_v4, %v2645_v9  ;;  %v1239_v29 = vrot.slane %v1225_v27, %v7131_v0  ;;  %v1240_v30 = vcombine.high %v1232_v20, %v1232_v20  ;;  %v2768_v34 = vsel %vm2263_vm0, %v1232_v20, -inf }
 0x198   :  { %v2634_v51 = vmax.f32 %v2632_v17, %v2633_v52  ;;  %v2640_v62 = vrot.slane %v2639_v10, 1  ;;  %v2653_v26 = vmax.f32 %v2651_v35, %v2652_v19  ;;  %v2769_v18 = vrot.slane %v2768_v34, 4 }
 0x199   :  { %v2647_v36 = vrot.slane %v2646_v25, 1  ;;  %v1241_v37 = vcombine.high %v1239_v29, %v1239_v29  ;;  %v2775_v31 = vsel %vm2263_vm0, %v1240_v30, -inf  ;;  %v2782_v38 = vsel %vm2263_vm0, %v1239_v29, -inf }
 0x19a   :  { %v2641_v49 = vmax.f32 %v2639_v10, %v2640_v62  ;;  %v2654_v53 = vrot.slane %v2653_v26, 1  ;;  %v4084_v42 = vmax.f32 %v2634_v51, %v2690_v54  ;;  %v2770_v43 = vmax.f32 %v2768_v34, %v2769_v18 }
 0x19b   :  { %v2648_v45 = vmax.f32 %v2646_v25, %v2647_v36  ;;  %v2776_v46 = vrot.slane %v2775_v31, 4  ;;  %v2783_v13 = vrot.slane %v2782_v38, 4  ;;  %v2789_v47 = vsel %vm2263_vm0, %v1241_v37, -inf }
 0x19c   :  { %v2655_v48 = vmax.f32 %v2653_v26, %v2654_v53  ;;  %v4085_v57 = vmax.f32 %v2641_v49, %v2697_v50  ;;  %v4383_v59 = vsel %vm4358_vm4, %v4084_v42, %v7466_v14  ;;  %v2771_v61 = vrot.slane %v2770_v43, 2 }
 0x19d   :  { %v4086_v63 = vmax.f32 %v2648_v45, %v2704_v58  ;;  %v2777_v55 = vmax.f32 %v2775_v31, %v2776_v46  ;;  %v2784_v1 = vmax.f32 %v2782_v38, %v2783_v13  ;;  %v2790_v44 = vrot.slane %v2789_v47, 4 }
 0x19e   :  { %v4087_v4 = vmax.f32 %v2655_v48, %v2711_v3  ;;  %v4384_v54 = vsel %vm4360_vm5, %v4085_v57, %v4383_v59  ;;  %v2772_v21 = vmax.f32 %v2770_v43, %v2771_v61  ;;  %v807_v5 = vmax.f32 %v743_v15, 0.0 }
 0x19f   :  { %v4385_v17 = vsel %vm4362_vm6, %v4086_v63, %v4384_v54  ;;  %v2778_v16 = vrot.slane %v2777_v55, 2  ;;  %v2785_v35 = vrot.slane %v2784_v1, 2  ;;  %v2791_v7 = vmax.f32 %v2789_v47, %v2790_v44 }
 0x1a0   :  { %v4386_v50 = vsel %vm4364_vm7, %v4087_v4, %v4385_v17  ;;  %v2773_v9 = vrot.slane %v2772_v21, 1  ;;  %v1191_v27 = vcombine.high %v807_v5, %v807_v5  ;;  %v1198_v14 = vrot.slane %v807_v5, %v7131_v0 }
 0x1a1   :  { %4491 = vst [vmem:[#allocation2 + $0x41] sm:$0xff] %v4386_v50  ;;  %v2779_v58 = vmax.f32 %v2777_v55, %v2778_v16  ;;  %v2786_v20 = vmax.f32 %v2784_v1, %v2785_v35  ;;  %v2792_v52 = vrot.slane %v2791_v7, 2  ;;  %v810_v3 = vmax.f32 %v746_v24, 0.0 }
 0x1a2   :  { %v7496_v10 = vmax.f32 %v2772_v21, %v2773_v9  ;;  %v1205_v15 = vrot.slane %v1191_v27, %v7131_v0  ;;  %v1206_v19 = vcombine.high %v1198_v14, %v1198_v14  ;;  %v2712_v25 = vsel %vm2263_vm0, %v1198_v14, -inf }
 0x1a3   :  { %v2780_v29 = vrot.slane %v2779_v58, 1  ;;  %v2787_v30 = vrot.slane %v2786_v20, 1  ;;  %v2793_v34 = vmax.f32 %v2791_v7, %v2792_v52  ;;  %v2713_v51 = vrot.slane %v2712_v25, 4 }
 0x1a4   :  { %v1207_v62 = vcombine.high %v1205_v15, %v1205_v15  ;;  %v2719_v26 = vsel %vm2263_vm0, %v1206_v19, -inf  ;;  %v2726_v18 = vsel %vm2263_vm0, %v1205_v15, -inf  ;;  %v1242_v36 = vcombine.high %v810_v3, %v810_v3 }
 0x1a5   :  { %v2781_v37 = vmax.f32 %v2779_v58, %v2780_v29  ;;  %v7502_v31 = vmax.f32 %v2786_v20, %v2787_v30  ;;  %v2794_v24 = vrot.slane %v2793_v34, 1  ;;  %v2714_v38 = vmax.f32 %v2712_v25, %v2713_v51 }
 0x1a6   :  { %v2720_v49 = vrot.slane %v2719_v26, 4  ;;  %v2727_v53 = vrot.slane %v2726_v18, 4  ;;  %v2733_v42 = vsel %vm2263_vm0, %v1207_v62, -inf  ;;  %v1249_v43 = vrot.slane %v810_v3, %v7131_v0 }
 0x1a7   :  { %v7506_v45 = vmax.f32 %v2793_v34, %v2794_v24  ;;  %v2715_v46 = vrot.slane %v2714_v38, 2  ;;  %v2734_v13 = vrot.slane %v2733_v42, 4  ;;  %v1256_v47 = vrot.slane %v1242_v36, %v7131_v0 }
 0x1a8   :  { %v2721_v48 = vmax.f32 %v2719_v26, %v2720_v49  ;;  %v2728_v57 = vmax.f32 %v2726_v18, %v2727_v53  ;;  %v1257_v59 = vcombine.high %v1249_v43, %v1249_v43  ;;  %v2796_v61 = vsel %vm2263_vm0, %v1249_v43, -inf }
 0x1a9   :  { %v2716_v63 = vmax.f32 %v2714_v38, %v2715_v46  ;;  %v2735_v55 = vmax.f32 %v2733_v42, %v2734_v13  ;;  %v1258_v1 = vcombine.high %v1256_v47, %v1256_v47  ;;  %v2797_v44 = vrot.slane %v2796_v61, 4 }
 0x1aa   :  { %v2722_v4 = vrot.slane %v2721_v48, 2  ;;  %v2729_v54 = vrot.slane %v2728_v57, 2  ;;  %v2803_v21 = vsel %vm2263_vm0, %v1257_v59, -inf  ;;  %v2810_v5 = vsel %vm2263_vm0, %v1256_v47, -inf }
 0x1ab   :  { %v2717_v17 = vrot.slane %v2716_v63, 1  ;;  %v2736_v16 = vrot.slane %v2735_v55, 2  ;;  %v2798_v35 = vmax.f32 %v2796_v61, %v2797_v44  ;;  %v2804_v7 = vrot.slane %v2803_v21, 4  ;;  %v4520_v44 = vld [vmem:[#allocation2 + $0x1] sm:$0xff] }
 0x1ac   :  { %v2723_v50 = vmax.f32 %v2721_v48, %v2722_v4  ;;  %v2730_v9 = vmax.f32 %v2728_v57, %v2729_v54  ;;  %v2811_v27 = vrot.slane %v2810_v5, 4  ;;  %v2817_v14 = vsel %vm2263_vm0, %v1258_v1, -inf  ;;  %v7529_v4 = vld [vmem:[#allocation2 + $0x11] sm:$0xff] }
 0x1ad   :  { %v2718_v58 = vmax.f32 %v2716_v63, %v2717_v17  ;;  %v2737_v20 = vmax.f32 %v2735_v55, %v2736_v16  ;;  %v2799_v52 = vrot.slane %v2798_v35, 2  ;;  %v2805_v3 = vmax.f32 %v2803_v21, %v2804_v7 }
 0x1ae   :  { %v2724_v15 = vrot.slane %v2723_v50, 1  ;;  %v2731_v19 = vrot.slane %v2730_v9, 1  ;;  %v2812_v25 = vmax.f32 %v2810_v5, %v2811_v27  ;;  %v2818_v29 = vrot.slane %v2817_v14, 4 }
 0x1af   :  { %v2738_v30 = vrot.slane %v2737_v20, 1  ;;  %v4088_v34 = vmax.f32 %v2718_v58, %v7496_v10  ;;  %v2800_v51 = vmax.f32 %v2798_v35, %v2799_v52  ;;  %v2806_v62 = vrot.slane %v2805_v3, 2 }
 0x1b0   :  { %v2725_v26 = vmax.f32 %v2723_v50, %v2724_v15  ;;  %v2732_v18 = vmax.f32 %v2730_v9, %v2731_v19  ;;  %v2813_v36 = vrot.slane %v2812_v25, 2  ;;  %v2819_v24 = vmax.f32 %v2817_v14, %v2818_v29 }
 0x1b1   :  { %v2739_v38 = vmax.f32 %v2737_v20, %v2738_v30  ;;  %v2801_v49 = vrot.slane %v2800_v51, 1  ;;  %v2807_v53 = vmax.f32 %v2805_v3, %v2806_v62  ;;  %v673_v42 = vmul.f32 %v7397_v56, %v7257_v23 }
 0x1b2   :  { %v4089_v43 = vmax.f32 %v2725_v26, %v2781_v37  ;;  %v4090_v46 = vmax.f32 %v2732_v18, %v7502_v31  ;;  %v2814_v13 = vmax.f32 %v2812_v25, %v2813_v36  ;;  %v2820_v47 = vrot.slane %v2819_v24, 2 }
 0x1b3   :  { %v4091_v48 = vmax.f32 %v2739_v38, %v7506_v45  ;;  %v7518_v10 = vmax.f32 %v2800_v51, %v2801_v49  ;;  %v2808_v57 = vrot.slane %v2807_v53, 1  ;;  %v744_v59 = vadd.f32 %v7413_v39, %v673_v42 }
 0x1b4   :  { %v4387_v61 = vsel %vm4352_vm1, %v4089_v43, %v4088_v34  ;;  %v2815_v63 = vrot.slane %v2814_v13, 1  ;;  %v2821_v55 = vmax.f32 %v2819_v24, %v2820_v47  ;;  %v678_v1 = vmul.f32 %v7397_v56, %v7293_v8 }
 0x1b5   :  { %v4388_v23 = vsel %vm4354_vm2, %v4090_v46, %v4387_v61  ;;  %v7525_v37 = vmax.f32 %v2807_v53, %v2808_v57  ;;  %v808_v31 = vmax.f32 %v744_v59, 0.0  ;;  %v676_v45 = vmul.f32 %v7397_v56, %v7297_v12  ;;  %v7541_v12 = vpop.f32.mrb[32].mxu0 }
 0x1b6   :  { %v7531_v54 = vmax.f32 %v2814_v13, %v2815_v63  ;;  %v2822_v21 = vrot.slane %v2821_v55, 1  ;;  %v7534_v5 = vsel %vm4356_vm3, %v4091_v48, %v4388_v23  ;;  %v749_v17 = vadd.f32 %v7413_v39, %v678_v1  ;;  %v7550_v58 = vpop.f32.mrb[33].mxu0 }
 0x1b7   :  { %v1208_v8 = vcombine.high %v808_v31, %v808_v31  ;;  %v1215_v16 = vrot.slane %v808_v31, %v7131_v0  ;;  %v747_v35 = vadd.f32 %v7413_v39, %v676_v45  ;;  %v679_v7 = vmul.f32 %v7397_v56, %v7322_v33 }
 0x1b8   :  { %v7543_v50 = vmax.f32 %v2821_v55, %v2822_v21  ;;  %v813_v9 = vmax.f32 %v749_v17, 0.0  ;;  %v7547_v27 = vmul.f32 %v7397_v56, %v7347_v2  ;;  %v4650_v14 = vpack.c.bf16 %v7529_v4, %v4520_v44  ;;  %v7560_v2 = vpop.f32.mrb[34].mxu0 }
 0x1b9   :  { %v1222_v20 = vrot.slane %v1208_v8, %v7131_v0  ;;  %v1223_v52 = vcombine.high %v1215_v16, %v1215_v16  ;;  %v2740_v3 = vsel %vm2263_vm0, %v1215_v16, -inf  ;;  %v7554_v15 = vmax.f32 %v747_v35, 0.0 }
 0x1ba   :  { %v2741_v33 = vrot.slane %v2740_v3, 4  ;;  %v1293_v19 = vcombine.high %v813_v9, %v813_v9  ;;  %v1300_v25 = vrot.slane %v813_v9, %v7131_v0  ;;  %v7558_v29 = vadd.f32 %v7413_v39, %v679_v7  ;;  %5329 = vmatprep.mubr.bf16.mxu1 %v4650_v14 }
 0x1bb   :  { %v1224_v30 = vcombine.high %v1222_v20, %v1222_v20  ;;  %v2747_v34 = vsel %vm2263_vm0, %v1223_v52, -inf  ;;  %v2754_v51 = vsel %vm2263_vm0, %v1222_v20, -inf  ;;  %v1259_v62 = vcombine.high %v7554_v15, %v7554_v15 }
 0x1bc   :  { %v2742_v26 = vmax.f32 %v2740_v3, %v2741_v33  ;;  %v2748_v18 = vrot.slane %v2747_v34, 4  ;;  %v2755_v36 = vrot.slane %v2754_v51, 4  ;;  %v1307_v24 = vrot.slane %v1293_v19, %v7131_v0 }
 0x1bd   :  { %v2761_v38 = vsel %vm2263_vm0, %v1224_v30, -inf  ;;  %v1308_v49 = vcombine.high %v1300_v25, %v1300_v25  ;;  %v2880_v53 = vsel %vm2263_vm0, %v1300_v25, -inf  ;;  %v1266_v42 = vrot.slane %v7554_v15, %v7131_v0 }
 0x1be   :  { %v2743_v43 = vrot.slane %v2742_v26, 2  ;;  %v2749_v46 = vmax.f32 %v2747_v34, %v2748_v18  ;;  %v2756_v13 = vmax.f32 %v2754_v51, %v2755_v36  ;;  %v2762_v47 = vrot.slane %v2761_v38, 4  ;;  %v7574_v51 = vpop.f32.mrb[35].mxu0 }
 0x1bf   :  { %v1309_v48 = vcombine.high %v1307_v24, %v1307_v24  ;;  %v2881_v57 = vrot.slane %v2880_v53, 4  ;;  %v2887_v59 = vsel %vm2263_vm0, %v1308_v49, -inf  ;;  %v2894_v61 = vsel %vm2263_vm0, %v1307_v24, -inf }
 0x1c0   :  { %v2744_v63 = vmax.f32 %v2742_v26, %v2743_v43  ;;  %v2750_v55 = vrot.slane %v2749_v46, 2  ;;  %v2757_v1 = vrot.slane %v2756_v13, 2  ;;  %v2763_v23 = vmax.f32 %v2761_v38, %v2762_v47 }
 0x1c1   :  { %v2882_v31 = vmax.f32 %v2880_v53, %v2881_v57  ;;  %v2888_v45 = vrot.slane %v2887_v59, 4  ;;  %v2895_v44 = vrot.slane %v2894_v61, 4  ;;  %v2901_v21 = vsel %vm2263_vm0, %v1309_v48, -inf }
 0x1c2   :  { %v2745_v17 = vrot.slane %v2744_v63, 1  ;;  %v2751_v8 = vmax.f32 %v2749_v46, %v2750_v55  ;;  %v2758_v16 = vmax.f32 %v2756_v13, %v2757_v1  ;;  %v2764_v35 = vrot.slane %v2763_v23, 2 }
 0x1c3   :  { %v2883_v7 = vrot.slane %v2882_v31, 2  ;;  %v2889_v9 = vmax.f32 %v2887_v59, %v2888_v45  ;;  %v2896_v14 = vmax.f32 %v2894_v61, %v2895_v44  ;;  %v2902_v20 = vrot.slane %v2901_v21, 4 }
 0x1c4   :  { %v2746_v52 = vmax.f32 %v2744_v63, %v2745_v17  ;;  %v2752_v3 = vrot.slane %v2751_v8, 1  ;;  %v2759_v15 = vrot.slane %v2758_v16, 1  ;;  %v2765_v33 = vmax.f32 %v2763_v23, %v2764_v35 }
 0x1c5   :  { %v2884_v19 = vmax.f32 %v2882_v31, %v2883_v7  ;;  %v2890_v25 = vrot.slane %v2889_v9, 2  ;;  %v2897_v30 = vrot.slane %v2896_v14, 2  ;;  %v2903_v34 = vmax.f32 %v2901_v21, %v2902_v20 }
 0x1c6   :  { %v2753_v26 = vmax.f32 %v2751_v8, %v2752_v3  ;;  %v2760_v18 = vmax.f32 %v2758_v16, %v2759_v15  ;;  %v2766_v36 = vrot.slane %v2765_v33, 1  ;;  %v4092_v24 = vmax.f32 %v2746_v52, %v7518_v10  ;;  %v6871_v15 = vld [vmem:[#allocation2] sm:$0xff] }
 0x1c7   :  { %v2885_v38 = vrot.slane %v2884_v19, 1  ;;  %v2891_v49 = vmax.f32 %v2889_v9, %v2890_v25  ;;  %v2898_v53 = vmax.f32 %v2896_v14, %v2897_v30  ;;  %v2904_v43 = vrot.slane %v2903_v34, 2 }
 0x1c8   :  { %v2767_v46 = vmax.f32 %v2765_v33, %v2766_v36  ;;  %v4093_v13 = vmax.f32 %v2753_v26, %v7525_v37  ;;  %v4094_v47 = vmax.f32 %v2760_v18, %v7531_v54  ;;  %v4390_v48 = vsel %vm4358_vm4, %v4092_v24, %v7534_v5 }
 0x1c9   :  { %v7581_v57 = vmax.f32 %v2884_v19, %v2885_v38  ;;  %v2892_v59 = vrot.slane %v2891_v49, 1  ;;  %v2899_v61 = vrot.slane %v2898_v53, 1  ;;  %v2905_v63 = vmax.f32 %v2903_v34, %v2904_v43 }
 0x1ca   :  { %v4095_v55 = vmax.f32 %v2767_v46, %v7543_v50  ;;  %v4391_v10 = vsel %vm4360_vm5, %v4093_v13, %v4390_v48  ;;  %v1273_v1 = vrot.slane %v1259_v62, %v7131_v0  ;;  %v1274_v23 = vcombine.high %v1266_v42, %v1266_v42  ;;  %v4505_v50 = vld [vmem:[#allocation2 + $0x10] sm:$0xff] }
 0x1cb   :  { %v4392_v31 = vsel %vm4362_vm6, %v4094_v47, %v4391_v10  ;;  %v7587_v37 = vmax.f32 %v2891_v49, %v2892_v59  ;;  %v7589_v54 = vmax.f32 %v2898_v53, %v2899_v61  ;;  %v2906_v45 = vrot.slane %v2905_v63, 1 }
 0x1cc   :  { %v4393_v5 = vsel %vm4364_vm7, %v4095_v55, %v4392_v31  ;;  %v1275_v44 = vcombine.high %v1273_v1, %v1273_v1  ;;  %v2824_v21 = vsel %vm2263_vm0, %v1266_v42, -inf  ;;  %v2831_v17 = vsel %vm2263_vm0, %v1274_v23, -inf }
 0x1cd   :  { %4492 = vst [vmem:[#allocation2 + $0x51] sm:$0xff] %v4393_v5  ;;  %v7594_v8 = vmax.f32 %v2905_v63, %v2906_v45  ;;  %v2825_v62 = vrot.slane %v2824_v21, 4  ;;  %v2832_v16 = vrot.slane %v2831_v17, 4  ;;  %v2838_v35 = vsel %vm2263_vm0, %v1273_v1, -inf }
 0x1ce   :  { %v2839_v7 = vrot.slane %v2838_v35, 4  ;;  %v2845_v9 = vsel %vm2263_vm0, %v1275_v44, -inf  ;;  %v814_v14 = vmax.f32 %v7558_v29, 0.0  ;;  %v748_v20 = vadd.f32 %v7413_v39, %v7547_v27 }
 0x1cf   :  { %v2826_v52 = vmax.f32 %v2824_v21, %v2825_v62  ;;  %v2833_v42 = vmax.f32 %v2831_v17, %v2832_v16  ;;  %v2846_v3 = vrot.slane %v2845_v9, 4  ;;  %v4649_v33 = vpack.c.bf16 %v4505_v50, %v6871_v15 }
 0x1d0   :  { %v2840_v19 = vmax.f32 %v2838_v35, %v2839_v7  ;;  %v1310_v25 = vcombine.high %v814_v14, %v814_v14  ;;  %v1317_v30 = vrot.slane %v814_v14, %v7131_v0  ;;  %v812_v34 = vmax.f32 %v748_v20, 0.0 }
 0x1d1   :  { %v2827_v26 = vrot.slane %v2826_v52, 2  ;;  %v2834_v18 = vrot.slane %v2833_v42, 2  ;;  %v2847_v36 = vmax.f32 %v2845_v9, %v2846_v3  ;;  %5330 = vmatmul.mubr.bf16.vlgmr.msra.gmra.mrb[0].mxu1 %v4649_v33  ;;  %v682_v29 = vmul.f32 %v7397_v56, %v7372_v28 }
 0x1d2   :  { %v2841_v24 = vrot.slane %v2840_v19, 2  ;;  %v1324_v27 = vrot.slane %v1310_v25, %v7131_v0  ;;  %v1325_v38 = vcombine.high %v1317_v30, %v1317_v30  ;;  %v2908_v49 = vsel %vm2263_vm0, %v1317_v30, -inf }
 0x1d3   :  { %v2828_v53 = vmax.f32 %v2826_v52, %v2827_v26  ;;  %v2835_v43 = vmax.f32 %v2833_v42, %v2834_v18  ;;  %v2848_v46 = vrot.slane %v2847_v36, 2  ;;  %v2909_v13 = vrot.slane %v2908_v49, 4 }
 0x1d4   :  { %v2842_v47 = vmax.f32 %v2840_v19, %v2841_v24  ;;  %v1326_v48 = vcombine.high %v1324_v27, %v1324_v27  ;;  %v2915_v59 = vsel %vm2263_vm0, %v1325_v38, -inf  ;;  %v2922_v61 = vsel %vm2263_vm0, %v1324_v27, -inf }
 0x1d5   :  { %v2829_v63 = vrot.slane %v2828_v53, 1  ;;  %v2836_v55 = vrot.slane %v2835_v43, 1  ;;  %v2849_v10 = vmax.f32 %v2847_v36, %v2848_v46  ;;  %v2910_v28 = vmax.f32 %v2908_v49, %v2909_v13 }
 0x1d6   :  { %v2843_v1 = vrot.slane %v2842_v47, 1  ;;  %v2916_v23 = vrot.slane %v2915_v59, 4  ;;  %v2923_v31 = vrot.slane %v2922_v61, 4  ;;  %v2929_v45 = vsel %vm2263_vm0, %v1326_v48, -inf }
 0x1d7   :  { %v2830_v5 = vmax.f32 %v2828_v53, %v2829_v63  ;;  %v2837_v44 = vmax.f32 %v2835_v43, %v2836_v55  ;;  %v2850_v21 = vrot.slane %v2849_v10, 1  ;;  %v2911_v17 = vrot.slane %v2910_v28, 2 }
 0x1d8   :  { %v2844_v50 = vmax.f32 %v2842_v47, %v2843_v1  ;;  %v2917_v62 = vmax.f32 %v2915_v59, %v2916_v23  ;;  %v2924_v16 = vmax.f32 %v2922_v61, %v2923_v31  ;;  %v2930_v35 = vrot.slane %v2929_v45, 4  ;;  %v7631_v1 = vpop.f32.mrb[36].mxu0 }
 0x1d9   :  { %v2851_v7 = vmax.f32 %v2849_v10, %v2850_v21  ;;  %v4096_v9 = vmax.f32 %v2830_v5, %v7581_v57  ;;  %v4097_v14 = vmax.f32 %v2837_v44, %v7587_v37  ;;  %v2912_v20 = vmax.f32 %v2910_v28, %v2911_v17 }
 0x1da   :  { %v4098_v52 = vmax.f32 %v2844_v50, %v7589_v54  ;;  %v2918_v42 = vrot.slane %v2917_v62, 2  ;;  %v2925_v3 = vrot.slane %v2924_v16, 2  ;;  %v2931_v15 = vmax.f32 %v2929_v45, %v2930_v35  ;;  %v7635_v45 = vpop.f32.mrb[37].mxu0 }
 0x1db   :  { %v4099_v33 = vmax.f32 %v2851_v7, %v7594_v8  ;;  %v4394_v19 = vsel %vm4352_vm1, %v4097_v14, %v4096_v9  ;;  %v2913_v25 = vrot.slane %v2912_v20, 1  ;;  %v1276_v30 = vcombine.high %v812_v34, %v812_v34  ;;  %v7640_v50 = vpop.f32.mrb[38].mxu0 }
 0x1dc   :  { %v4395_v26 = vsel %vm4354_vm2, %v4098_v52, %v4394_v19  ;;  %v2919_v18 = vmax.f32 %v2917_v62, %v2918_v42  ;;  %v2926_v36 = vmax.f32 %v2924_v16, %v2925_v3  ;;  %v2932_v24 = vrot.slane %v2931_v15, 2 }
 0x1dd   :  { %v7615_v57 = vmax.f32 %v2912_v20, %v2913_v25  ;;  %v1283_v37 = vrot.slane %v812_v34, %v7131_v0  ;;  %v1290_v54 = vrot.slane %v1276_v30, %v7131_v0  ;;  %v7620_v27 = vsel %vm4356_vm3, %v4099_v33, %v4395_v26 }
 0x1de   :  { %v2920_v38 = vrot.slane %v2919_v18, 1  ;;  %v2927_v8 = vrot.slane %v2926_v36, 1  ;;  %v2933_v49 = vmax.f32 %v2931_v15, %v2932_v24  ;;  %v753_v53 = vadd.f32 %v7413_v39, %v682_v29 }
 0x1df   :  { %v1291_v43 = vcombine.high %v1283_v37, %v1283_v37  ;;  %v1292_v46 = vcombine.high %v1290_v54, %v1290_v54  ;;  %v2852_v13 = vsel %vm2263_vm0, %v1283_v37, -inf  ;;  %v2866_v47 = vsel %vm2263_vm0, %v1290_v54, -inf }
 0x1e0   :  { %v7625_v48 = vmax.f32 %v2919_v18, %v2920_v38  ;;  %v7627_v59 = vmax.f32 %v2926_v36, %v2927_v8  ;;  %v2934_v34 = vrot.slane %v2933_v49, 1  ;;  %v2853_v61 = vrot.slane %v2852_v13, 4 }
 0x1e1   :  { %v2859_v63 = vsel %vm2263_vm0, %v1291_v43, -inf  ;;  %v2867_v55 = vrot.slane %v2866_v47, 4  ;;  %v2873_v10 = vsel %vm2263_vm0, %v1292_v46, -inf  ;;  %v817_v28 = vmax.f32 %v753_v53, 0.0 }
 0x1e2   :  { %v7633_v39 = vmax.f32 %v2933_v49, %v2934_v34  ;;  %v2854_v29 = vmax.f32 %v2852_v13, %v2853_v61  ;;  %v2860_v23 = vrot.slane %v2859_v63, 4  ;;  %v2874_v31 = vrot.slane %v2873_v10, 4 }
 0x1e3   :  { %v2868_v5 = vmax.f32 %v2866_v47, %v2867_v55  ;;  %v1361_v44 = vcombine.high %v817_v28, %v817_v28  ;;  %v1368_v21 = vrot.slane %v817_v28, %v7131_v0  ;;  %v680_v17 = vmul.f32 %v7397_v56, %v7378_v40 }
 0x1e4   :  { %v2855_v62 = vrot.slane %v2854_v29, 2  ;;  %v2861_v16 = vmax.f32 %v2859_v63, %v2860_v23  ;;  %v2875_v35 = vmax.f32 %v2873_v10, %v2874_v31  ;;  %v683_v7 = vmul.f32 %v7397_v56, %v7405_v60 }
 0x1e5   :  { %v2869_v9 = vrot.slane %v2868_v5, 2  ;;  %v1375_v14 = vrot.slane %v1361_v44, %v7131_v0  ;;  %v1376_v20 = vcombine.high %v1368_v21, %v1368_v21  ;;  %v2992_v52 = vsel %vm2263_vm0, %v1368_v21, -inf }
 0x1e6   :  { %v2856_v42 = vmax.f32 %v2854_v29, %v2855_v62  ;;  %v2862_v3 = vrot.slane %v2861_v16, 2  ;;  %v2876_v15 = vrot.slane %v2875_v35, 2  ;;  %v2993_v33 = vrot.slane %v2992_v52, 4  ;;  %v7655_v62 = vpop.f32.mrb[39].mxu0 }
 0x1e7   :  { %v2870_v19 = vmax.f32 %v2868_v5, %v2869_v9  ;;  %v1377_v40 = vcombine.high %v1375_v14, %v1375_v14  ;;  %v2999_v25 = vsel %vm2263_vm0, %v1376_v20, -inf  ;;  %v3006_v30 = vsel %vm2263_vm0, %v1375_v14, -inf }
 0x1e8   :  { %v2857_v26 = vrot.slane %v2856_v42, 1  ;;  %v2863_v18 = vmax.f32 %v2861_v16, %v2862_v3  ;;  %v2877_v36 = vmax.f32 %v2875_v35, %v2876_v15  ;;  %v2994_v56 = vmax.f32 %v2992_v52, %v2993_v33  ;;  %v4585_v52 = vld [vmem:[#allocation2 + $0x22] sm:$0xff] }
 0x1e9   :  { %v2871_v60 = vrot.slane %v2870_v19, 1  ;;  %v3000_v24 = vrot.slane %v2999_v25, 4  ;;  %v3007_v37 = vrot.slane %v3006_v30, 4  ;;  %v3013_v54 = vsel %vm2263_vm0, %v1377_v40, -inf }
 0x1ea   :  { %v2858_v38 = vmax.f32 %v2856_v42, %v2857_v26  ;;  %v2864_v8 = vrot.slane %v2863_v18, 1  ;;  %v2878_v49 = vrot.slane %v2877_v36, 1  ;;  %v2995_v53 = vrot.slane %v2994_v56, 2 }
 0x1eb   :  { %v2872_v43 = vmax.f32 %v2870_v19, %v2871_v60  ;;  %v3001_v46 = vmax.f32 %v2999_v25, %v3000_v24  ;;  %v3008_v13 = vmax.f32 %v3006_v30, %v3007_v37  ;;  %v3014_v47 = vrot.slane %v3013_v54, 4  ;;  %v4584_v25 = vld [vmem:[#allocation2 + $0x12] sm:$0xff]  ;;  %v7677_v30 = vld [vmem:[#allocation2 + $0x21] sm:$0xff] }
 0x1ec   :  { %v2865_v34 = vmax.f32 %v2863_v18, %v2864_v8  ;;  %v2879_v61 = vmax.f32 %v2877_v36, %v2878_v49  ;;  %v4100_v63 = vmax.f32 %v2858_v38, %v7615_v57  ;;  %v2996_v55 = vmax.f32 %v2994_v56, %v2995_v53  ;;  %v7660_v57 = vld [vmem:[%s8968_s3] ss:$0 sm:$0xff] }
 0x1ed   :  { %v4102_v10 = vmax.f32 %v2872_v43, %v7627_v59  ;;  %v3002_v28 = vrot.slane %v3001_v46, 2  ;;  %v3009_v29 = vrot.slane %v3008_v13, 2  ;;  %v3015_v23 = vmax.f32 %v3013_v54, %v3014_v47 }
 0x1ee   :  { %v4101_v31 = vmax.f32 %v2865_v34, %v7625_v48  ;;  %v4103_v5 = vmax.f32 %v2879_v61, %v7633_v39  ;;  %v4397_v44 = vsel %vm4358_vm4, %v4100_v63, %v7620_v27  ;;  %v2997_v21 = vrot.slane %v2996_v55, 1  ;;  %v7670_v27 = vld [vmem:[%s8967_s2] ss:$0 sm:$0xff] }
 0x1ef   :  { %v3003_v16 = vmax.f32 %v3001_v46, %v3002_v28  ;;  %v3010_v35 = vmax.f32 %v3008_v13, %v3009_v29  ;;  %v3016_v9 = vrot.slane %v3015_v23, 2  ;;  %v751_v59 = vadd.f32 %v7660_v57, %v680_v17 }
 0x1f0   :  { %v4398_v48 = vsel %vm4360_vm5, %v4101_v31, %v4397_v44  ;;  %v7664_v14 = vmax.f32 %v2996_v55, %v2997_v21  ;;  %v754_v39 = vadd.f32 %v7660_v57, %v683_v7  ;;  %v681_v20 = vmul.f32 %v7670_v27, %v7423_v41 }
 0x1f1   :  { %v4399_v42 = vsel %vm4362_vm6, %v4102_v10, %v4398_v48  ;;  %v3004_v3 = vrot.slane %v3003_v16, 1  ;;  %v3011_v15 = vrot.slane %v3010_v35, 1  ;;  %v3017_v17 = vmax.f32 %v3015_v23, %v3016_v9 }
 0x1f2   :  { %v4400_v33 = vsel %vm4364_vm7, %v4103_v5, %v4399_v42  ;;  %v815_v19 = vmax.f32 %v751_v59, 0.0  ;;  %v818_v40 = vmax.f32 %v754_v39, 0.0  ;;  %v752_v7 = vadd.f32 %v7660_v57, %v681_v20 }
 0x1f3   :  { %4493 = vst [vmem:[#allocation2 + $0x61] sm:$0xff] %v4400_v33  ;;  %v7679_v26 = vmax.f32 %v3003_v16, %v3004_v3  ;;  %v7681_v18 = vmax.f32 %v3010_v35, %v3011_v15  ;;  %v3018_v41 = vrot.slane %v3017_v17, 1  ;;  %v4654_v36 = vpack.c.bf16 %v4585_v52, %v4584_v25 }
 0x1f4   :  { %v1327_v56 = vcombine.high %v815_v19, %v815_v19  ;;  %v1334_v60 = vrot.slane %v815_v19, %v7131_v0  ;;  %v1378_v24 = vcombine.high %v818_v40, %v818_v40  ;;  %v1385_v37 = vrot.slane %v818_v40, %v7131_v0 }
 0x1f5   :  { %v7685_v54 = vmax.f32 %v3017_v17, %v3018_v41  ;;  %v7687_v38 = vmax.f32 %v752_v7, 0.0  ;;  %5523 = vmatprep.mubr.bf16.mxu0 %v4654_v36  ;;  %v4653_v8 = vpack.c.bf16 %v7677_v30, %v7529_v4  ;;  %v7693_v49 = vmul.f32 %v7670_v27, %v7447_v6 }
 0x1f6   :  { %v1341_v53 = vrot.slane %v1327_v56, %v7131_v0  ;;  %v1342_v43 = vcombine.high %v1334_v60, %v1334_v60  ;;  %v2936_v46 = vsel %vm2263_vm0, %v1334_v60, -inf  ;;  %v1392_v13 = vrot.slane %v1378_v24, %v7131_v0 }
 0x1f7   :  { %v2937_v47 = vrot.slane %v2936_v46, 4  ;;  %v1393_v34 = vcombine.high %v1385_v37, %v1385_v37  ;;  %v3020_v61 = vsel %vm2263_vm0, %v1385_v37, -inf  ;;  %v1344_v63 = vcombine.high %v7687_v38, %v7687_v38  ;;  %5524 = vmatmul.mubr.bf16.vlgmr.msra.gmra.mrb[64].mxu0 %v4653_v8 }
 0x1f8   :  { %v1343_v4 = vcombine.high %v1341_v53, %v1341_v53  ;;  %v2943_v55 = vsel %vm2263_vm0, %v1342_v43, -inf  ;;  %v2950_v6 = vsel %vm2263_vm0, %v1341_v53, -inf  ;;  %v1394_v10 = vcombine.high %v1392_v13, %v1392_v13 }
 0x1f9   :  { %v2938_v28 = vmax.f32 %v2936_v46, %v2937_v47  ;;  %v2944_v29 = vrot.slane %v2943_v55, 4  ;;  %v2951_v23 = vrot.slane %v2950_v6, 4  ;;  %v3021_v31 = vrot.slane %v3020_v61, 4 }
 0x1fa   :  { %v2957_v5 = vsel %vm2263_vm0, %v1343_v4, -inf  ;;  %v3027_v44 = vsel %vm2263_vm0, %v1393_v34, -inf  ;;  %v3034_v21 = vsel %vm2263_vm0, %v1392_v13, -inf  ;;  %v3041_v16 = vsel %vm2263_vm0, %v1394_v10, -inf }
 0x1fb   :  { %v2939_v35 = vrot.slane %v2938_v28, 2  ;;  %v2945_v9 = vmax.f32 %v2943_v55, %v2944_v29  ;;  %v2952_v59 = vmax.f32 %v2950_v6, %v2951_v23  ;;  %v2958_v48 = vrot.slane %v2957_v5, 4 }
 0x1fc   :  { %v3022_v39 = vmax.f32 %v3020_v61, %v3021_v31  ;;  %v3028_v20 = vrot.slane %v3027_v44, 4  ;;  %v3035_v52 = vrot.slane %v3034_v21, 4  ;;  %v3042_v42 = vrot.slane %v3041_v16, 4 }
 0x1fd   :  { %v2940_v3 = vmax.f32 %v2938_v28, %v2939_v35  ;;  %v2946_v15 = vrot.slane %v2945_v9, 2  ;;  %v2953_v17 = vrot.slane %v2952_v59, 2  ;;  %v2959_v33 = vmax.f32 %v2957_v5, %v2958_v48 }
 0x1fe   :  { %v3023_v19 = vrot.slane %v3022_v39, 2  ;;  %v3029_v40 = vmax.f32 %v3027_v44, %v3028_v20  ;;  %v3036_v7 = vmax.f32 %v3034_v21, %v3035_v52  ;;  %v3043_v25 = vmax.f32 %v3041_v16, %v3042_v42 }
 0x1ff   :  { %v2941_v41 = vrot.slane %v2940_v3, 1  ;;  %v2947_v36 = vmax.f32 %v2945_v9, %v2946_v15  ;;  %v2954_v56 = vmax.f32 %v2952_v59, %v2953_v17  ;;  %v2960_v60 = vrot.slane %v2959_v33, 2 }
 0x200   :  { %v3024_v24 = vmax.f32 %v3022_v39, %v3023_v19  ;;  %v3030_v37 = vrot.slane %v3029_v40, 2  ;;  %v3037_v8 = vrot.slane %v3036_v7, 2  ;;  %v3044_v53 = vrot.slane %v3043_v25, 2 }
 0x201   :  { %v2942_v43 = vmax.f32 %v2940_v3, %v2941_v41  ;;  %v2948_v46 = vrot.slane %v2947_v36, 1  ;;  %v2955_v13 = vrot.slane %v2954_v56, 1  ;;  %v2961_v47 = vmax.f32 %v2959_v33, %v2960_v60 }
 0x202   :  { %v3025_v34 = vrot.slane %v3024_v24, 1  ;;  %v3031_v61 = vmax.f32 %v3029_v40, %v3030_v37  ;;  %v3038_v4 = vmax.f32 %v3036_v7, %v3037_v8  ;;  %v3045_v55 = vmax.f32 %v3043_v25, %v3044_v53 }
 0x203   :  { %v2949_v6 = vmax.f32 %v2947_v36, %v2948_v46  ;;  %v2956_v10 = vmax.f32 %v2954_v56, %v2955_v13  ;;  %v2962_v28 = vrot.slane %v2961_v47, 1  ;;  %v4104_v29 = vmax.f32 %v2942_v43, %v7664_v14 }
 0x204   :  { %v7708_v23 = vmax.f32 %v3024_v24, %v3025_v34  ;;  %v3032_v31 = vrot.slane %v3031_v61, 1  ;;  %v3039_v5 = vrot.slane %v3038_v4, 1  ;;  %v3046_v44 = vrot.slane %v3045_v55, 1  ;;  %v7735_v24 = vpop.f32.mrb[40].mxu0 }
 0x205   :  { %v2963_v21 = vmax.f32 %v2961_v47, %v2962_v28  ;;  %v4105_v16 = vmax.f32 %v2949_v6, %v7679_v26  ;;  %v4106_v35 = vmax.f32 %v2956_v10, %v7681_v18  ;;  %v1351_v9 = vrot.slane %v7687_v38, %v7131_v0  ;;  %v7742_v43 = vpop.f32.mrb[41].mxu0 }
 0x206   :  { %v7714_v59 = vmax.f32 %v3031_v61, %v3032_v31  ;;  %v7716_v48 = vmax.f32 %v3038_v4, %v3039_v5  ;;  %v7718_v39 = vmax.f32 %v3045_v55, %v3046_v44  ;;  %v1358_v14 = vrot.slane %v1344_v63, %v7131_v0  ;;  %v7745_v34 = vpop.f32.mrb[42].mxu0 }
 0x207   :  { %v4107_v20 = vmax.f32 %v2963_v21, %v7685_v54  ;;  %v4401_v52 = vsel %vm4352_vm1, %v4105_v16, %v4104_v29  ;;  %v1359_v42 = vcombine.high %v1351_v9, %v1351_v9  ;;  %v2964_v26 = vsel %vm2263_vm0, %v1351_v9, -inf }
 0x208   :  { %v4402_v18 = vsel %vm4354_vm2, %v4106_v35, %v4401_v52  ;;  %v1360_v3 = vcombine.high %v1358_v14, %v1358_v14  ;;  %v2965_v15 = vrot.slane %v2964_v26, 4  ;;  %v2978_v38 = vsel %vm2263_vm0, %v1358_v14, -inf }
 0x209   :  { %v2971_v17 = vsel %vm2263_vm0, %v1359_v42, -inf  ;;  %v2979_v33 = vrot.slane %v2978_v38, 4  ;;  %v4403_v19 = vsel %vm4356_vm3, %v4107_v20, %v4402_v18  ;;  %v757_v63 = vadd.f32 %v7660_v57, %v7693_v49 }
 0x20a   :  { %v2966_v54 = vmax.f32 %v2964_v26, %v2965_v15  ;;  %v2972_v40 = vrot.slane %v2971_v17, 4  ;;  %v2985_v7 = vsel %vm2263_vm0, %v1360_v3, -inf  ;;  %v684_v25 = vmul.f32 %v7670_v27, %v7461_v32 }
 0x20b   :  { %v2980_v41 = vmax.f32 %v2978_v38, %v2979_v33  ;;  %v2986_v36 = vrot.slane %v2985_v7, 4  ;;  %v821_v56 = vmax.f32 %v757_v63, 0.0  ;;  %v687_v60 = vmul.f32 %v7670_v27, %v7478_v22 }
 0x20c   :  { %v2967_v37 = vrot.slane %v2966_v54, 2  ;;  %v2973_v8 = vmax.f32 %v2971_v17, %v2972_v40  ;;  %v755_v53 = vadd.f32 %v7660_v57, %v684_v25  ;;  %v7740_v49 = vmul.f32 %v7670_v27, %v7488_v11 }
 0x20d   :  { %v2981_v46 = vrot.slane %v2980_v41, 2  ;;  %v2987_v32 = vmax.f32 %v2985_v7, %v2986_v36  ;;  %v1429_v13 = vcombine.high %v821_v56, %v821_v56  ;;  %v1436_v47 = vrot.slane %v821_v56, %v7131_v0 }
 0x20e   :  { %v2968_v22 = vmax.f32 %v2966_v54, %v2967_v37  ;;  %v2974_v61 = vrot.slane %v2973_v8, 2  ;;  %v819_v4 = vmax.f32 %v755_v53, 0.0  ;;  %v758_v55 = vadd.f32 %v7660_v57, %v687_v60 }
 0x20f   :  { %v2982_v6 = vmax.f32 %v2980_v41, %v2981_v46  ;;  %v2988_v10 = vrot.slane %v2987_v32, 2  ;;  %v1443_v28 = vrot.slane %v1429_v13, %v7131_v0  ;;  %v1444_v11 = vcombine.high %v1436_v47, %v1436_v47  ;;  %v7759_v46 = vpop.f32.mrb[43].mxu0 }
 0x210   :  { %v2969_v29 = vrot.slane %v2968_v22, 1  ;;  %v2975_v31 = vmax.f32 %v2973_v8, %v2974_v61  ;;  %v3104_v5 = vsel %vm2263_vm0, %v1436_v47, -inf  ;;  %v1395_v44 = vcombine.high %v819_v4, %v819_v4 }
 0x211   :  { %v2983_v21 = vrot.slane %v2982_v6, 1  ;;  %v2989_v16 = vmax.f32 %v2987_v32, %v2988_v10  ;;  %v1445_v35 = vcombine.high %v1443_v28, %v1443_v28  ;;  %v3105_v9 = vrot.slane %v3104_v5, 4 }
 0x212   :  { %v2970_v14 = vmax.f32 %v2968_v22, %v2969_v29  ;;  %v2976_v20 = vrot.slane %v2975_v31, 1  ;;  %v3111_v52 = vsel %vm2263_vm0, %v1444_v11, -inf  ;;  %v3118_v42 = vsel %vm2263_vm0, %v1443_v28, -inf }
 0x213   :  { %v2984_v26 = vmax.f32 %v2982_v6, %v2983_v21  ;;  %v2990_v18 = vrot.slane %v2989_v16, 1  ;;  %v3106_v3 = vmax.f32 %v3104_v5, %v3105_v9  ;;  %v3112_v15 = vrot.slane %v3111_v52, 4 }
 0x214   :  { %v2977_v38 = vmax.f32 %v2975_v31, %v2976_v20  ;;  %v4108_v17 = vmax.f32 %v2970_v14, %v7708_v23  ;;  %v3119_v33 = vrot.slane %v3118_v42, 4  ;;  %v3125_v63 = vsel %vm2263_vm0, %v1445_v35, -inf }
 0x215   :  { %v2991_v54 = vmax.f32 %v2989_v16, %v2990_v18  ;;  %v4110_v40 = vmax.f32 %v2984_v26, %v7716_v48  ;;  %v3107_v7 = vrot.slane %v3106_v3, 2  ;;  %v3113_v25 = vmax.f32 %v3111_v52, %v3112_v15 }
 0x216   :  { %v4109_v41 = vmax.f32 %v2977_v38, %v7714_v59  ;;  %v4404_v36 = vsel %vm4358_vm4, %v4108_v17, %v4403_v19  ;;  %v3120_v56 = vmax.f32 %v3118_v42, %v3119_v33  ;;  %v3126_v60 = vrot.slane %v3125_v63, 4 }
 0x217   :  { %v4111_v37 = vmax.f32 %v2991_v54, %v7718_v39  ;;  %v3108_v8 = vmax.f32 %v3106_v3, %v3107_v7  ;;  %v3114_v53 = vrot.slane %v3113_v25, 2  ;;  %v1402_v23 = vrot.slane %v819_v4, %v7131_v0 }
 0x218   :  { %v4405_v32 = vsel %vm4360_vm5, %v4109_v41, %v4404_v36  ;;  %v3121_v13 = vrot.slane %v3120_v56, 2  ;;  %v3127_v48 = vmax.f32 %v3125_v63, %v3126_v60  ;;  %v1409_v47 = vrot.slane %v1395_v44, %v7131_v0 }
 0x219   :  { %v4406_v59 = vsel %vm4362_vm6, %v4110_v40, %v4405_v32  ;;  %v3109_v22 = vrot.slane %v3108_v8, 1  ;;  %v3115_v19 = vmax.f32 %v3113_v25, %v3114_v53  ;;  %v1410_v61 = vcombine.high %v1402_v23, %v1402_v23 }
 0x21a   :  { %v4407_v6 = vsel %vm4364_vm7, %v4111_v37, %v4406_v59  ;;  %v3122_v39 = vmax.f32 %v3120_v56, %v3121_v13  ;;  %v3128_v10 = vrot.slane %v3127_v48, 2  ;;  %v1411_v28 = vcombine.high %v1409_v47, %v1409_v47 }
 0x21b   :  { %4494 = vst [vmem:[#allocation2 + $0x71] sm:$0xff] %v4407_v6  ;;  %v3110_v4 = vmax.f32 %v3108_v8, %v3109_v22  ;;  %v3116_v11 = vrot.slane %v3115_v19, 1  ;;  %v3048_v29 = vsel %vm2263_vm0, %v1402_v23, -inf  ;;  %v3055_v31 = vsel %vm2263_vm0, %v1410_v61, -inf }
 0x21c   :  { %v3123_v5 = vrot.slane %v3122_v39, 1  ;;  %v3129_v21 = vmax.f32 %v3127_v48, %v3128_v10  ;;  %v3049_v44 = vrot.slane %v3048_v29, 4  ;;  %v3056_v16 = vrot.slane %v3055_v31, 4 }
 0x21d   :  { %v3117_v35 = vmax.f32 %v3115_v19, %v3116_v11  ;;  %v3062_v9 = vsel %vm2263_vm0, %v1409_v47, -inf  ;;  %v3069_v14 = vsel %vm2263_vm0, %v1411_v28, -inf  ;;  %v822_v20 = vmax.f32 %v758_v55, 0.0 }
 0x21e   :  { %v7769_v52 = vmax.f32 %v3122_v39, %v3123_v5  ;;  %v3130_v42 = vrot.slane %v3129_v21, 1  ;;  %v3050_v26 = vmax.f32 %v3048_v29, %v3049_v44  ;;  %v3057_v18 = vmax.f32 %v3055_v31, %v3056_v16 }
 0x21f   :  { %v3063_v3 = vrot.slane %v3062_v9, 4  ;;  %v3070_v15 = vrot.slane %v3069_v14, 4  ;;  %v1446_v38 = vcombine.high %v822_v20, %v822_v20  ;;  %v1453_v17 = vrot.slane %v822_v20, %v7131_v0 }
 0x220   :  { %v7772_v33 = vmax.f32 %v3129_v21, %v3130_v42  ;;  %v3051_v63 = vrot.slane %v3050_v26, 2  ;;  %v3058_v54 = vrot.slane %v3057_v18, 2  ;;  %v756_v40 = vadd.f32 %v7660_v57, %v7740_v49 }
 0x221   :  { %v3064_v7 = vmax.f32 %v3062_v9, %v3063_v3  ;;  %v3071_v25 = vmax.f32 %v3069_v14, %v3070_v15  ;;  %v1460_v55 = vrot.slane %v1446_v38, %v7131_v0  ;;  %v1461_v41 = vcombine.high %v1453_v17, %v1453_v17 }
 0x222   :  { %v3052_v36 = vmax.f32 %v3050_v26, %v3051_v63  ;;  %v3059_v56 = vmax.f32 %v3057_v18, %v3058_v54  ;;  %v3132_v60 = vsel %vm2263_vm0, %v1453_v17, -inf  ;;  %v820_v37 = vmax.f32 %v756_v40, 0.0  ;;  %v7782_v17 = vld [vmem:[#allocation2 + $0x31] sm:$0xff] }
 0x223   :  { %v3065_v8 = vrot.slane %v3064_v7, 2  ;;  %v3072_v53 = vrot.slane %v3071_v25, 2  ;;  %v1462_v23 = vcombine.high %v1460_v55, %v1460_v55  ;;  %v3133_v32 = vrot.slane %v3132_v60, 4 }
 0x224   :  { %v3053_v13 = vrot.slane %v3052_v36, 1  ;;  %v3060_v48 = vrot.slane %v3059_v56, 1  ;;  %v3139_v47 = vsel %vm2263_vm0, %v1461_v41, -inf  ;;  %v3146_v49 = vsel %vm2263_vm0, %v1460_v55, -inf }
 0x225   :  { %v3066_v59 = vmax.f32 %v3064_v7, %v3065_v8  ;;  %v3073_v22 = vmax.f32 %v3071_v25, %v3072_v53  ;;  %v3134_v19 = vmax.f32 %v3132_v60, %v3133_v32  ;;  %v3140_v61 = vrot.slane %v3139_v47, 4 }
 0x226   :  { %v3054_v6 = vmax.f32 %v3052_v36, %v3053_v13  ;;  %v3061_v39 = vmax.f32 %v3059_v56, %v3060_v48  ;;  %v3147_v10 = vrot.slane %v3146_v49, 4  ;;  %v3153_v28 = vsel %vm2263_vm0, %v1462_v23, -inf  ;;  %v4507_v23 = vld [vmem:[#allocation2 + $0x30] sm:$0xff] }
 0x227   :  { %v3067_v11 = vrot.slane %v3066_v59, 1  ;;  %v3074_v29 = vrot.slane %v3073_v22, 1  ;;  %v3135_v31 = vrot.slane %v3134_v19, 2  ;;  %v3141_v5 = vmax.f32 %v3139_v47, %v3140_v61 }
 0x228   :  { %v4112_v21 = vmax.f32 %v3054_v6, %v3110_v4  ;;  %v4113_v44 = vmax.f32 %v3061_v39, %v3117_v35  ;;  %v3148_v16 = vmax.f32 %v3146_v49, %v3147_v10  ;;  %v3154_v9 = vrot.slane %v3153_v28, 4 }
 0x229   :  { %v3068_v14 = vmax.f32 %v3066_v59, %v3067_v11  ;;  %v3075_v20 = vmax.f32 %v3073_v22, %v3074_v29  ;;  %v3136_v42 = vmax.f32 %v3134_v19, %v3135_v31  ;;  %v3142_v26 = vrot.slane %v3141_v5, 2  ;;  %v4506_v22 = vld [vmem:[#allocation2 + $0x20] sm:$0xff]  ;;  %v7808_v31 = vpop.f32.mrb[44].mxu0 }
 0x22a   :  { %v4408_v18 = vsel %vm4352_vm1, %v4113_v44, %v4112_v21  ;;  %v3149_v3 = vrot.slane %v3148_v16, 2  ;;  %v3155_v15 = vmax.f32 %v3153_v28, %v3154_v9  ;;  %v1412_v38 = vcombine.high %v820_v37, %v820_v37  ;;  %v7814_v9 = vpop.f32.mrb[45].mxu0 }
 0x22b   :  { %v4114_v63 = vmax.f32 %v3068_v14, %v7769_v52  ;;  %v4115_v54 = vmax.f32 %v3075_v20, %v7772_v33  ;;  %v3137_v40 = vrot.slane %v3136_v42, 1  ;;  %v3143_v4 = vmax.f32 %v3141_v5, %v3142_v26  ;;  %v7819_v26 = vpop.f32.mrb[46].mxu0 }
 0x22c   :  { %v3150_v35 = vmax.f32 %v3148_v16, %v3149_v3  ;;  %v3156_v7 = vrot.slane %v3155_v15, 2  ;;  %v1419_v25 = vrot.slane %v820_v37, %v7131_v0  ;;  %v1426_v55 = vrot.slane %v1412_v38, %v7131_v0 }
 0x22d   :  { %v4409_v41 = vsel %vm4354_vm2, %v4114_v63, %v4408_v18  ;;  %v7789_v36 = vmax.f32 %v3136_v42, %v3137_v40  ;;  %v3144_v56 = vrot.slane %v3143_v4, 1  ;;  %v4659_v60 = vpack.c.bf16 %v7782_v17, %v7677_v30 }
 0x22e   :  { %v3151_v8 = vrot.slane %v3150_v35, 1  ;;  %v3157_v52 = vmax.f32 %v3155_v15, %v3156_v7  ;;  %v1427_v53 = vcombine.high %v1419_v25, %v1419_v25  ;;  %v1428_v33 = vcombine.high %v1426_v55, %v1426_v55 }
 0x22f   :  { %v7793_v32 = vmax.f32 %v3143_v4, %v3144_v56  ;;  %v3076_v13 = vsel %vm2263_vm0, %v1419_v25, -inf  ;;  %v3090_v37 = vsel %vm2263_vm0, %v1426_v55, -inf  ;;  %v7798_v48 = vsel %vm4356_vm3, %v4115_v54, %v4409_v41  ;;  %5337 = vmatprep.mubr.bf16.mxu1 %v4659_v60 }
 0x230   :  { %v7800_v47 = vmax.f32 %v3150_v35, %v3151_v8  ;;  %v3158_v49 = vrot.slane %v3157_v52, 1  ;;  %v3077_v59 = vrot.slane %v3076_v13, 4  ;;  %v3083_v30 = vsel %vm2263_vm0, %v1427_v53, -inf }
 0x231   :  { %v3084_v19 = vrot.slane %v3083_v30, 4  ;;  %v3091_v61 = vrot.slane %v3090_v37, 4  ;;  %v3097_v6 = vsel %vm2263_vm0, %v1428_v33, -inf  ;;  %v4658_v39 = vpack.c.bf16 %v4507_v23, %v4506_v22 }
 0x232   :  { %v7804_v10 = vmax.f32 %v3157_v52, %v3158_v49  ;;  %v3078_v28 = vmax.f32 %v3076_v13, %v3077_v59  ;;  %v3098_v11 = vrot.slane %v3097_v6, 4  ;;  %v690_v29 = vmul.f32 %v7670_v27, %v7541_v12 }
 0x233   :  { %v3085_v5 = vmax.f32 %v3083_v30, %v3084_v19  ;;  %v3092_v21 = vmax.f32 %v3090_v37, %v3091_v61  ;;  %5338 = vmatmul.mubr.bf16.gmra.mrb[4].mxu1 %v4658_v39  ;;  %v688_v44 = vmul.f32 %v7670_v27, %v7550_v58  ;;  %v691_v16 = vmul.f32 %v7670_v27, %v7560_v2 }
 0x234   :  { %v3079_v14 = vrot.slane %v3078_v28, 2  ;;  %v3099_v20 = vmax.f32 %v3097_v6, %v3098_v11  ;;  %v761_v42 = vadd.f32 %v7660_v57, %v690_v29  ;;  %v689_v12 = vmul.f32 %v7670_v27, %v7574_v51 }
 0x235   :  { %v3086_v18 = vrot.slane %v3085_v5, 2  ;;  %v3093_v3 = vrot.slane %v3092_v21, 2  ;;  %v759_v15 = vadd.f32 %v7660_v57, %v688_v44  ;;  %v762_v58 = vadd.f32 %v7660_v57, %v691_v16 }
 0x236   :  { %v3080_v38 = vmax.f32 %v3078_v28, %v3079_v14  ;;  %v3100_v63 = vrot.slane %v3099_v20, 2  ;;  %v825_v2 = vmax.f32 %v761_v42, 0.0  ;;  %v7824_v54 = vadd.f32 %v7660_v57, %v689_v12  ;;  %v7841_v14 = vpop.f32.mrb[47].mxu0 }
 0x237   :  { %v3087_v40 = vmax.f32 %v3085_v5, %v3086_v18  ;;  %v3094_v4 = vmax.f32 %v3092_v21, %v3093_v3  ;;  %v823_v35 = vmax.f32 %v759_v15, 0.0  ;;  %v7826_v7 = vmax.f32 %v762_v58, 0.0 }
 0x238   :  { %v3081_v51 = vrot.slane %v3080_v38, 1  ;;  %v3101_v25 = vmax.f32 %v3099_v20, %v3100_v63  ;;  %v1497_v55 = vcombine.high %v825_v2, %v825_v2  ;;  %v1504_v41 = vrot.slane %v825_v2, %v7131_v0 }
 0x239   :  { %v3088_v56 = vrot.slane %v3087_v40, 1  ;;  %v3095_v60 = vrot.slane %v3094_v4, 1  ;;  %v1463_v8 = vcombine.high %v823_v35, %v823_v35  ;;  %v1470_v52 = vrot.slane %v823_v35, %v7131_v0 }
 0x23a   :  { %v3082_v53 = vmax.f32 %v3080_v38, %v3081_v51  ;;  %v3102_v33 = vrot.slane %v3101_v25, 1  ;;  %v1511_v23 = vrot.slane %v1497_v55, %v7131_v0  ;;  %v1512_v13 = vcombine.high %v1504_v41, %v1504_v41 }
 0x23b   :  { %v3089_v37 = vmax.f32 %v3087_v40, %v3088_v56  ;;  %v3096_v49 = vmax.f32 %v3094_v4, %v3095_v60  ;;  %v3216_v59 = vsel %vm2263_vm0, %v1504_v41, -inf  ;;  %v1477_v30 = vrot.slane %v1463_v8, %v7131_v0 }
 0x23c   :  { %v3103_v22 = vmax.f32 %v3101_v25, %v3102_v33  ;;  %v4116_v19 = vmax.f32 %v3082_v53, %v7789_v36  ;;  %v1513_v61 = vcombine.high %v1511_v23, %v1511_v23  ;;  %v3217_v6 = vrot.slane %v3216_v59, 4 }
 0x23d   :  { %v4117_v39 = vmax.f32 %v3089_v37, %v7793_v32  ;;  %v4118_v28 = vmax.f32 %v3096_v49, %v7800_v47  ;;  %v3223_v11 = vsel %vm2263_vm0, %v1512_v13, -inf  ;;  %v3230_v29 = vsel %vm2263_vm0, %v1511_v23, -inf }
 0x23e   :  { %v4119_v5 = vmax.f32 %v3103_v22, %v7804_v10  ;;  %v4411_v21 = vsel %vm4358_vm4, %v4116_v19, %v7798_v48  ;;  %v3218_v44 = vmax.f32 %v3216_v59, %v3217_v6  ;;  %v3224_v16 = vrot.slane %v3223_v11, 4 }
 0x23f   :  { %v4412_v36 = vsel %vm4360_vm5, %v4117_v39, %v4411_v21  ;;  %v3231_v20 = vrot.slane %v3230_v29, 4  ;;  %v3237_v32 = vsel %vm2263_vm0, %v1513_v61, -inf  ;;  %v1478_v42 = vcombine.high %v1470_v52, %v1470_v52 }
 0x240   :  { %v4413_v47 = vsel %vm4362_vm6, %v4118_v28, %v4412_v36  ;;  %v3219_v12 = vrot.slane %v3218_v44, 2  ;;  %v3225_v18 = vmax.f32 %v3223_v11, %v3224_v16  ;;  %v3238_v3 = vrot.slane %v3237_v32, 4 }
 0x241   :  { %v4414_v10 = vsel %vm4364_vm7, %v4119_v5, %v4413_v47  ;;  %v3232_v15 = vmax.f32 %v3230_v29, %v3231_v20  ;;  %v1479_v58 = vcombine.high %v1477_v30, %v1477_v30  ;;  %v3160_v48 = vsel %vm2263_vm0, %v1470_v52, -inf }
 0x242   :  { %4495 = vst [vmem:[#allocation2 + $0x81] sm:$0xff] %v4414_v10  ;;  %v3220_v38 = vmax.f32 %v3218_v44, %v3219_v12  ;;  %v3226_v63 = vrot.slane %v3225_v18, 2  ;;  %v3239_v2 = vmax.f32 %v3237_v32, %v3238_v3  ;;  %v3161_v40 = vrot.slane %v3160_v48, 4 }
 0x243   :  { %v3233_v4 = vrot.slane %v3232_v15, 2  ;;  %v3167_v35 = vsel %vm2263_vm0, %v1478_v42, -inf  ;;  %v3174_v51 = vsel %vm2263_vm0, %v1477_v30, -inf  ;;  %v3181_v25 = vsel %vm2263_vm0, %v1479_v58, -inf }
 0x244   :  { %v3221_v55 = vrot.slane %v3220_v38, 1  ;;  %v3227_v41 = vmax.f32 %v3225_v18, %v3226_v63  ;;  %v3240_v56 = vrot.slane %v3239_v2, 2  ;;  %v3162_v60 = vmax.f32 %v3160_v48, %v3161_v40 }
 0x245   :  { %v3234_v8 = vmax.f32 %v3232_v15, %v3233_v4  ;;  %v3168_v53 = vrot.slane %v3167_v35, 4  ;;  %v3175_v33 = vrot.slane %v3174_v51, 4  ;;  %v3182_v52 = vrot.slane %v3181_v25, 4 }
 0x246   :  { %v3222_v23 = vmax.f32 %v3220_v38, %v3221_v55  ;;  %v3228_v13 = vrot.slane %v3227_v41, 1  ;;  %v3241_v37 = vmax.f32 %v3239_v2, %v3240_v56  ;;  %v3163_v49 = vrot.slane %v3162_v60, 2 }
 0x247   :  { %v3235_v59 = vrot.slane %v3234_v8, 1  ;;  %v3169_v22 = vmax.f32 %v3167_v35, %v3168_v53  ;;  %v3176_v19 = vmax.f32 %v3174_v51, %v3175_v33  ;;  %v3183_v61 = vmax.f32 %v3181_v25, %v3182_v52 }
 0x248   :  { %v3229_v6 = vmax.f32 %v3227_v41, %v3228_v13  ;;  %v3242_v30 = vrot.slane %v3241_v37, 1  ;;  %v3164_v39 = vmax.f32 %v3162_v60, %v3163_v49  ;;  %v1514_v28 = vcombine.high %v7826_v7, %v7826_v7 }
 0x249   :  { %v3236_v11 = vmax.f32 %v3234_v8, %v3235_v59  ;;  %v3170_v29 = vrot.slane %v3169_v22, 2  ;;  %v3177_v5 = vrot.slane %v3176_v19, 2  ;;  %v3184_v21 = vrot.slane %v3183_v61, 2  ;;  %v4587_v8 = vld [vmem:[#allocation2 + $0x42] sm:$0xff] }
 0x24a   :  { %v7853_v44 = vmax.f32 %v3241_v37, %v3242_v30  ;;  %v3165_v16 = vrot.slane %v3164_v39, 1  ;;  %v1521_v36 = vrot.slane %v7826_v7, %v7131_v0  ;;  %v1528_v20 = vrot.slane %v1514_v28, %v7131_v0 }
 0x24b   :  { %v3171_v32 = vmax.f32 %v3169_v22, %v3170_v29  ;;  %v3178_v42 = vmax.f32 %v3176_v19, %v3177_v5  ;;  %v3185_v47 = vmax.f32 %v3183_v61, %v3184_v21  ;;  %v824_v12 = vmax.f32 %v7824_v54, 0.0  ;;  %v4586_v22 = vld [vmem:[#allocation2 + $0x32] sm:$0xff] }
 0x24c   :  { %v3166_v18 = vmax.f32 %v3164_v39, %v3165_v16  ;;  %v1529_v3 = vcombine.high %v1521_v36, %v1521_v36  ;;  %v1530_v10 = vcombine.high %v1528_v20, %v1528_v20  ;;  %v3244_v15 = vsel %vm2263_vm0, %v1521_v36, -inf }
 0x24d   :  { %v3172_v58 = vrot.slane %v3171_v32, 1  ;;  %v3179_v48 = vrot.slane %v3178_v42, 1  ;;  %v3186_v38 = vrot.slane %v3185_v47, 1  ;;  %v3245_v63 = vrot.slane %v3244_v15, 4 }
 0x24e   :  { %v4120_v2 = vmax.f32 %v3166_v18, %v3222_v23  ;;  %v3251_v40 = vsel %vm2263_vm0, %v1529_v3, -inf  ;;  %v3258_v7 = vsel %vm2263_vm0, %v1528_v20, -inf  ;;  %v3265_v4 = vsel %vm2263_vm0, %v1530_v10, -inf }
 0x24f   :  { %v3173_v35 = vmax.f32 %v3171_v32, %v3172_v58  ;;  %v3180_v51 = vmax.f32 %v3178_v42, %v3179_v48  ;;  %v3187_v25 = vmax.f32 %v3185_v47, %v3186_v38  ;;  %v3246_v54 = vmax.f32 %v3244_v15, %v3245_v63  ;;  %v7872_v38 = vld [vmem:[#allocation2 + $0x41] sm:$0xff] }
 0x250   :  { %v3252_v55 = vrot.slane %v3251_v40, 4  ;;  %v3259_v41 = vrot.slane %v3258_v7, 4  ;;  %v3266_v56 = vrot.slane %v3265_v4, 4  ;;  %v1480_v60 = vcombine.high %v824_v12, %v824_v12 }
 0x251   :  { %v4121_v53 = vmax.f32 %v3173_v35, %v3229_v6  ;;  %v4122_v33 = vmax.f32 %v3180_v51, %v3236_v11  ;;  %v4123_v52 = vmax.f32 %v3187_v25, %v7853_v44  ;;  %v3247_v23 = vrot.slane %v3246_v54, 2 }
 0x252   :  { %v3253_v13 = vmax.f32 %v3251_v40, %v3252_v55  ;;  %v3260_v37 = vmax.f32 %v3258_v7, %v3259_v41  ;;  %v3267_v49 = vmax.f32 %v3265_v4, %v3266_v56  ;;  %v1487_v59 = vrot.slane %v824_v12, %v7131_v0 }
 0x253   :  { %v4415_v19 = vsel %vm4352_vm1, %v4121_v53, %v4120_v2  ;;  %v3248_v61 = vmax.f32 %v3246_v54, %v3247_v23  ;;  %v1494_v30 = vrot.slane %v1480_v60, %v7131_v0  ;;  %v4663_v39 = vpack.c.bf16 %v4587_v8, %v4586_v22  ;;  %v7877_v54 = vpop.f32.mrb[48].mxu0 }
 0x254   :  { %v4416_v28 = vsel %vm4354_vm2, %v4122_v33, %v4415_v19  ;;  %v3254_v29 = vrot.slane %v3253_v13, 2  ;;  %v3261_v6 = vrot.slane %v3260_v37, 2  ;;  %v3268_v11 = vrot.slane %v3267_v49, 2  ;;  %v7881_v8 = vpop.f32.mrb[49].mxu0 }
 0x255   :  { %v3249_v5 = vrot.slane %v3248_v61, 1  ;;  %v1495_v21 = vcombine.high %v1487_v59, %v1487_v59  ;;  %v1496_v44 = vcombine.high %v1494_v30, %v1494_v30  ;;  %v3188_v16 = vsel %vm2263_vm0, %v1487_v59, -inf  ;;  %5531 = vmatprep.mubr.bf16.mxu0 %v4663_v39 }
 0x256   :  { %v3255_v36 = vmax.f32 %v3253_v13, %v3254_v29  ;;  %v3262_v20 = vmax.f32 %v3260_v37, %v3261_v6  ;;  %v3269_v32 = vmax.f32 %v3267_v49, %v3268_v11  ;;  %v3189_v42 = vrot.slane %v3188_v16, 4  ;;  %v7889_v13 = vpop.f32.mrb[50].mxu0 }
 0x257   :  { %v3250_v47 = vmax.f32 %v3248_v61, %v3249_v5  ;;  %v3195_v12 = vsel %vm2263_vm0, %v1495_v21, -inf  ;;  %v3202_v18 = vsel %vm2263_vm0, %v1494_v30, -inf  ;;  %v3209_v3 = vsel %vm2263_vm0, %v1496_v44, -inf }
 0x258   :  { %v3256_v10 = vrot.slane %v3255_v36, 1  ;;  %v3263_v15 = vrot.slane %v3262_v20, 1  ;;  %v3270_v58 = vrot.slane %v3269_v32, 1  ;;  %v3190_v48 = vmax.f32 %v3188_v16, %v3189_v42 }
 0x259   :  { %v3196_v63 = vrot.slane %v3195_v12, 4  ;;  %v3203_v2 = vrot.slane %v3202_v18, 4  ;;  %v3210_v40 = vrot.slane %v3209_v3, 4  ;;  %v4417_v7 = vsel %vm4356_vm3, %v4123_v52, %v4416_v28 }
 0x25a   :  { %v3257_v4 = vmax.f32 %v3255_v36, %v3256_v10  ;;  %v3264_v35 = vmax.f32 %v3262_v20, %v3263_v15  ;;  %v7875_v51 = vmax.f32 %v3269_v32, %v3270_v58  ;;  %v3191_v25 = vrot.slane %v3190_v48, 2 }
 0x25b   :  { %v3197_v55 = vmax.f32 %v3195_v12, %v3196_v63  ;;  %v3204_v41 = vmax.f32 %v3202_v18, %v3203_v2  ;;  %v3211_v56 = vmax.f32 %v3209_v3, %v3210_v40  ;;  %v4662_v60 = vpack.c.bf16 %v7872_v38, %v7782_v17 }
 0x25c   :  { %v3192_v53 = vmax.f32 %v3190_v48, %v3191_v25  ;;  %v694_v33 = vmul.f32 %v7670_v27, %v7631_v1  ;;  %v692_v52 = vmul.f32 %v7670_v27, %v7635_v45  ;;  %v695_v23 = vmul.f32 %v7670_v27, %v7640_v50 }
 0x25d   :  { %v3198_v37 = vrot.slane %v3197_v55, 2  ;;  %v3205_v49 = vrot.slane %v3204_v41, 2  ;;  %v3212_v59 = vrot.slane %v3211_v56, 2  ;;  %5532 = vmatmul.mubr.bf16.gmra.mrb[68].mxu0 %v4662_v60  ;;  %v693_v17 = vmul.f32 %v7670_v27, %v7655_v62 }
 0x25e   :  { %v3193_v22 = vrot.slane %v3192_v53, 1  ;;  %v765_v19 = vadd.f32 %v7660_v57, %v694_v33  ;;  %v763_v1 = vadd.f32 %v7660_v57, %v692_v52  ;;  %v766_v61 = vadd.f32 %v7660_v57, %v695_v23 }
 0x25f   :  { %v3199_v45 = vmax.f32 %v3197_v55, %v3198_v37  ;;  %v3206_v30 = vmax.f32 %v3204_v41, %v3205_v49  ;;  %v3213_v39 = vmax.f32 %v3211_v56, %v3212_v59  ;;  %v764_v50 = vadd.f32 %v7660_v57, %v693_v17 }
 0x260   :  { %v3194_v28 = vmax.f32 %v3192_v53, %v3193_v22  ;;  %v829_v29 = vmax.f32 %v765_v19, 0.0  ;;  %v827_v6 = vmax.f32 %v763_v1, 0.0  ;;  %v7897_v11 = vmax.f32 %v766_v61, 0.0  ;;  %v7911_v53 = vpop.f32.mrb[51].mxu0 }
 0x261   :  { %v3200_v5 = vrot.slane %v3199_v45, 1  ;;  %v3207_v21 = vrot.slane %v3206_v30, 1  ;;  %v3214_v62 = vrot.slane %v3213_v39, 1  ;;  %v7899_v27 = vmax.f32 %v764_v50, 0.0 }
 0x262   :  { %v4124_v44 = vmax.f32 %v3194_v28, %v3250_v47  ;;  %v1565_v16 = vcombine.high %v829_v29, %v829_v29  ;;  %v1572_v36 = vrot.slane %v829_v29, %v7131_v0  ;;  %v1531_v20 = vcombine.high %v827_v6, %v827_v6 }
 0x263   :  { %v3201_v32 = vmax.f32 %v3199_v45, %v3200_v5  ;;  %v3208_v42 = vmax.f32 %v3206_v30, %v3207_v21  ;;  %v3215_v12 = vmax.f32 %v3213_v39, %v3214_v62  ;;  %v1538_v57 = vrot.slane %v827_v6, %v7131_v0 }
 0x264   :  { %v4418_v18 = vsel %vm4358_vm4, %v4124_v44, %v4417_v7  ;;  %v1579_v3 = vrot.slane %v1565_v16, %v7131_v0  ;;  %v1580_v10 = vcombine.high %v1572_v36, %v1572_v36  ;;  %v3328_v15 = vsel %vm2263_vm0, %v1572_v36, -inf }
 0x265   :  { %v4125_v58 = vmax.f32 %v3201_v32, %v3257_v4  ;;  %v4126_v48 = vmax.f32 %v3208_v42, %v3264_v35  ;;  %v4127_v47 = vmax.f32 %v3215_v12, %v7875_v51  ;;  %v3329_v63 = vrot.slane %v3328_v15, 4 }
 0x266   :  { %v1581_v2 = vcombine.high %v1579_v3, %v1579_v3  ;;  %v3335_v40 = vsel %vm2263_vm0, %v1580_v10, -inf  ;;  %v3342_v25 = vsel %vm2263_vm0, %v1579_v3, -inf  ;;  %v1545_v55 = vrot.slane %v1531_v20, %v7131_v0 }
 0x267   :  { %v4419_v41 = vsel %vm4360_vm5, %v4125_v58, %v4418_v18  ;;  %v3330_v7 = vmax.f32 %v3328_v15, %v3329_v63  ;;  %v3336_v56 = vrot.slane %v3335_v40, 4  ;;  %v3343_v60 = vrot.slane %v3342_v25, 4 }
 0x268   :  { %v4420_v4 = vsel %vm4362_vm6, %v4126_v48, %v4419_v41  ;;  %v3349_v35 = vsel %vm2263_vm0, %v1581_v2, -inf  ;;  %v1546_v51 = vcombine.high %v1538_v57, %v1538_v57  ;;  %v1547_v33 = vcombine.high %v1545_v55, %v1545_v55 }
 0x269   :  { %v4421_v52 = vsel %vm4364_vm7, %v4127_v47, %v4420_v4  ;;  %v3331_v23 = vrot.slane %v3330_v7, 2  ;;  %v3337_v37 = vmax.f32 %v3335_v40, %v3336_v56  ;;  %v3344_v49 = vmax.f32 %v3342_v25, %v3343_v60 }
 0x26a   :  { %4496 = vst [vmem:[#allocation2 + $0xb1] sm:$0xff] %v4421_v52  ;;  %v3350_v59 = vrot.slane %v3349_v35, 4  ;;  %v3272_v17 = vsel %vm2263_vm0, %v1538_v57, -inf  ;;  %v3279_v22 = vsel %vm2263_vm0, %v1546_v51, -inf  ;;  %v3286_v19 = vsel %vm2263_vm0, %v1545_v55, -inf }
 0x26b   :  { %v3332_v1 = vmax.f32 %v3330_v7, %v3331_v23  ;;  %v3338_v61 = vrot.slane %v3337_v37, 2  ;;  %v3345_v45 = vrot.slane %v3344_v49, 2  ;;  %v3273_v30 = vrot.slane %v3272_v17, 4 }
 0x26c   :  { %v3351_v39 = vmax.f32 %v3349_v35, %v3350_v59  ;;  %v3280_v50 = vrot.slane %v3279_v22, 4  ;;  %v3287_v28 = vrot.slane %v3286_v19, 4  ;;  %v3293_v29 = vsel %vm2263_vm0, %v1547_v33, -inf }
 0x26d   :  { %v3333_v6 = vrot.slane %v3332_v1, 1  ;;  %v3339_v5 = vmax.f32 %v3337_v37, %v3338_v61  ;;  %v3346_v21 = vmax.f32 %v3344_v49, %v3345_v45  ;;  %v3274_v62 = vmax.f32 %v3272_v17, %v3273_v30 }
 0x26e   :  { %v3352_v44 = vrot.slane %v3351_v39, 2  ;;  %v3281_v16 = vmax.f32 %v3279_v22, %v3280_v50  ;;  %v3288_v36 = vmax.f32 %v3286_v19, %v3287_v28  ;;  %v3294_v20 = vrot.slane %v3293_v29, 4 }
 0x26f   :  { %v3334_v32 = vmax.f32 %v3332_v1, %v3333_v6  ;;  %v3340_v42 = vrot.slane %v3339_v5, 1  ;;  %v3347_v12 = vrot.slane %v3346_v21, 1  ;;  %v3275_v57 = vrot.slane %v3274_v62, 2 }
 0x270   :  { %v3353_v18 = vmax.f32 %v3351_v39, %v3352_v44  ;;  %v3282_v3 = vrot.slane %v3281_v16, 2  ;;  %v3289_v10 = vrot.slane %v3288_v36, 2  ;;  %v3295_v15 = vmax.f32 %v3293_v29, %v3294_v20 }
 0x271   :  { %v3341_v58 = vmax.f32 %v3339_v5, %v3340_v42  ;;  %v3348_v48 = vmax.f32 %v3346_v21, %v3347_v12  ;;  %v3276_v47 = vmax.f32 %v3274_v62, %v3275_v57  ;;  %v1582_v63 = vcombine.high %v7897_v11, %v7897_v11 }
 0x272   :  { %v3354_v2 = vrot.slane %v3353_v18, 1  ;;  %v3283_v40 = vmax.f32 %v3281_v16, %v3282_v3  ;;  %v3290_v25 = vmax.f32 %v3288_v36, %v3289_v10  ;;  %v3296_v55 = vrot.slane %v3295_v15, 2 }
 0x273   :  { %v3277_v41 = vrot.slane %v3276_v47, 1  ;;  %v1589_v7 = vrot.slane %v7897_v11, %v7131_v0  ;;  %v1596_v56 = vrot.slane %v1582_v63, %v7131_v0  ;;  %v1548_v60 = vcombine.high %v7899_v27, %v7899_v27 }
 0x274   :  { %v3355_v4 = vmax.f32 %v3353_v18, %v3354_v2  ;;  %v3284_v35 = vrot.slane %v3283_v40, 1  ;;  %v3291_v51 = vrot.slane %v3290_v25, 1  ;;  %v3297_v33 = vmax.f32 %v3295_v15, %v3296_v55 }
 0x275   :  { %v3278_v52 = vmax.f32 %v3276_v47, %v3277_v41  ;;  %v1597_v23 = vcombine.high %v1589_v7, %v1589_v7  ;;  %v1598_v37 = vcombine.high %v1596_v56, %v1596_v56  ;;  %v3356_v49 = vsel %vm2263_vm0, %v1589_v7, -inf }
 0x276   :  { %v3285_v59 = vmax.f32 %v3283_v40, %v3284_v35  ;;  %v3292_v17 = vmax.f32 %v3290_v25, %v3291_v51  ;;  %v3298_v22 = vrot.slane %v3297_v33, 1  ;;  %v3357_v19 = vrot.slane %v3356_v49, 4 }
 0x277   :  { %v4128_v1 = vmax.f32 %v3278_v52, %v3334_v32  ;;  %v3363_v11 = vsel %vm2263_vm0, %v1597_v23, -inf  ;;  %v3370_v61 = vsel %vm2263_vm0, %v1596_v56, -inf  ;;  %v3377_v45 = vsel %vm2263_vm0, %v1598_v37, -inf  ;;  %v7940_v37 = vld [vmem:[#allocation2 + $0x51] sm:$0xff] }
 0x278   :  { %v3299_v30 = vmax.f32 %v3297_v33, %v3298_v22  ;;  %v4129_v39 = vmax.f32 %v3285_v59, %v3341_v58  ;;  %v4130_v50 = vmax.f32 %v3292_v17, %v3348_v48  ;;  %v3358_v28 = vmax.f32 %v3356_v49, %v3357_v19  ;;  %v4509_v19 = vld [vmem:[#allocation2 + $0x50] sm:$0xff] }
 0x279   :  { %v3364_v29 = vrot.slane %v3363_v11, 4  ;;  %v3371_v6 = vrot.slane %v3370_v61, 4  ;;  %v3378_v5 = vrot.slane %v3377_v45, 4  ;;  %v1555_v21 = vrot.slane %v7899_v27, %v7131_v0 }
 0x27a   :  { %v4131_v62 = vmax.f32 %v3299_v30, %v3355_v4  ;;  %v4422_v44 = vsel %vm4352_vm1, %v4129_v39, %v4128_v1  ;;  %v3359_v16 = vrot.slane %v3358_v28, 2  ;;  %v1562_v36 = vrot.slane %v1548_v60, %v7131_v0  ;;  %v7943_v1 = vpop.f32.mrb[52].mxu0 }
 0x27b   :  { %v4423_v20 = vsel %vm4354_vm2, %v4130_v50, %v4422_v44  ;;  %v3365_v32 = vmax.f32 %v3363_v11, %v3364_v29  ;;  %v3372_v42 = vmax.f32 %v3370_v61, %v3371_v6  ;;  %v3379_v12 = vmax.f32 %v3377_v45, %v3378_v5  ;;  %v7947_v39 = vpop.f32.mrb[53].mxu0  ;;  %v4508_v5 = vld [vmem:[#allocation2 + $0x40] sm:$0xff] }
 0x27c   :  { %v3360_v57 = vmax.f32 %v3358_v28, %v3359_v16  ;;  %v1563_v18 = vcombine.high %v1555_v21, %v1555_v21  ;;  %v1564_v3 = vcombine.high %v1562_v36, %v1562_v36  ;;  %v3300_v10 = vsel %vm2263_vm0, %v1555_v21, -inf  ;;  %v7951_v21 = vpop.f32.mrb[54].mxu0  ;;  %v7956_v16 = vld [vmem:[%s8967_s2] ss:$0 sm:$0xff] }
 0x27d   :  { %v3366_v15 = vrot.slane %v3365_v32, 2  ;;  %v3373_v58 = vrot.slane %v3372_v42, 2  ;;  %v3380_v48 = vrot.slane %v3379_v12, 2  ;;  %v3301_v27 = vrot.slane %v3300_v10, 4 }
 0x27e   :  { %v3361_v47 = vrot.slane %v3360_v57, 1  ;;  %v3307_v63 = vsel %vm2263_vm0, %v1563_v18, -inf  ;;  %v3314_v2 = vsel %vm2263_vm0, %v1562_v36, -inf  ;;  %v3321_v40 = vsel %vm2263_vm0, %v1564_v3, -inf  ;;  %v7967_v18 = vld [vmem:[%s8968_s3] ss:$0 sm:$0xff] }
 0x27f   :  { %v3367_v25 = vmax.f32 %v3365_v32, %v3366_v15  ;;  %v3374_v55 = vmax.f32 %v3372_v42, %v3373_v58  ;;  %v3381_v41 = vmax.f32 %v3379_v12, %v3380_v48  ;;  %v3302_v7 = vmax.f32 %v3300_v10, %v3301_v27 }
 0x280   :  { %v3362_v56 = vmax.f32 %v3360_v57, %v3361_v47  ;;  %v3308_v60 = vrot.slane %v3307_v63, 4  ;;  %v3315_v4 = vrot.slane %v3314_v2, 4  ;;  %v3322_v35 = vrot.slane %v3321_v40, 4 }
 0x281   :  { %v3368_v51 = vrot.slane %v3367_v25, 1  ;;  %v3375_v33 = vrot.slane %v3374_v55, 1  ;;  %v3382_v52 = vrot.slane %v3381_v41, 1  ;;  %v3303_v23 = vrot.slane %v3302_v7, 2 }
 0x282   :  { %v3309_v49 = vmax.f32 %v3307_v63, %v3308_v60  ;;  %v3316_v59 = vmax.f32 %v3314_v2, %v3315_v4  ;;  %v3323_v17 = vmax.f32 %v3321_v40, %v3322_v35  ;;  %v4424_v22 = vsel %vm4356_vm3, %v4131_v62, %v4423_v20 }
 0x283   :  { %v3369_v11 = vmax.f32 %v3367_v25, %v3368_v51  ;;  %v3376_v61 = vmax.f32 %v3374_v55, %v3375_v33  ;;  %v7945_v45 = vmax.f32 %v3381_v41, %v3382_v52  ;;  %v3304_v30 = vmax.f32 %v3302_v7, %v3303_v23  ;;  %v6814_v41 = vld [vmem:[%s8969_s4 + $0x80] sm:$0xff]  }
 0x284   :  { %v3310_v50 = vrot.slane %v3309_v49, 2  ;;  %v3317_v28 = vrot.slane %v3316_v59, 2  ;;  %v3324_v29 = vrot.slane %v3323_v17, 2  ;;  %v4668_v6 = vpack.c.bf16 %v7940_v37, %v7872_v38 }
 0x285   :  { %v3305_v62 = vrot.slane %v3304_v30, 1  ;;  %v4667_v44 = vpack.c.bf16 %v4509_v19, %v4508_v5  ;;  %v698_v36 = vmul.f32 %v7956_v16, %v7735_v24  ;;  %v696_v20 = vmul.f32 %v7956_v16, %v7742_v43 }
 0x286   :  { %v3311_v32 = vmax.f32 %v3309_v49, %v3310_v50  ;;  %v3318_v42 = vmax.f32 %v3316_v59, %v3317_v28  ;;  %v3325_v12 = vmax.f32 %v3323_v17, %v3324_v29  ;;  %5345 = vmatprep.mubr.bf16.mxu1 %v4668_v6  ;;  %v699_v38 = vmul.f32 %v7956_v16, %v7745_v34 }
 0x287   :  { %v3306_v57 = vmax.f32 %v3304_v30, %v3305_v62  ;;  %5346 = vmatmul.mubr.bf16.gmra.mrb[8].mxu1 %v4667_v44  ;;  %v769_v3 = vadd.f32 %v7967_v18, %v698_v36  ;;  %v767_v24 = vadd.f32 %v7967_v18, %v696_v20  ;;  %v697_v43 = vmul.f32 %v7956_v16, %v7759_v46  ;;  %v6813_v46 = vld [vmem:[%s8969_s4 + $0xc0] sm:$0xff]   ;;  %v7998_v44 = vpop.f32.mrb[55].mxu0 }
 0x288   :  { %v3312_v10 = vrot.slane %v3311_v32, 1  ;;  %v3319_v15 = vrot.slane %v3318_v42, 1  ;;  %v3326_v58 = vrot.slane %v3325_v12, 1  ;;  %v770_v48 = vadd.f32 %v7967_v18, %v699_v38  ;;  %6359 = vmatprep.subr.bf16.mxu1 %v6813_v46 }
 0x289   :  { %v4132_v34 = vmax.f32 %v3306_v57, %v3362_v56  ;;  %v833_v27 = vmax.f32 %v769_v3, 0.0  ;;  %v831_v47 = vmax.f32 %v767_v24, 0.0  ;;  %v7975_v63 = vadd.f32 %v7967_v18, %v697_v43  ;;  %6360 = vmatpush3.bf16.msra.mxu1 %v6814_v41 }
 0x28a   :  { %v3313_v2 = vmax.f32 %v3311_v32, %v3312_v10  ;;  %v3320_v40 = vmax.f32 %v3318_v42, %v3319_v15  ;;  %v3327_v25 = vmax.f32 %v3325_v12, %v3326_v58  ;;  %v7977_v55 = vmax.f32 %v770_v48, 0.0 }
 0x28b   :  { %v4425_v7 = vsel %vm4358_vm4, %v4132_v34, %v4424_v22  ;;  %v1633_v56 = vcombine.high %v833_v27, %v833_v27  ;;  %v1640_v60 = vrot.slane %v833_v27, %v7131_v0  ;;  %v1599_v4 = vcombine.high %v831_v47, %v831_v47 }
 0x28c   :  { %v4133_v35 = vmax.f32 %v3313_v2, %v3369_v11  ;;  %v4134_v51 = vmax.f32 %v3320_v40, %v3376_v61  ;;  %v4135_v33 = vmax.f32 %v3327_v25, %v7945_v45  ;;  %v1606_v52 = vrot.slane %v831_v47, %v7131_v0 }
 0x28d   :  { %v1647_v23 = vrot.slane %v1633_v56, %v7131_v0  ;;  %v1648_v49 = vcombine.high %v1640_v60, %v1640_v60  ;;  %v3440_v59 = vsel %vm2263_vm0, %v1640_v60, -inf  ;;  %v1613_v17 = vrot.slane %v1599_v4, %v7131_v0 }
 0x28e   :  { %v4426_v22 = vsel %vm4360_vm5, %v4133_v35, %v4425_v7  ;;  %v3441_v19 = vrot.slane %v3440_v59, 4  ;;  %v1614_v30 = vcombine.high %v1606_v52, %v1606_v52  ;;  %v3384_v11 = vsel %vm2263_vm0, %v1606_v52, -inf }
 0x28f   :  { %v4427_v61 = vsel %vm4362_vm6, %v4134_v51, %v4426_v22  ;;  %v1649_v45 = vcombine.high %v1647_v23, %v1647_v23  ;;  %v3447_v50 = vsel %vm2263_vm0, %v1648_v49, -inf  ;;  %v3454_v28 = vsel %vm2263_vm0, %v1647_v23, -inf }
 0x290   :  { %v4428_v29 = vsel %vm4364_vm7, %v4135_v33, %v4427_v61  ;;  %v3442_v6 = vmax.f32 %v3440_v59, %v3441_v19  ;;  %v3448_v5 = vrot.slane %v3447_v50, 4  ;;  %v3455_v62 = vrot.slane %v3454_v28, 4 }
 0x291   :  { %4497 = vst [vmem:[#allocation2 + $0xc1] sm:$0xff] %v4428_v29  ;;  %v3461_v36 = vsel %vm2263_vm0, %v1649_v45, -inf  ;;  %v1615_v20 = vcombine.high %v1613_v17, %v1613_v17  ;;  %v3385_v32 = vrot.slane %v3384_v11, 4  ;;  %v3391_v42 = vsel %vm2263_vm0, %v1614_v30, -inf }
 0x292   :  { %v3443_v12 = vrot.slane %v3442_v6, 2  ;;  %v3449_v38 = vmax.f32 %v3447_v50, %v3448_v5  ;;  %v3456_v57 = vmax.f32 %v3454_v28, %v3455_v62  ;;  %v3462_v3 = vrot.slane %v3461_v36, 4 }
 0x293   :  { %v3386_v24 = vmax.f32 %v3384_v11, %v3385_v32  ;;  %v3392_v43 = vrot.slane %v3391_v42, 4  ;;  %v3398_v10 = vsel %vm2263_vm0, %v1613_v17, -inf  ;;  %v3405_v15 = vsel %vm2263_vm0, %v1615_v20, -inf }
 0x294   :  { %v3444_v58 = vmax.f32 %v3442_v6, %v3443_v12  ;;  %v3450_v48 = vrot.slane %v3449_v38, 2  ;;  %v3457_v34 = vrot.slane %v3456_v57, 2  ;;  %v3463_v27 = vmax.f32 %v3461_v36, %v3462_v3 }
 0x295   :  { %v3387_v47 = vrot.slane %v3386_v24, 2  ;;  %v3393_v2 = vmax.f32 %v3391_v42, %v3392_v43  ;;  %v3399_v40 = vrot.slane %v3398_v10, 4  ;;  %v3406_v25 = vrot.slane %v3405_v15, 4 }
 0x296   :  { %v3445_v46 = vrot.slane %v3444_v58, 1  ;;  %v3451_v41 = vmax.f32 %v3449_v38, %v3450_v48  ;;  %v3458_v7 = vmax.f32 %v3456_v57, %v3457_v34  ;;  %v3464_v56 = vrot.slane %v3463_v27, 2 }
 0x297   :  { %v3388_v60 = vmax.f32 %v3386_v24, %v3387_v47  ;;  %v3394_v4 = vrot.slane %v3393_v2, 2  ;;  %v3400_v35 = vmax.f32 %v3398_v10, %v3399_v40  ;;  %v3407_v51 = vmax.f32 %v3405_v15, %v3406_v25  ;;  %v4589_v47 = vld [vmem:[#allocation2 + $0x62] sm:$0xff] }
 0x298   :  { %v3446_v33 = vmax.f32 %v3444_v58, %v3445_v46  ;;  %v3452_v52 = vrot.slane %v3451_v41, 1  ;;  %v3459_v23 = vrot.slane %v3458_v7, 1  ;;  %v3465_v49 = vmax.f32 %v3463_v27, %v3464_v56 }
 0x299   :  { %v3389_v59 = vrot.slane %v3388_v60, 1  ;;  %v3395_v17 = vmax.f32 %v3393_v2, %v3394_v4  ;;  %v3401_v22 = vrot.slane %v3400_v35, 2  ;;  %v3408_v19 = vrot.slane %v3407_v51, 2  ;;  %v4588_v4 = vld [vmem:[#allocation2 + $0x52] sm:$0xff] }
 0x29a   :  { %v3453_v30 = vmax.f32 %v3451_v41, %v3452_v52  ;;  %v3460_v11 = vmax.f32 %v3458_v7, %v3459_v23  ;;  %v3466_v61 = vrot.slane %v3465_v49, 1  ;;  %v1650_v45 = vcombine.high %v7977_v55, %v7977_v55 }
 0x29b   :  { %v3390_v50 = vmax.f32 %v3388_v60, %v3389_v59  ;;  %v3396_v28 = vrot.slane %v3395_v17, 1  ;;  %v3402_v29 = vmax.f32 %v3400_v35, %v3401_v22  ;;  %v3409_v6 = vmax.f32 %v3407_v51, %v3408_v19 }
 0x29c   :  { %v8006_v5 = vmax.f32 %v3465_v49, %v3466_v61  ;;  %v1657_v62 = vrot.slane %v7977_v55, %v7131_v0  ;;  %v1664_v36 = vrot.slane %v1650_v45, %v7131_v0  ;;  %v832_v20 = vmax.f32 %v7975_v63, 0.0 }
 0x29d   :  { %v3397_v32 = vmax.f32 %v3395_v17, %v3396_v28  ;;  %v3403_v42 = vrot.slane %v3402_v29, 1  ;;  %v3410_v12 = vrot.slane %v3409_v6, 1  ;;  %v4136_v38 = vmax.f32 %v3390_v50, %v3446_v33 }
 0x29e   :  { %v1665_v57 = vcombine.high %v1657_v62, %v1657_v62  ;;  %v1666_v3 = vcombine.high %v1664_v36, %v1664_v36  ;;  %v3468_v24 = vsel %vm2263_vm0, %v1657_v62, -inf  ;;  %v3482_v43 = vsel %vm2263_vm0, %v1664_v36, -inf }
 0x29f   :  { %v3404_v10 = vmax.f32 %v3402_v29, %v3403_v42  ;;  %v3411_v15 = vmax.f32 %v3409_v6, %v3410_v12  ;;  %v4137_v58 = vmax.f32 %v3397_v32, %v3453_v30  ;;  %v3469_v48 = vrot.slane %v3468_v24, 4 }
 0x2a0   :  { %v3475_v55 = vsel %vm2263_vm0, %v1665_v57, -inf  ;;  %v3483_v34 = vrot.slane %v3482_v43, 4  ;;  %v3489_v27 = vsel %vm2263_vm0, %v1666_v3, -inf  ;;  %v1616_v63 = vcombine.high %v832_v20, %v832_v20 }
 0x2a1   :  { %v4138_v2 = vmax.f32 %v3404_v10, %v3460_v11  ;;  %v4139_v40 = vmax.f32 %v3411_v15, %v8006_v5  ;;  %v4429_v25 = vsel %vm4352_vm1, %v4137_v58, %v4136_v38  ;;  %v3470_v46 = vmax.f32 %v3468_v24, %v3469_v48  ;;  %v8025_v24 = vld [vmem:[#allocation2 + $0x61] sm:$0xff] }
 0x2a2   :  { %v3476_v41 = vrot.slane %v3475_v55, 4  ;;  %v3484_v7 = vmax.f32 %v3482_v43, %v3483_v34  ;;  %v3490_v56 = vrot.slane %v3489_v27, 4  ;;  %v1623_v60 = vrot.slane %v832_v20, %v7131_v0 }
 0x2a3   :  { %v4430_v35 = vsel %vm4354_vm2, %v4138_v2, %v4429_v25  ;;  %v3471_v51 = vrot.slane %v3470_v46, 2  ;;  %v1630_v33 = vrot.slane %v1616_v63, %v7131_v0  ;;  %v4672_v52 = vpack.c.bf16 %v4589_v47, %v4588_v4  ;;  %v8030_v63 = vpop.f32.mrb[56].mxu0 }
 0x2a4   :  { %v3477_v23 = vmax.f32 %v3475_v55, %v3476_v41  ;;  %v3485_v49 = vrot.slane %v3484_v7, 2  ;;  %v3491_v59 = vmax.f32 %v3489_v27, %v3490_v56  ;;  %v1631_v17 = vcombine.high %v1623_v60, %v1623_v60  ;;  %v8034_v41 = vpop.f32.mrb[57].mxu0 }
 0x2a5   :  { %v3472_v22 = vmax.f32 %v3470_v46, %v3471_v51  ;;  %v1632_v19 = vcombine.high %v1630_v33, %v1630_v33  ;;  %v3412_v30 = vsel %vm2263_vm0, %v1623_v60, -inf  ;;  %v3426_v11 = vsel %vm2263_vm0, %v1630_v33, -inf  ;;  %5539 = vmatprep.mubr.bf16.mxu0 %v4672_v52  ;;  %v8038_v51 = vpop.f32.mrb[58].mxu0 }
 0x2a6   :  { %v3478_v61 = vrot.slane %v3477_v23, 2  ;;  %v3486_v45 = vmax.f32 %v3484_v7, %v3485_v49  ;;  %v3492_v50 = vrot.slane %v3491_v59, 2  ;;  %v3413_v28 = vrot.slane %v3412_v30, 4 }
 0x2a7   :  { %v3473_v29 = vrot.slane %v3472_v22, 1  ;;  %v3419_v6 = vsel %vm2263_vm0, %v1631_v17, -inf  ;;  %v3427_v5 = vrot.slane %v3426_v11, 4  ;;  %v3433_v62 = vsel %vm2263_vm0, %v1632_v19, -inf }
 0x2a8   :  { %v3479_v36 = vmax.f32 %v3477_v23, %v3478_v61  ;;  %v3487_v20 = vrot.slane %v3486_v45, 1  ;;  %v3493_v32 = vmax.f32 %v3491_v59, %v3492_v50  ;;  %v3414_v42 = vmax.f32 %v3412_v30, %v3413_v28  ;;  %v6815_v28 = vld [vmem:[%s8969_s4 + $0xc8] sm:$0xff]  }
 0x2a9   :  { %v3474_v12 = vmax.f32 %v3472_v22, %v3473_v29  ;;  %v3420_v38 = vrot.slane %v3419_v6, 4  ;;  %v3428_v57 = vmax.f32 %v3426_v11, %v3427_v5  ;;  %v3434_v3 = vrot.slane %v3433_v62, 4  ;;  %v6816_v29 = vld [vmem:[%s8969_s4 + $0x88] sm:$0xff]   ;;  %6361 = vmatprep.subr.bf16.mxu1 %v6815_v28 }
 0x2aa   :  { %v3480_v43 = vrot.slane %v3479_v36, 1  ;;  %v8027_v10 = vmax.f32 %v3486_v45, %v3487_v20  ;;  %v3494_v15 = vrot.slane %v3493_v32, 1  ;;  %v3415_v58 = vrot.slane %v3414_v42, 2  ;;  %6362 = vmatpush3.bf16.msra.mxu1 %v6816_v29 }
 0x2ab   :  { %v3421_v48 = vmax.f32 %v3419_v6, %v3420_v38  ;;  %v3429_v55 = vrot.slane %v3428_v57, 2  ;;  %v3435_v34 = vmax.f32 %v3433_v62, %v3434_v3  ;;  %v4431_v27 = vsel %vm4356_vm3, %v4139_v40, %v4430_v35 }
 0x2ac   :  { %v3481_v47 = vmax.f32 %v3479_v36, %v3480_v43  ;;  %v3495_v2 = vmax.f32 %v3493_v32, %v3494_v15  ;;  %v3416_v25 = vmax.f32 %v3414_v42, %v3415_v58  ;;  %v4671_v46 = vpack.c.bf16 %v8025_v24, %v7940_v37 }
 0x2ad   :  { %v3422_v7 = vrot.slane %v3421_v48, 2  ;;  %v3430_v56 = vmax.f32 %v3428_v57, %v3429_v55  ;;  %v3436_v60 = vrot.slane %v3435_v34, 2  ;;  %v702_v4 = vmul.f32 %v7956_v16, %v7808_v31 }
 0x2ae   :  { %v3417_v33 = vrot.slane %v3416_v25, 1  ;;  %5540 = vmatmul.mubr.bf16.gmra.mrb[72].mxu0 %v4671_v46  ;;  %v700_v40 = vmul.f32 %v7956_v16, %v7814_v9  ;;  %v703_v35 = vmul.f32 %v7956_v16, %v7819_v26  ;;  %v701_v37 = vmul.f32 %v7956_v16, %v7841_v14 }
 0x2af   :  { %v3423_v52 = vmax.f32 %v3421_v48, %v3422_v7  ;;  %v3431_v23 = vrot.slane %v3430_v56, 1  ;;  %v3437_v49 = vmax.f32 %v3435_v34, %v3436_v60  ;;  %v773_v59 = vadd.f32 %v7967_v18, %v702_v4 }
 0x2b0   :  { %v3418_v17 = vmax.f32 %v3416_v25, %v3417_v33  ;;  %v771_v31 = vadd.f32 %v7967_v18, %v700_v40  ;;  %v774_v22 = vadd.f32 %v7967_v18, %v703_v35  ;;  %v772_v19 = vadd.f32 %v7967_v18, %v701_v37 }
 0x2b1   :  { %v3424_v30 = vrot.slane %v3423_v52, 1  ;;  %v3432_v9 = vmax.f32 %v3430_v56, %v3431_v23  ;;  %v3438_v11 = vrot.slane %v3437_v49, 1  ;;  %v837_v61 = vmax.f32 %v773_v59, 0.0  ;;  %v8073_v56 = vpop.f32.mrb[59].mxu0 }
 0x2b2   :  { %v4140_v26 = vmax.f32 %v3418_v17, %v3474_v12  ;;  %v835_v45 = vmax.f32 %v771_v31, 0.0  ;;  %v8050_v50 = vmax.f32 %v774_v22, 0.0  ;;  %v8052_v14 = vmax.f32 %v772_v19, 0.0 }
 0x2b3   :  { %v3425_v6 = vmax.f32 %v3423_v52, %v3424_v30  ;;  %v3439_v5 = vmax.f32 %v3437_v49, %v3438_v11  ;;  %v4142_v62 = vmax.f32 %v3432_v9, %v8027_v10  ;;  %v1701_v36 = vcombine.high %v837_v61, %v837_v61 }
 0x2b4   :  { %v4432_v20 = vsel %vm4358_vm4, %v4140_v26, %v4431_v27  ;;  %v1708_v32 = vrot.slane %v837_v61, %v7131_v0  ;;  %v1667_v42 = vcombine.high %v835_v45, %v835_v45  ;;  %v1674_v12 = vrot.slane %v835_v45, %v7131_v0 }
 0x2b5   :  { %v4141_v38 = vmax.f32 %v3425_v6, %v3481_v47  ;;  %v4143_v57 = vmax.f32 %v3439_v5, %v3495_v2  ;;  %v1715_v3 = vrot.slane %v1701_v36, %v7131_v0  ;;  %v1718_v43 = vcombine.high %v8050_v50, %v8050_v50 }
 0x2b6   :  { %v1716_v15 = vcombine.high %v1708_v32, %v1708_v32  ;;  %v3552_v10 = vsel %vm2263_vm0, %v1708_v32, -inf  ;;  %v1681_v58 = vrot.slane %v1667_v42, %v7131_v0  ;;  %v1682_v48 = vcombine.high %v1674_v12, %v1674_v12 }
 0x2b7   :  { %v4433_v55 = vsel %vm4360_vm5, %v4141_v38, %v4432_v20  ;;  %v1717_v34 = vcombine.high %v1715_v3, %v1715_v3  ;;  %v3553_v27 = vrot.slane %v3552_v10, 4  ;;  %v3566_v25 = vsel %vm2263_vm0, %v1715_v3, -inf }
 0x2b8   :  { %v4434_v47 = vsel %vm4362_vm6, %v4142_v62, %v4433_v55  ;;  %v3559_v2 = vsel %vm2263_vm0, %v1716_v15, -inf  ;;  %v3567_v46 = vrot.slane %v3566_v25, 4  ;;  %v1683_v7 = vcombine.high %v1681_v58, %v1681_v58 }
 0x2b9   :  { %v4435_v60 = vsel %vm4364_vm7, %v4143_v57, %v4434_v47  ;;  %v3554_v4 = vmax.f32 %v3552_v10, %v3553_v27  ;;  %v3560_v33 = vrot.slane %v3559_v2, 4  ;;  %v3573_v40 = vsel %vm2263_vm0, %v1717_v34, -inf }
 0x2ba   :  { %4498 = vst [vmem:[#allocation2 + $0xd1] sm:$0xff] %v4435_v60  ;;  %v3568_v35 = vmax.f32 %v3566_v25, %v3567_v46  ;;  %v3574_v37 = vrot.slane %v3573_v40, 4  ;;  %v3496_v52 = vsel %vm2263_vm0, %v1674_v12, -inf  ;;  %v3503_v23 = vsel %vm2263_vm0, %v1682_v48, -inf }
 0x2bb   :  { %v3555_v49 = vrot.slane %v3554_v4, 2  ;;  %v3561_v59 = vmax.f32 %v3559_v2, %v3560_v33  ;;  %v3497_v17 = vrot.slane %v3496_v52, 4  ;;  %v3504_v31 = vrot.slane %v3503_v23, 4 }
 0x2bc   :  { %v3569_v22 = vrot.slane %v3568_v35, 2  ;;  %v3575_v19 = vmax.f32 %v3573_v40, %v3574_v37  ;;  %v3510_v30 = vsel %vm2263_vm0, %v1681_v58, -inf  ;;  %v3517_v9 = vsel %vm2263_vm0, %v1683_v7, -inf }
 0x2bd   :  { %v3556_v11 = vmax.f32 %v3554_v4, %v3555_v49  ;;  %v3562_v61 = vrot.slane %v3561_v59, 2  ;;  %v3498_v26 = vmax.f32 %v3496_v52, %v3497_v17  ;;  %v3505_v45 = vmax.f32 %v3503_v23, %v3504_v31 }
 0x2be   :  { %v3570_v28 = vmax.f32 %v3568_v35, %v3569_v22  ;;  %v3576_v29 = vrot.slane %v3575_v19, 2  ;;  %v3511_v6 = vrot.slane %v3510_v30, 4  ;;  %v3518_v5 = vrot.slane %v3517_v9, 4 }
 0x2bf   :  { %v3557_v62 = vrot.slane %v3556_v11, 1  ;;  %v3563_v36 = vmax.f32 %v3561_v59, %v3562_v61  ;;  %v3499_v20 = vrot.slane %v3498_v26, 2  ;;  %v3506_v32 = vrot.slane %v3505_v45, 2 }
 0x2c0   :  { %v3571_v42 = vrot.slane %v3570_v28, 1  ;;  %v3577_v12 = vmax.f32 %v3575_v19, %v3576_v29  ;;  %v3512_v38 = vmax.f32 %v3510_v30, %v3511_v6  ;;  %v3519_v57 = vmax.f32 %v3517_v9, %v3518_v5  ;;  %v8096_v29 = vld [vmem:[#allocation2 + $0x71] sm:$0xff] }
 0x2c1   :  { %v3558_v3 = vmax.f32 %v3556_v11, %v3557_v62  ;;  %v3564_v15 = vrot.slane %v3563_v36, 1  ;;  %v3500_v10 = vmax.f32 %v3498_v26, %v3499_v20  ;;  %v3507_v58 = vmax.f32 %v3505_v45, %v3506_v32 }
 0x2c2   :  { %v3572_v48 = vmax.f32 %v3570_v28, %v3571_v42  ;;  %v3578_v55 = vrot.slane %v3577_v12, 1  ;;  %v3513_v34 = vrot.slane %v3512_v38, 2  ;;  %v3520_v27 = vrot.slane %v3519_v57, 2 }
 0x2c3   :  { %v3565_v25 = vmax.f32 %v3563_v36, %v3564_v15  ;;  %v3501_v47 = vrot.slane %v3500_v10, 1  ;;  %v3508_v2 = vrot.slane %v3507_v58, 1  ;;  %v1725_v46 = vrot.slane %v8050_v50, %v7131_v0 }
 0x2c4   :  { %v8083_v7 = vmax.f32 %v3577_v12, %v3578_v55  ;;  %v3514_v60 = vmax.f32 %v3512_v38, %v3513_v34  ;;  %v3521_v4 = vmax.f32 %v3519_v57, %v3520_v27  ;;  %v1732_v33 = vrot.slane %v1718_v43, %v7131_v0 }
 0x2c5   :  { %v3502_v40 = vmax.f32 %v3500_v10, %v3501_v47  ;;  %v3509_v35 = vmax.f32 %v3507_v58, %v3508_v2  ;;  %v1733_v37 = vcombine.high %v1725_v46, %v1725_v46  ;;  %v3580_v52 = vsel %vm2263_vm0, %v1725_v46, -inf }
 0x2c6   :  { %v3515_v23 = vrot.slane %v3514_v60, 1  ;;  %v3522_v49 = vrot.slane %v3521_v4, 1  ;;  %v1734_v59 = vcombine.high %v1732_v33, %v1732_v33  ;;  %v3581_v17 = vrot.slane %v3580_v52, 4 }
 0x2c7   :  { %v4144_v31 = vmax.f32 %v3502_v40, %v3558_v3  ;;  %v4145_v22 = vmax.f32 %v3509_v35, %v3565_v25  ;;  %v3587_v19 = vsel %vm2263_vm0, %v1733_v37, -inf  ;;  %v3594_v30 = vsel %vm2263_vm0, %v1732_v33, -inf }
 0x2c8   :  { %v3516_v9 = vmax.f32 %v3514_v60, %v3515_v23  ;;  %v3523_v11 = vmax.f32 %v3521_v4, %v3522_v49  ;;  %v3582_v61 = vmax.f32 %v3580_v52, %v3581_v17  ;;  %v3588_v50 = vrot.slane %v3587_v19, 4  ;;  %v4511_v23 = vld [vmem:[#allocation2 + $0x70] sm:$0xff] }
 0x2c9   :  { %v4436_v43 = vsel %vm4352_vm1, %v4145_v22, %v4144_v31  ;;  %v3595_v26 = vrot.slane %v3594_v30, 4  ;;  %v3601_v45 = vsel %vm2263_vm0, %v1734_v59, -inf  ;;  %v1684_v28 = vcombine.high %v8052_v14, %v8052_v14 }
 0x2ca   :  { %v4146_v6 = vmax.f32 %v3516_v9, %v3572_v48  ;;  %v4147_v5 = vmax.f32 %v3523_v11, %v8083_v7  ;;  %v3583_v62 = vrot.slane %v3582_v61, 2  ;;  %v3589_v36 = vmax.f32 %v3587_v19, %v3588_v50  ;;  %v4510_v11 = vld [vmem:[#allocation2 + $0x60] sm:$0xff] }
 0x2cb   :  { %v3596_v20 = vmax.f32 %v3594_v30, %v3595_v26  ;;  %v3602_v32 = vrot.slane %v3601_v45, 4  ;;  %v1691_v42 = vrot.slane %v8052_v14, %v7131_v0  ;;  %v1698_v12 = vrot.slane %v1684_v28, %v7131_v0 }
 0x2cc   :  { %v4437_v38 = vsel %vm4354_vm2, %v4146_v6, %v4436_v43  ;;  %v3584_v57 = vmax.f32 %v3582_v61, %v3583_v62  ;;  %v3590_v3 = vrot.slane %v3589_v36, 2  ;;  %v4677_v15 = vpack.c.bf16 %v8096_v29, %v8025_v24  ;;  %v8112_v61 = vpop.f32.mrb[60].mxu0 }
 0x2cd   :  { %v3597_v10 = vrot.slane %v3596_v20, 2  ;;  %v3603_v58 = vmax.f32 %v3601_v45, %v3602_v32  ;;  %v1699_v48 = vcombine.high %v1691_v42, %v1691_v42  ;;  %v1700_v55 = vcombine.high %v1698_v12, %v1698_v12  ;;  %v8114_v28 = vpop.f32.mrb[61].mxu0 }
 0x2ce   :  { %v3585_v34 = vrot.slane %v3584_v57, 1  ;;  %v3591_v27 = vmax.f32 %v3589_v36, %v3590_v3  ;;  %v3524_v25 = vsel %vm2263_vm0, %v1691_v42, -inf  ;;  %v3538_v47 = vsel %vm2263_vm0, %v1698_v12, -inf  ;;  %5353 = vmatprep.mubr.bf16.mxu1 %v4677_v15 }
 0x2cf   :  { %v3598_v14 = vmax.f32 %v3596_v20, %v3597_v10  ;;  %v3604_v2 = vrot.slane %v3603_v58, 2  ;;  %v3525_v46 = vrot.slane %v3524_v25, 4  ;;  %v3531_v7 = vsel %vm2263_vm0, %v1699_v48, -inf }
 0x2d0   :  { %v8108_v60 = vmax.f32 %v3584_v57, %v3585_v34  ;;  %v3592_v4 = vrot.slane %v3591_v27, 1  ;;  %v3532_v24 = vrot.slane %v3531_v7, 4  ;;  %v3539_v33 = vrot.slane %v3538_v47, 4 }
 0x2d1   :  { %v3599_v40 = vrot.slane %v3598_v14, 1  ;;  %v3605_v35 = vmax.f32 %v3603_v58, %v3604_v2  ;;  %v3526_v37 = vmax.f32 %v3524_v25, %v3525_v46  ;;  %v3545_v52 = vsel %vm2263_vm0, %v1700_v55, -inf }
 0x2d2   :  { %v3593_v49 = vmax.f32 %v3591_v27, %v3592_v4  ;;  %v3533_v59 = vmax.f32 %v3531_v7, %v3532_v24  ;;  %v3540_v17 = vmax.f32 %v3538_v47, %v3539_v33  ;;  %v3546_v31 = vrot.slane %v3545_v52, 4  ;;  %v6818_v24 = vld [vmem:[%s8969_s4 + $0x90] sm:$0xff]  }
 0x2d3   :  { %v3600_v22 = vmax.f32 %v3598_v14, %v3599_v40  ;;  %v3606_v19 = vrot.slane %v3605_v35, 1  ;;  %v3527_v30 = vrot.slane %v3526_v37, 2  ;;  %v4438_v9 = vsel %vm4356_vm3, %v4147_v5, %v4437_v38  ;;  %v6817_v5 = vld [vmem:[%s8969_s4 + $0xd0] sm:$0xff]  }
 0x2d4   :  { %v3534_v50 = vrot.slane %v3533_v59, 2  ;;  %v3541_v43 = vrot.slane %v3540_v17, 2  ;;  %v3547_v26 = vmax.f32 %v3545_v52, %v3546_v31  ;;  %v4676_v45 = vpack.c.bf16 %v4511_v23, %v4510_v11  ;;  %6363 = vmatprep.subr.bf16.mxu1 %v6817_v5 }
 0x2d5   :  { %v3607_v6 = vmax.f32 %v3605_v35, %v3606_v19  ;;  %v3528_v62 = vmax.f32 %v3526_v37, %v3527_v30  ;;  %v706_v36 = vmul.f32 %v7956_v16, %v7877_v54  ;;  %v704_v20 = vmul.f32 %v7956_v16, %v7881_v8  ;;  %v8129_v8 = vpop.f32.mrb[62].mxu0  ;;  %6364 = vmatpush3.bf16.msra.mxu1 %v6818_v24 }
 0x2d6   :  { %v3535_v32 = vmax.f32 %v3533_v59, %v3534_v50  ;;  %v3542_v42 = vmax.f32 %v3540_v17, %v3541_v43  ;;  %v3548_v12 = vrot.slane %v3547_v26, 2  ;;  %5354 = vmatmul.mubr.bf16.gmra.mrb[12].mxu1 %v4676_v45  ;;  %v707_v38 = vmul.f32 %v7956_v16, %v7889_v13  ;;  %v8148_v30 = vpop.f32.mrb[63].mxu0 }
 0x2d7   :  { %v3529_v57 = vrot.slane %v3528_v62, 1  ;;  %v777_v3 = vadd.f32 %v7967_v18, %v706_v36  ;;  %v775_v15 = vadd.f32 %v7967_v18, %v704_v20  ;;  %v705_v54 = vmul.f32 %v7956_v16, %v7911_v53 }
 0x2d8   :  { %v3536_v10 = vrot.slane %v3535_v32, 1  ;;  %v3543_v58 = vrot.slane %v3542_v42, 1  ;;  %v3549_v48 = vmax.f32 %v3547_v26, %v3548_v12  ;;  %v778_v55 = vadd.f32 %v7967_v18, %v707_v38 }
 0x2d9   :  { %v3530_v34 = vmax.f32 %v3528_v62, %v3529_v57  ;;  %v841_v27 = vmax.f32 %v777_v3, 0.0  ;;  %v839_v25 = vmax.f32 %v775_v15, 0.0  ;;  %v8133_v13 = vadd.f32 %v7967_v18, %v705_v54 }
 0x2da   :  { %v3537_v47 = vmax.f32 %v3535_v32, %v3536_v10  ;;  %v3544_v14 = vmax.f32 %v3542_v42, %v3543_v58  ;;  %v3550_v2 = vrot.slane %v3549_v48, 1  ;;  %v8135_v46 = vmax.f32 %v778_v55, 0.0 }
 0x2db   :  { %v4148_v53 = vmax.f32 %v3530_v34, %v8108_v60  ;;  %v1769_v16 = vcombine.high %v841_v27, %v841_v27  ;;  %v1776_v7 = vrot.slane %v841_v27, %v7131_v0  ;;  %v1735_v4 = vcombine.high %v839_v25, %v839_v25 }
 0x2dc   :  { %v3551_v33 = vmax.f32 %v3549_v48, %v3550_v2  ;;  %v4149_v40 = vmax.f32 %v3537_v47, %v3593_v49  ;;  %v4150_v35 = vmax.f32 %v3544_v14, %v3600_v22  ;;  %v1742_v18 = vrot.slane %v839_v25, %v7131_v0 }
 0x2dd   :  { %v4439_v37 = vsel %vm4358_vm4, %v4148_v53, %v4438_v9  ;;  %v1783_v52 = vrot.slane %v1769_v16, %v7131_v0  ;;  %v1784_v23 = vcombine.high %v1776_v7, %v1776_v7  ;;  %v3664_v60 = vsel %vm2263_vm0, %v1776_v7, -inf }
 0x2de   :  { %v4151_v59 = vmax.f32 %v3551_v33, %v3607_v6  ;;  %v4440_v17 = vsel %vm4360_vm5, %v4149_v40, %v4439_v37  ;;  %v3665_v31 = vrot.slane %v3664_v60, 4  ;;  %v1749_v19 = vrot.slane %v1735_v4, %v7131_v0 }
 0x2df   :  { %v4441_v49 = vsel %vm4362_vm6, %v4150_v35, %v4440_v17  ;;  %v1785_v22 = vcombine.high %v1783_v52, %v1783_v52  ;;  %v3671_v11 = vsel %vm2263_vm0, %v1784_v23, -inf  ;;  %v3678_v9 = vsel %vm2263_vm0, %v1783_v52, -inf }
 0x2e0   :  { %v4442_v50 = vsel %vm4364_vm7, %v4151_v59, %v4441_v49  ;;  %v3666_v43 = vmax.f32 %v3664_v60, %v3665_v31  ;;  %v3672_v26 = vrot.slane %v3671_v11, 4  ;;  %v3679_v45 = vrot.slane %v3678_v9, 4 }
 0x2e1   :  { %4499 = vst [vmem:[#allocation2 + $0xe1] sm:$0xff] %v4442_v50  ;;  %v3685_v6 = vsel %vm2263_vm0, %v1785_v22, -inf  ;;  %v1750_v62 = vcombine.high %v1742_v18, %v1742_v18  ;;  %v1751_v36 = vcombine.high %v1749_v19, %v1749_v19  ;;  %v3608_v20 = vsel %vm2263_vm0, %v1742_v18, -inf }
 0x2e2   :  { %v3667_v5 = vrot.slane %v3666_v43, 2  ;;  %v3673_v32 = vmax.f32 %v3671_v11, %v3672_v26  ;;  %v3680_v42 = vmax.f32 %v3678_v9, %v3679_v45  ;;  %v3686_v12 = vrot.slane %v3685_v6, 4 }
 0x2e3   :  { %v3609_v38 = vrot.slane %v3608_v20, 4  ;;  %v3615_v57 = vsel %vm2263_vm0, %v1750_v62, -inf  ;;  %v3622_v3 = vsel %vm2263_vm0, %v1749_v19, -inf  ;;  %v3629_v15 = vsel %vm2263_vm0, %v1751_v36, -inf }
 0x2e4   :  { %v3668_v54 = vmax.f32 %v3666_v43, %v3667_v5  ;;  %v3674_v10 = vrot.slane %v3673_v32, 2  ;;  %v3681_v58 = vrot.slane %v3680_v42, 2  ;;  %v3687_v48 = vmax.f32 %v3685_v6, %v3686_v12 }
 0x2e5   :  { %v3610_v55 = vmax.f32 %v3608_v20, %v3609_v38  ;;  %v3616_v34 = vrot.slane %v3615_v57, 4  ;;  %v3623_v27 = vrot.slane %v3622_v3, 4  ;;  %v3630_v25 = vrot.slane %v3629_v15, 4 }
 0x2e6   :  { %v3669_v47 = vrot.slane %v3668_v54, 1  ;;  %v3675_v14 = vmax.f32 %v3673_v32, %v3674_v10  ;;  %v3682_v2 = vmax.f32 %v3680_v42, %v3681_v58  ;;  %v3688_v53 = vrot.slane %v3687_v48, 2 }
 0x2e7   :  { %v3611_v16 = vrot.slane %v3610_v55, 2  ;;  %v3617_v7 = vmax.f32 %v3615_v57, %v3616_v34  ;;  %v3624_v4 = vmax.f32 %v3622_v3, %v3623_v27  ;;  %v3631_v24 = vmax.f32 %v3629_v15, %v3630_v25 }
 0x2e8   :  { %v3670_v33 = vmax.f32 %v3668_v54, %v3669_v47  ;;  %v3676_v40 = vrot.slane %v3675_v14, 1  ;;  %v3683_v35 = vrot.slane %v3682_v2, 1  ;;  %v3689_v18 = vmax.f32 %v3687_v48, %v3688_v53  ;;  %v4591_v48 = vld [vmem:[#allocation2 + $0x82] sm:$0xff] }
 0x2e9   :  { %v3612_v37 = vmax.f32 %v3610_v55, %v3611_v16  ;;  %v3618_v52 = vrot.slane %v3617_v7, 2  ;;  %v3625_v23 = vrot.slane %v3624_v4, 2  ;;  %v3632_v60 = vrot.slane %v3631_v24, 2  ;;  %v4590_v16 = vld [vmem:[#allocation2 + $0x72] sm:$0xff] }
 0x2ea   :  { %v3677_v59 = vmax.f32 %v3675_v14, %v3676_v40  ;;  %v3684_v17 = vmax.f32 %v3682_v2, %v3683_v35  ;;  %v3690_v31 = vrot.slane %v3689_v18, 1  ;;  %v1786_v19 = vcombine.high %v8135_v46, %v8135_v46 }
 0x2eb   :  { %v3613_v49 = vrot.slane %v3612_v37, 1  ;;  %v3619_v22 = vmax.f32 %v3617_v7, %v3618_v52  ;;  %v3626_v11 = vmax.f32 %v3624_v4, %v3625_v23  ;;  %v3633_v9 = vmax.f32 %v3631_v24, %v3632_v60 }
 0x2ec   :  { %v8161_v50 = vmax.f32 %v3689_v18, %v3690_v31  ;;  %v1793_v43 = vrot.slane %v8135_v46, %v7131_v0  ;;  %v1800_v26 = vrot.slane %v1786_v19, %v7131_v0  ;;  %v840_v45 = vmax.f32 %v8133_v13, 0.0  ;;  %v6819_v46 = vld [vmem:[%s8969_s4 + $0xd8] sm:$0xff]  }
 0x2ed   :  { %v3614_v6 = vmax.f32 %v3612_v37, %v3613_v49  ;;  %v3620_v62 = vrot.slane %v3619_v22, 1  ;;  %v3627_v36 = vrot.slane %v3626_v11, 1  ;;  %v3634_v20 = vrot.slane %v3633_v9, 1  ;;  %6365 = vmatprep.subr.bf16.mxu1 %v6819_v46 }
 0x2ee   :  { %v1801_v5 = vcombine.high %v1793_v43, %v1793_v43  ;;  %v1802_v32 = vcombine.high %v1800_v26, %v1800_v26  ;;  %v3692_v42 = vsel %vm2263_vm0, %v1793_v43, -inf  ;;  %v3706_v12 = vsel %vm2263_vm0, %v1800_v26, -inf }
 0x2ef   :  { %v3621_v38 = vmax.f32 %v3619_v22, %v3620_v62  ;;  %v3628_v57 = vmax.f32 %v3626_v11, %v3627_v36  ;;  %v3635_v3 = vmax.f32 %v3633_v9, %v3634_v20  ;;  %v4152_v15 = vmax.f32 %v3614_v6, %v3670_v33 }
 0x2f0   :  { %v3693_v54 = vrot.slane %v3692_v42, 4  ;;  %v3699_v13 = vsel %vm2263_vm0, %v1801_v5, -inf  ;;  %v3707_v10 = vrot.slane %v3706_v12, 4  ;;  %v3713_v58 = vsel %vm2263_vm0, %v1802_v32, -inf  ;;  %v4575_v32 = vld [vmem:[#allocation2 + $0x81] sm:$0xff] }
 0x2f1   :  { %v4153_v55 = vmax.f32 %v3621_v38, %v3677_v59  ;;  %v4154_v34 = vmax.f32 %v3628_v57, %v3684_v17  ;;  %v4155_v27 = vmax.f32 %v3635_v3, %v8161_v50  ;;  %v3700_v25 = vrot.slane %v3699_v13, 4 }
 0x2f2   :  { %v3694_v47 = vmax.f32 %v3692_v42, %v3693_v54  ;;  %v3708_v14 = vmax.f32 %v3706_v12, %v3707_v10  ;;  %v3714_v2 = vrot.slane %v3713_v58, 4  ;;  %v1752_v53 = vcombine.high %v840_v45, %v840_v45 }
 0x2f3   :  { %v4443_v7 = vsel %vm4352_vm1, %v4153_v55, %v4152_v15  ;;  %v3701_v4 = vmax.f32 %v3699_v13, %v3700_v25  ;;  %v1759_v24 = vrot.slane %v840_v45, %v7131_v0  ;;  %v4681_v33 = vpack.c.bf16 %v4591_v48, %v4590_v16  ;;  %v6825_v16 = vld [vmem:[%s8969_s4 + $0x200] sm:$0xff]  }
 0x2f4   :  { %v4444_v40 = vsel %vm4354_vm2, %v4154_v34, %v4443_v7  ;;  %v3695_v35 = vrot.slane %v3694_v47, 2  ;;  %v3709_v18 = vrot.slane %v3708_v14, 2  ;;  %v3715_v37 = vmax.f32 %v3713_v58, %v3714_v2  ;;  %6665 = vmatprep.subr.bf16.mxu0 %v6825_v16 }
 0x2f5   :  { %v3702_v52 = vrot.slane %v3701_v4, 2  ;;  %v1766_v23 = vrot.slane %v1752_v53, %v7131_v0  ;;  %v1767_v60 = vcombine.high %v1759_v24, %v1759_v24  ;;  %v3636_v59 = vsel %vm2263_vm0, %v1759_v24, -inf  ;;  %5547 = vmatprep.mubr.bf16.mxu0 %v4681_v33  ;;  %6666 = vmatpush3.bf16.msra.mxu0 %v6825_v16  ;;  %v6827_v16 = vld [vmem:[%s8969_s4 + $0xf0] sm:$0xff]  }
 0x2f6   :  { %v3696_v17 = vmax.f32 %v3694_v47, %v3695_v35  ;;  %v3710_v31 = vmax.f32 %v3708_v14, %v3709_v18  ;;  %v3716_v19 = vrot.slane %v3715_v37, 2  ;;  %v3637_v49 = vrot.slane %v3636_v59, 4  ;;  %v8194_v47 = vld [vmem:[%s8967_s2] ss:$0 sm:$0xff] }
 0x2f7   :  { %v3703_v22 = vmax.f32 %v3701_v4, %v3702_v52  ;;  %v1768_v11 = vcombine.high %v1766_v23, %v1766_v23  ;;  %v3643_v9 = vsel %vm2263_vm0, %v1767_v60, -inf  ;;  %v3650_v50 = vsel %vm2263_vm0, %v1766_v23, -inf }
 0x2f8   :  { %v3697_v43 = vrot.slane %v3696_v17, 1  ;;  %v3711_v26 = vrot.slane %v3710_v31, 1  ;;  %v3717_v45 = vmax.f32 %v3715_v37, %v3716_v19  ;;  %v3638_v6 = vmax.f32 %v3636_v59, %v3637_v49  ;;  %v6826_v19 = vld [vmem:[%s8969_s4 + $0x208] sm:$0xff]  }
 0x2f9   :  { %v3704_v62 = vrot.slane %v3703_v22, 1  ;;  %v3644_v36 = vrot.slane %v3643_v9, 4  ;;  %v3651_v20 = vrot.slane %v3650_v50, 4  ;;  %v3657_v5 = vsel %vm2263_vm0, %v1768_v11, -inf  ;;  %6667 = vmatprep.subr.bf16.mxu0 %v6826_v19 }
 0x2fa   :  { %v3698_v42 = vmax.f32 %v3696_v17, %v3697_v43  ;;  %v8183_v12 = vmax.f32 %v3710_v31, %v3711_v26  ;;  %v3718_v38 = vrot.slane %v3717_v45, 1  ;;  %v3639_v57 = vrot.slane %v3638_v6, 2  ;;  %v6820_v31 = vld [vmem:[%s8969_s4 + $0x98] sm:$0xff]   ;;  %6668 = vmatpush3.bf16.msra.mxu0 %v6826_v19 }
 0x2fb   :  { %v8185_v3 = vmax.f32 %v3703_v22, %v3704_v62  ;;  %v3645_v15 = vmax.f32 %v3643_v9, %v3644_v36  ;;  %v3652_v46 = vmax.f32 %v3650_v50, %v3651_v20  ;;  %v3658_v54 = vrot.slane %v3657_v5, 4  ;;  %6366 = vmatpush3.bf16.msra.mxu1 %v6820_v31  ;;  %v6822_v62 = vld [vmem:[%s8969_s4 + $0xa0] sm:$0xff]  }
 0x2fc   :  { %v8187_v13 = vmax.f32 %v3717_v45, %v3718_v38  ;;  %v3640_v10 = vmax.f32 %v3638_v6, %v3639_v57  ;;  %v4445_v58 = vsel %vm4356_vm3, %v4155_v27, %v4444_v40  ;;  %v4680_v48 = vpack.c.bf16 %v4575_v32, %v8096_v29  ;;  %v6821_v6 = vld [vmem:[%s8969_s4 + $0xe0] sm:$0xff]  }
 0x2fd   :  { %v3646_v55 = vrot.slane %v3645_v15, 2  ;;  %v3653_v34 = vrot.slane %v3652_v46, 2  ;;  %v3659_v25 = vmax.f32 %v3657_v5, %v3658_v54  ;;  %v710_v14 = vmul.f32 %v8194_v47, %v7943_v1  ;;  %v8210_v1 = vld [vmem:[%s8968_s3] ss:$0 sm:$0xff]  ;;  %6367 = vmatprep.subr.bf16.mxu1 %v6821_v6 }
 0x2fe   :  { %v3641_v2 = vrot.slane %v3640_v10, 1  ;;  %5548 = vmatmul.mubr.bf16.gmra.mrb[76].mxu0 %v4680_v48  ;;  %v708_v53 = vmul.f32 %v8194_v47, %v7947_v39  ;;  %v711_v27 = vmul.f32 %v8194_v47, %v7951_v21  ;;  %v709_v29 = vmul.f32 %v8194_v47, %v7998_v44  ;;  %v6830_v48 = vld [vmem:[%s8969_s4 + $0x218] sm:$0xff]  }
 0x2ff   :  { %v3647_v7 = vmax.f32 %v3645_v15, %v3646_v55  ;;  %v3654_v4 = vmax.f32 %v3652_v46, %v3653_v34  ;;  %v3660_v24 = vrot.slane %v3659_v25, 2  ;;  %v781_v39 = vadd.f32 %v8210_v1, %v710_v14  ;;  %6368 = vmatpush3.bf16.msra.mxu1 %v6822_v62 }
 0x300   :  { %v3642_v33 = vmax.f32 %v3640_v10, %v3641_v2  ;;  %v779_v21 = vadd.f32 %v8210_v1, %v708_v53  ;;  %v782_v40 = vadd.f32 %v8210_v1, %v711_v27  ;;  %v780_v44 = vadd.f32 %v8210_v1, %v709_v29 }
 0x301   :  { %v3648_v35 = vrot.slane %v3647_v7, 1  ;;  %v3655_v18 = vrot.slane %v3654_v4, 1  ;;  %v3661_v37 = vmax.f32 %v3659_v25, %v3660_v24  ;;  %v845_v52 = vmax.f32 %v781_v39, 0.0 }
 0x302   :  { %v4156_v23 = vmax.f32 %v3642_v33, %v3698_v42  ;;  %v843_v60 = vmax.f32 %v779_v21, 0.0  ;;  %v8216_v59 = vmax.f32 %v782_v40, 0.0  ;;  %v8218_v17 = vmax.f32 %v780_v44, 0.0  ;;  %v6823_v42 = vld [vmem:[%s8969_s4 + $0xe8] sm:$0xff]  }
 0x303   :  { %v3649_v49 = vmax.f32 %v3647_v7, %v3648_v35  ;;  %v3656_v22 = vmax.f32 %v3654_v4, %v3655_v18  ;;  %v3662_v11 = vrot.slane %v3661_v37, 1  ;;  %v1837_v9 = vcombine.high %v845_v52, %v845_v52  ;;  %6369 = vmatprep.subr.bf16.mxu1 %v6823_v42  ;;  %v6833_v35 = vld [vmem:[%s8969_s4 + $0x220] sm:$0xff]  }
 0x304   :  { %v4446_v50 = vsel %vm4358_vm4, %v4156_v23, %v4445_v58  ;;  %v1844_v43 = vrot.slane %v845_v52, %v7131_v0  ;;  %v1803_v26 = vcombine.high %v843_v60, %v843_v60  ;;  %v1810_v45 = vrot.slane %v843_v60, %v7131_v0  ;;  %v6828_v60 = vld [vmem:[%s8969_s4 + $0xb0] sm:$0xff]  }
 0x305   :  { %v3663_v36 = vmax.f32 %v3661_v37, %v3662_v11  ;;  %v4157_v20 = vmax.f32 %v3649_v49, %v8185_v3  ;;  %v4158_v5 = vmax.f32 %v3656_v22, %v8183_v12  ;;  %v1851_v32 = vrot.slane %v1837_v9, %v7131_v0  ;;  %v6829_v3 = vld [vmem:[%s8969_s4 + $0x210] sm:$0xff]   ;;  %v6831_v11 = vld [vmem:[%s8969_s4 + $0xf8] sm:$0xff]  }
 0x306   :  { %v1852_v38 = vcombine.high %v1844_v43, %v1844_v43  ;;  %v3776_v57 = vsel %vm2263_vm0, %v1844_v43, -inf  ;;  %v1817_v15 = vrot.slane %v1803_v26, %v7131_v0  ;;  %v1818_v46 = vcombine.high %v1810_v45, %v1810_v45  ;;  %6669 = vmatprep.subr.bf16.mxu0 %v6829_v3 }
 0x307   :  { %v4159_v12 = vmax.f32 %v3663_v36, %v8187_v13  ;;  %v4447_v54 = vsel %vm4360_vm5, %v4157_v20, %v4446_v50  ;;  %v1853_v10 = vcombine.high %v1851_v32, %v1851_v32  ;;  %v3777_v58 = vrot.slane %v3776_v57, 4  ;;  %v6824_v13 = vld [vmem:[%s8969_s4 + $0xa8] sm:$0xff]   ;;  %6670 = vmatpush3.bf16.msra.mxu0 %v6829_v3 }
 0x308   :  { %v4448_v55 = vsel %vm4362_vm6, %v4158_v5, %v4447_v54  ;;  %v3783_v34 = vsel %vm2263_vm0, %v1852_v38, -inf  ;;  %v3790_v25 = vsel %vm2263_vm0, %v1851_v32, -inf  ;;  %v1819_v14 = vcombine.high %v1817_v15, %v1817_v15  ;;  %6671 = vmatprep.subr.bf16.mxu0 %v6830_v48  ;;  %6370 = vmatpush3.bf16.msra.mxu1 %v6824_v13  ;;  %v6834_v20 = vld [vmem:[%s8969_s4 + $0x228] sm:$0xff]   ;;  %v6835_v54 = vld [vmem:[%s8969_s4 + $0x1c0] sm:$0xff]  }
 0x309   :  { %v4449_v2 = vsel %vm4364_vm7, %v4159_v12, %v4448_v55  ;;  %v3778_v53 = vmax.f32 %v3776_v57, %v3777_v58  ;;  %v3784_v27 = vrot.slane %v3783_v34, 4  ;;  %v3791_v29 = vrot.slane %v3790_v25, 4  ;;  %6371 = vmatprep.subr.bf16.mxu1 %v6827_v16  ;;  %v6832_v57 = vld [vmem:[%s8969_s4 + $0xb8] sm:$0xff]  }
 0x30a   :  { %4500 = vst [vmem:[#allocation2 + $0xf1] sm:$0xff] %v4449_v2  ;;  %v3797_v7 = vsel %vm2263_vm0, %v1853_v10, -inf  ;;  %v3720_v4 = vsel %vm2263_vm0, %v1810_v45, -inf  ;;  %v3727_v24 = vsel %vm2263_vm0, %v1818_v46, -inf  ;;  %v3734_v39 = vsel %vm2263_vm0, %v1817_v15, -inf  ;;  %v6837_v2 = vld [vmem:[%s8969_s4 + $0x230] sm:$0xff]  }
 0x30b   :  { %v3779_v33 = vrot.slane %v3778_v53, 2  ;;  %v3785_v21 = vmax.f32 %v3783_v34, %v3784_v27  ;;  %v3792_v40 = vmax.f32 %v3790_v25, %v3791_v29  ;;  %v3798_v44 = vrot.slane %v3797_v7, 4  ;;  %6672 = vmatpush3.bf16.msra.mxu0 %v6830_v48 }
 0x30c   :  { %v3721_v18 = vrot.slane %v3720_v4, 4  ;;  %v3728_v37 = vrot.slane %v3727_v24, 4  ;;  %v3735_v52 = vrot.slane %v3734_v39, 4  ;;  %v3741_v23 = vsel %vm2263_vm0, %v1819_v14, -inf  ;;  %6673 = vmatprep.subr.bf16.mxu0 %v6833_v35  ;;  %6372 = vmatpush3.bf16.msra.mxu1 %v6828_v60 }
 0x30d   :  { %v3780_v31 = vmax.f32 %v3778_v53, %v3779_v33  ;;  %v3786_v19 = vrot.slane %v3785_v21, 2  ;;  %v3793_v49 = vrot.slane %v3792_v40, 2  ;;  %v3799_v22 = vmax.f32 %v3797_v7, %v3798_v44  ;;  %6373 = vmatprep.subr.bf16.mxu1 %v6831_v11 }
 0x30e   :  { %v3722_v9 = vmax.f32 %v3720_v4, %v3721_v18  ;;  %v3729_v50 = vmax.f32 %v3727_v24, %v3728_v37  ;;  %v3736_v43 = vmax.f32 %v3734_v39, %v3735_v52  ;;  %v3742_v26 = vrot.slane %v3741_v23, 4 }
 0x30f   :  { %v3781_v45 = vrot.slane %v3780_v31, 1  ;;  %v3787_v6 = vmax.f32 %v3785_v21, %v3786_v19  ;;  %v3794_v62 = vmax.f32 %v3792_v40, %v3793_v49  ;;  %v3800_v36 = vrot.slane %v3799_v22, 2  ;;  %6674 = vmatpush3.bf16.msra.mxu0 %v6833_v35 }
 0x310   :  { %v3723_v5 = vrot.slane %v3722_v9, 2  ;;  %v3730_v32 = vrot.slane %v3729_v50, 2  ;;  %v3737_v42 = vrot.slane %v3736_v43, 2  ;;  %v3743_v38 = vmax.f32 %v3741_v23, %v3742_v26  ;;  %6675 = vmatprep.subr.bf16.mxu0 %v6834_v20  ;;  %6374 = vmatpush3.bf16.msra.mxu1 %v6832_v57 }
 0x311   :  { %v3782_v15 = vmax.f32 %v3780_v31, %v3781_v45  ;;  %v3788_v46 = vrot.slane %v3787_v6, 1  ;;  %v3795_v3 = vrot.slane %v3794_v62, 1  ;;  %v3801_v12 = vmax.f32 %v3799_v22, %v3800_v36  ;;  %6487 = vmatprep.subr.bf16.mxu1 %v6835_v54 }
 0x312   :  { %v3724_v10 = vmax.f32 %v3722_v9, %v3723_v5  ;;  %v3731_v58 = vmax.f32 %v3729_v50, %v3730_v32  ;;  %v3738_v48 = vmax.f32 %v3736_v43, %v3737_v42  ;;  %v3744_v55 = vrot.slane %v3743_v38, 2 }
 0x313   :  { %v3789_v34 = vmax.f32 %v3787_v6, %v3788_v46  ;;  %v3796_v25 = vmax.f32 %v3794_v62, %v3795_v3  ;;  %v3802_v14 = vrot.slane %v3801_v12, 1  ;;  %v1854_v13 = vcombine.high %v8216_v59, %v8216_v59  ;;  %6676 = vmatpush3.bf16.msra.mxu0 %v6834_v20 }
 0x314   :  { %v3725_v53 = vrot.slane %v3724_v10, 1  ;;  %v3732_v27 = vrot.slane %v3731_v58, 1  ;;  %v3739_v29 = vrot.slane %v3738_v48, 1  ;;  %v3745_v16 = vmax.f32 %v3743_v38, %v3744_v55  ;;  %6677 = vmatprep.subr.bf16.mxu0 %v6837_v2 }
 0x315   :  { %v3803_v7 = vmax.f32 %v3801_v12, %v3802_v14  ;;  %v1861_v4 = vrot.slane %v8216_v59, %v7131_v0  ;;  %v1868_v24 = vrot.slane %v1854_v13, %v7131_v0  ;;  %v1820_v39 = vcombine.high %v8218_v17, %v8218_v17  ;;  %v6838_v59 = vld [vmem:[%s8969_s4 + $0x238] sm:$0xff]  }
 0x316   :  { %v3726_v33 = vmax.f32 %v3724_v10, %v3725_v53  ;;  %v3733_v21 = vmax.f32 %v3731_v58, %v3732_v27  ;;  %v3740_v40 = vmax.f32 %v3738_v48, %v3739_v29  ;;  %v3746_v44 = vrot.slane %v3745_v16, 1 }
 0x317   :  { %v1869_v35 = vcombine.high %v1861_v4, %v1861_v4  ;;  %v1870_v18 = vcombine.high %v1868_v24, %v1868_v24  ;;  %v3804_v37 = vsel %vm2263_vm0, %v1861_v4, -inf  ;;  %v3818_v52 = vsel %vm2263_vm0, %v1868_v24, -inf  ;;  %6678 = vmatpush3.bf16.msra.mxu0 %v6837_v2 }
 0x318   :  { %v3747_v23 = vmax.f32 %v3745_v16, %v3746_v44  ;;  %v4160_v60 = vmax.f32 %v3726_v33, %v3782_v15  ;;  %v4161_v31 = vmax.f32 %v3733_v21, %v3789_v34  ;;  %v4162_v19 = vmax.f32 %v3740_v40, %v3796_v25  ;;  %6679 = vmatprep.subr.bf16.mxu0 %v6838_v59  ;;  %v6878_v25 = vld [vmem:[#allocation2] sm:$0xff]  ;;  %v8313_v40 = vld [vmem:[#allocation2 + $0xb1] sm:$0xff] }
 0x319   :  { %v3805_v49 = vrot.slane %v3804_v37, 4  ;;  %v3811_v22 = vsel %vm2263_vm0, %v1869_v35, -inf  ;;  %v3819_v11 = vrot.slane %v3818_v52, 4  ;;  %v3825_v9 = vsel %vm2263_vm0, %v1870_v18, -inf  ;;  %v4528_v21 = vld [vmem:[#allocation2 + $0xa1] sm:$0xff]  ;;  %v4513_v44 = vld [vmem:[#allocation2 + $0xb0] sm:$0xff] }
 0x31a   :  { %v4163_v50 = vmax.f32 %v3747_v23, %v3803_v7  ;;  %v4450_v43 = vsel %vm4352_vm1, %v4161_v31, %v4160_v60  ;;  %v3812_v26 = vrot.slane %v3811_v22, 4  ;;  %v3826_v45 = vrot.slane %v3825_v9, 4 }
 0x31b   :  { %v4451_v6 = vsel %vm4354_vm2, %v4162_v19, %v4450_v43  ;;  %v3806_v62 = vmax.f32 %v3804_v37, %v3805_v49  ;;  %v3820_v36 = vmax.f32 %v3818_v52, %v3819_v11  ;;  %v1827_v20 = vrot.slane %v8218_v17, %v7131_v0  ;;  %6680 = vmatpush3.bf16.msra.mxu0 %v6838_v59 }
 0x31c   :  { %v3813_v5 = vmax.f32 %v3811_v22, %v3812_v26  ;;  %v3827_v32 = vmax.f32 %v3825_v9, %v3826_v45  ;;  %v1834_v42 = vrot.slane %v1820_v39, %v7131_v0  ;;  %v8307_v38 = vsel %vm4356_vm3, %v4163_v50, %v4451_v6  ;;  %6717 = vmatprep.subr.bf16.mxu0 %v6878_v25 }
 0x31d   :  { %v3807_v57 = vrot.slane %v3806_v62, 2  ;;  %v3821_v15 = vrot.slane %v3820_v36, 2  ;;  %v1835_v46 = vcombine.high %v1827_v20, %v1827_v20  ;;  %v3748_v3 = vsel %vm2263_vm0, %v1827_v20, -inf }
 0x31e   :  { %v3814_v12 = vrot.slane %v3813_v5, 2  ;;  %v3828_v54 = vrot.slane %v3827_v32, 2  ;;  %v1836_v10 = vcombine.high %v1834_v42, %v1834_v42  ;;  %v3749_v58 = vrot.slane %v3748_v3, 4 }
 0x31f   :  { %v3808_v48 = vmax.f32 %v3806_v62, %v3807_v57  ;;  %v3822_v17 = vmax.f32 %v3820_v36, %v3821_v15  ;;  %v3755_v55 = vsel %vm2263_vm0, %v1835_v46, -inf  ;;  %v3762_v34 = vsel %vm2263_vm0, %v1834_v42, -inf }
 0x320   :  { %v3815_v14 = vmax.f32 %v3813_v5, %v3814_v12  ;;  %v3829_v13 = vmax.f32 %v3827_v32, %v3828_v54  ;;  %v3750_v2 = vmax.f32 %v3748_v3, %v3749_v58  ;;  %v3756_v53 = vrot.slane %v3755_v55, 4 }
 0x321   :  { %v3809_v27 = vrot.slane %v3808_v48, 1  ;;  %v3823_v29 = vrot.slane %v3822_v17, 1  ;;  %v3763_v16 = vrot.slane %v3762_v34, 4  ;;  %v3769_v7 = vsel %vm2263_vm0, %v1836_v10, -inf }
 0x322   :  { %v3816_v4 = vrot.slane %v3815_v14, 1  ;;  %v3830_v24 = vrot.slane %v3829_v13, 1  ;;  %v3751_v39 = vrot.slane %v3750_v2, 2  ;;  %v3757_v33 = vmax.f32 %v3755_v55, %v3756_v53 }
 0x323   :  { %v3810_v35 = vmax.f32 %v3808_v48, %v3809_v27  ;;  %v3824_v18 = vmax.f32 %v3822_v17, %v3823_v29  ;;  %v3764_v37 = vmax.f32 %v3762_v34, %v3763_v16  ;;  %v3770_v52 = vrot.slane %v3769_v7, 4 }
 0x324   :  { %v3817_v59 = vmax.f32 %v3815_v14, %v3816_v4  ;;  %v3831_v23 = vmax.f32 %v3829_v13, %v3830_v24  ;;  %v3752_v60 = vmax.f32 %v3750_v2, %v3751_v39  ;;  %v3758_v31 = vrot.slane %v3757_v33, 2 }
 0x325   :  { %v3765_v19 = vrot.slane %v3764_v37, 2  ;;  %v3771_v49 = vmax.f32 %v3769_v7, %v3770_v52  ;;  %v4686_v22 = vpack.c.bf16 %v8313_v40, %v4528_v21  ;;  %v4685_v11 = vpack.c.bf16 %v4513_v44, %v6878_v25 }
 0x326   :  { %v3753_v9 = vrot.slane %v3752_v60, 1  ;;  %v3759_v50 = vmax.f32 %v3757_v33, %v3758_v31  ;;  %v714_v43 = vmul.f32 %v8194_v47, %v8030_v63  ;;  %v712_v26 = vmul.f32 %v8194_v47, %v8034_v41 }
 0x327   :  { %v3766_v45 = vmax.f32 %v3764_v37, %v3765_v19  ;;  %v3772_v6 = vrot.slane %v3771_v49, 2  ;;  %5361 = vmatprep.mubr.bf16.mxu1 %v4686_v22  ;;  %v715_v62 = vmul.f32 %v8194_v47, %v8038_v51  ;;  %v713_v36 = vmul.f32 %v8194_v47, %v8073_v56 }
 0x328   :  { %v3754_v20 = vmax.f32 %v3752_v60, %v3753_v9  ;;  %v3760_v5 = vrot.slane %v3759_v50, 1  ;;  %5362 = vmatmul.mubr.bf16.gmra.mrb[16].mxu1 %v4685_v11  ;;  %v785_v32 = vadd.f32 %v8210_v1, %v714_v43  ;;  %v783_v42 = vadd.f32 %v8210_v1, %v712_v26 }
 0x329   :  { %v3767_v63 = vrot.slane %v3766_v45, 1  ;;  %v3773_v57 = vmax.f32 %v3771_v49, %v3772_v6  ;;  %v786_v41 = vadd.f32 %v8210_v1, %v715_v62  ;;  %v784_v15 = vadd.f32 %v8210_v1, %v713_v36 }
 0x32a   :  { %v3761_v46 = vmax.f32 %v3759_v50, %v3760_v5  ;;  %v4164_v3 = vmax.f32 %v3754_v20, %v3810_v35  ;;  %v849_v12 = vmax.f32 %v785_v32, 0.0  ;;  %v847_v51 = vmax.f32 %v783_v42, 0.0 }
 0x32b   :  { %v3768_v54 = vmax.f32 %v3766_v45, %v3767_v63  ;;  %v3774_v10 = vrot.slane %v3773_v57, 1  ;;  %v8328_v56 = vmax.f32 %v786_v41, 0.0  ;;  %v8330_v58 = vmax.f32 %v784_v15, 0.0 }
 0x32c   :  { %v4165_v48 = vmax.f32 %v3761_v46, %v3817_v59  ;;  %v4453_v17 = vsel %vm4358_vm4, %v4164_v3, %v8307_v38  ;;  %v1905_v55 = vcombine.high %v849_v12, %v849_v12  ;;  %v1912_v34 = vrot.slane %v849_v12, %v7131_v0 }
 0x32d   :  { %v3775_v25 = vmax.f32 %v3773_v57, %v3774_v10  ;;  %v4166_v14 = vmax.f32 %v3768_v54, %v3824_v18  ;;  %v1871_v13 = vcombine.high %v847_v51, %v847_v51  ;;  %v1878_v2 = vrot.slane %v847_v51, %v7131_v0 }
 0x32e   :  { %v4454_v53 = vsel %vm4360_vm5, %v4165_v48, %v4453_v17  ;;  %v1919_v27 = vrot.slane %v1905_v55, %v7131_v0  ;;  %v1920_v29 = vcombine.high %v1912_v34, %v1912_v34  ;;  %v3888_v16 = vsel %vm2263_vm0, %v1912_v34, -inf }
 0x32f   :  { %v4167_v7 = vmax.f32 %v3775_v25, %v3831_v23  ;;  %v4455_v4 = vsel %vm4362_vm6, %v4166_v14, %v4454_v53  ;;  %v3889_v24 = vrot.slane %v3888_v16, 4  ;;  %v1885_v38 = vrot.slane %v1871_v13, %v7131_v0 }
 0x330   :  { %v1921_v39 = vcombine.high %v1919_v27, %v1919_v27  ;;  %v3895_v33 = vsel %vm2263_vm0, %v1920_v29, -inf  ;;  %v3902_v21 = vsel %vm2263_vm0, %v1919_v27, -inf  ;;  %v1886_v44 = vcombine.high %v1878_v2, %v1878_v2 }
 0x331   :  { %v8344_v35 = vsel %vm4364_vm7, %v4167_v7, %v4455_v4  ;;  %v3890_v18 = vmax.f32 %v3888_v16, %v3889_v24  ;;  %v3896_v37 = vrot.slane %v3895_v33, 4  ;;  %v3903_v52 = vrot.slane %v3902_v21, 4 }
 0x332   :  { %4501 = vst [vmem:[#allocation2 + $0x101] sm:$0xff] %v8344_v35  ;;  %v3909_v59 = vsel %vm2263_vm0, %v1921_v39, -inf  ;;  %v1887_v23 = vcombine.high %v1885_v38, %v1885_v38  ;;  %v3832_v60 = vsel %vm2263_vm0, %v1878_v2, -inf  ;;  %v3839_v31 = vsel %vm2263_vm0, %v1886_v44, -inf }
 0x333   :  { %v3891_v19 = vrot.slane %v3890_v18, 2  ;;  %v3897_v49 = vmax.f32 %v3895_v33, %v3896_v37  ;;  %v3904_v22 = vmax.f32 %v3902_v21, %v3903_v52  ;;  %v3910_v11 = vrot.slane %v3909_v59, 4 }
 0x334   :  { %v3833_v9 = vrot.slane %v3832_v60, 4  ;;  %v3840_v50 = vrot.slane %v3839_v31, 4  ;;  %v3846_v43 = vsel %vm2263_vm0, %v1885_v38, -inf  ;;  %v3853_v26 = vsel %vm2263_vm0, %v1887_v23, -inf }
 0x335   :  { %v3892_v45 = vmax.f32 %v3890_v18, %v3891_v19  ;;  %v3898_v6 = vrot.slane %v3897_v49, 2  ;;  %v3905_v62 = vrot.slane %v3904_v22, 2  ;;  %v3911_v36 = vmax.f32 %v3909_v59, %v3910_v11 }
 0x336   :  { %v3834_v20 = vmax.f32 %v3832_v60, %v3833_v9  ;;  %v3841_v5 = vmax.f32 %v3839_v31, %v3840_v50  ;;  %v3847_v32 = vrot.slane %v3846_v43, 4  ;;  %v3854_v42 = vrot.slane %v3853_v26, 4 }
 0x337   :  { %v3893_v63 = vrot.slane %v3892_v45, 1  ;;  %v3899_v57 = vmax.f32 %v3897_v49, %v3898_v6  ;;  %v3906_v41 = vmax.f32 %v3904_v22, %v3905_v62  ;;  %v3912_v15 = vrot.slane %v3911_v36, 2 }
 0x338   :  { %v3835_v46 = vrot.slane %v3834_v20, 2  ;;  %v3842_v3 = vrot.slane %v3841_v5, 2  ;;  %v3848_v12 = vmax.f32 %v3846_v43, %v3847_v32  ;;  %v3855_v51 = vmax.f32 %v3853_v26, %v3854_v42  ;;  %v8365_v43 = vld [vmem:[#allocation2 + $0xc2] sm:$0xff]  ;;  %v8371_v42 = vld [vmem:[#allocation2 + $0xb2] sm:$0xff] }
 0x339   :  { %v3894_v54 = vmax.f32 %v3892_v45, %v3893_v63  ;;  %v3900_v10 = vrot.slane %v3899_v57, 1  ;;  %v3907_v48 = vrot.slane %v3906_v41, 1  ;;  %v3913_v17 = vmax.f32 %v3911_v36, %v3912_v15 }
 0x33a   :  { %v3836_v55 = vmax.f32 %v3834_v20, %v3835_v46  ;;  %v3843_v34 = vmax.f32 %v3841_v5, %v3842_v3  ;;  %v3849_v25 = vrot.slane %v3848_v12, 2  ;;  %v3856_v14 = vrot.slane %v3855_v51, 2 }
 0x33b   :  { %v3901_v13 = vmax.f32 %v3899_v57, %v3900_v10  ;;  %v3908_v2 = vmax.f32 %v3906_v41, %v3907_v48  ;;  %v3914_v53 = vrot.slane %v3913_v17, 1  ;;  %v1922_v27 = vcombine.high %v8328_v56, %v8328_v56 }
 0x33c   :  { %v3837_v29 = vrot.slane %v3836_v55, 1  ;;  %v3844_v16 = vrot.slane %v3843_v34, 1  ;;  %v3850_v7 = vmax.f32 %v3848_v12, %v3849_v25  ;;  %v3857_v4 = vmax.f32 %v3855_v51, %v3856_v14 }
 0x33d   :  { %v8354_v24 = vmax.f32 %v3913_v17, %v3914_v53  ;;  %v1929_v38 = vrot.slane %v8328_v56, %v7131_v0  ;;  %v1936_v39 = vrot.slane %v1922_v27, %v7131_v0  ;;  %v1888_v33 = vcombine.high %v8330_v58, %v8330_v58 }
 0x33e   :  { %v3838_v21 = vmax.f32 %v3836_v55, %v3837_v29  ;;  %v3845_v44 = vmax.f32 %v3843_v34, %v3844_v16  ;;  %v3851_v18 = vrot.slane %v3850_v7, 1  ;;  %v3858_v37 = vrot.slane %v3857_v4, 1 }
 0x33f   :  { %v1937_v52 = vcombine.high %v1929_v38, %v1929_v38  ;;  %v1938_v59 = vcombine.high %v1936_v39, %v1936_v39  ;;  %v3916_v23 = vsel %vm2263_vm0, %v1929_v38, -inf  ;;  %v3930_v60 = vsel %vm2263_vm0, %v1936_v39, -inf }
 0x340   :  { %v3852_v31 = vmax.f32 %v3850_v7, %v3851_v18  ;;  %v3859_v19 = vmax.f32 %v3857_v4, %v3858_v37  ;;  %v4168_v49 = vmax.f32 %v3838_v21, %v3894_v54  ;;  %v4169_v22 = vmax.f32 %v3845_v44, %v3901_v13 }
 0x341   :  { %v3917_v56 = vrot.slane %v3916_v23, 4  ;;  %v3923_v11 = vsel %vm2263_vm0, %v1937_v52, -inf  ;;  %v3931_v9 = vrot.slane %v3930_v60, 4  ;;  %v3937_v50 = vsel %vm2263_vm0, %v1938_v59, -inf }
 0x342   :  { %v4170_v26 = vmax.f32 %v3852_v31, %v3908_v2  ;;  %v4171_v45 = vmax.f32 %v3859_v19, %v8354_v24  ;;  %v4457_v6 = vsel %vm4352_vm1, %v4169_v22, %v4168_v49  ;;  %v3924_v62 = vrot.slane %v3923_v11, 4  ;;  %v8381_v31 = vld [vmem:[#allocation2 + $0xd1] sm:$0xff] }
 0x343   :  { %v3918_v36 = vmax.f32 %v3916_v23, %v3917_v56  ;;  %v3932_v20 = vmax.f32 %v3930_v60, %v3931_v9  ;;  %v3938_v5 = vrot.slane %v3937_v50, 4  ;;  %v1895_v32 = vrot.slane %v8330_v58, %v7131_v0 }
 0x344   :  { %v4458_v63 = vsel %vm4354_vm2, %v4170_v26, %v4457_v6  ;;  %v3925_v57 = vmax.f32 %v3923_v11, %v3924_v62  ;;  %v1902_v41 = vrot.slane %v1888_v33, %v7131_v0  ;;  %v4690_v15 = vpack.c.bf16 %v8365_v43, %v8371_v42  ;;  %v4577_v33 = vld [vmem:[#allocation2 + $0xc1] sm:$0xff] }
 0x345   :  { %v3919_v46 = vrot.slane %v3918_v36, 2  ;;  %v3933_v3 = vrot.slane %v3932_v20, 2  ;;  %v3939_v12 = vmax.f32 %v3937_v50, %v3938_v5  ;;  %v1903_v51 = vcombine.high %v1895_v32, %v1895_v32 }
 0x346   :  { %v3926_v54 = vrot.slane %v3925_v57, 2  ;;  %v1904_v10 = vcombine.high %v1902_v41, %v1902_v41  ;;  %v3860_v48 = vsel %vm2263_vm0, %v1895_v32, -inf  ;;  %v3874_v58 = vsel %vm2263_vm0, %v1902_v41, -inf  ;;  %5555 = vmatprep.mubr.bf16.mxu0 %v4690_v15 }
 0x347   :  { %v3920_v17 = vmax.f32 %v3918_v36, %v3919_v46  ;;  %v3934_v55 = vmax.f32 %v3932_v20, %v3933_v3  ;;  %v3940_v34 = vrot.slane %v3939_v12, 2  ;;  %v3861_v25 = vrot.slane %v3860_v48, 4 }
 0x348   :  { %v3927_v14 = vmax.f32 %v3925_v57, %v3926_v54  ;;  %v3867_v13 = vsel %vm2263_vm0, %v1903_v51, -inf  ;;  %v3875_v2 = vrot.slane %v3874_v58, 4  ;;  %v3881_v53 = vsel %vm2263_vm0, %v1904_v10, -inf }
 0x349   :  { %v3921_v27 = vrot.slane %v3920_v17, 1  ;;  %v3935_v29 = vrot.slane %v3934_v55, 1  ;;  %v3941_v16 = vmax.f32 %v3939_v12, %v3940_v34  ;;  %v3862_v7 = vmax.f32 %v3860_v48, %v3861_v25 }
 0x34a   :  { %v3928_v4 = vrot.slane %v3927_v14, 1  ;;  %v3868_v24 = vrot.slane %v3867_v13, 4  ;;  %v3876_v38 = vmax.f32 %v3874_v58, %v3875_v2  ;;  %v3882_v39 = vrot.slane %v3881_v53, 4 }
 0x34b   :  { %v3922_v21 = vmax.f32 %v3920_v17, %v3921_v27  ;;  %v3936_v44 = vmax.f32 %v3934_v55, %v3935_v29  ;;  %v3942_v18 = vrot.slane %v3941_v16, 1  ;;  %v3863_v37 = vrot.slane %v3862_v7, 2 }
 0x34c   :  { %v3929_v52 = vmax.f32 %v3927_v14, %v3928_v4  ;;  %v3869_v59 = vmax.f32 %v3867_v13, %v3868_v24  ;;  %v3877_v23 = vrot.slane %v3876_v38, 2  ;;  %v3883_v60 = vmax.f32 %v3881_v53, %v3882_v39 }
 0x34d   :  { %v3943_v19 = vmax.f32 %v3941_v16, %v3942_v18  ;;  %v3864_v49 = vmax.f32 %v3862_v7, %v3863_v37  ;;  %v4459_v22 = vsel %vm4356_vm3, %v4171_v45, %v4458_v63  ;;  %v4689_v56 = vpack.c.bf16 %v4577_v33, %v8313_v40 }
 0x34e   :  { %v3870_v11 = vrot.slane %v3869_v59, 2  ;;  %v3878_v9 = vmax.f32 %v3876_v38, %v3877_v23  ;;  %v3884_v50 = vrot.slane %v3883_v60, 2  ;;  %v718_v26 = vmul.f32 %v8194_v47, %v8112_v61 }
 0x34f   :  { %v3865_v6 = vrot.slane %v3864_v49, 1  ;;  %5556 = vmatmul.mubr.bf16.gmra.mrb[80].mxu0 %v4689_v56  ;;  %v716_v62 = vmul.f32 %v8194_v47, %v8114_v28  ;;  %v719_v36 = vmul.f32 %v8194_v47, %v8129_v8  ;;  %v8392_v20 = vpack.c.bf16 %v8381_v31, %v4577_v33 }
 0x350   :  { %v3871_v45 = vmax.f32 %v3869_v59, %v3870_v11  ;;  %v3879_v5 = vrot.slane %v3878_v9, 1  ;;  %v3885_v40 = vmax.f32 %v3883_v60, %v3884_v50  ;;  %v789_v32 = vadd.f32 %v8210_v1, %v718_v26 }
 0x351   :  { %v3866_v63 = vmax.f32 %v3864_v49, %v3865_v6  ;;  %v787_v57 = vadd.f32 %v8210_v1, %v716_v62  ;;  %v790_v61 = vadd.f32 %v8210_v1, %v719_v36  ;;  %5369 = vmatprep.mubr.bf16.mxu1 %v8392_v20  ;;  %v717_v28 = vmul.f32 %v8194_v47, %v8148_v30 }
 0x352   :  { %v3872_v41 = vrot.slane %v3871_v45, 1  ;;  %v3880_v8 = vmax.f32 %v3878_v9, %v3879_v5  ;;  %v3886_v15 = vrot.slane %v3885_v40, 1  ;;  %v853_v46 = vmax.f32 %v789_v32, 0.0 }
 0x353   :  { %v4172_v3 = vmax.f32 %v3866_v63, %v3922_v21  ;;  %v851_v12 = vmax.f32 %v787_v57, 0.0  ;;  %v8400_v51 = vmax.f32 %v790_v61, 0.0  ;;  %v8403_v54 = vadd.f32 %v8210_v1, %v717_v28 }
 0x354   :  { %v3873_v10 = vmax.f32 %v3871_v45, %v3872_v41  ;;  %v3887_v48 = vmax.f32 %v3885_v40, %v3886_v15  ;;  %v4174_v58 = vmax.f32 %v3880_v8, %v3936_v44  ;;  %v1973_v17 = vcombine.high %v853_v46, %v853_v46 }
 0x355   :  { %v4460_v55 = vsel %vm4358_vm4, %v4172_v3, %v4459_v22  ;;  %v1980_v34 = vrot.slane %v853_v46, %v7131_v0  ;;  %v1939_v30 = vcombine.high %v851_v12, %v851_v12  ;;  %v1946_v47 = vrot.slane %v851_v12, %v7131_v0 }
 0x356   :  { %v4173_v25 = vmax.f32 %v3873_v10, %v3929_v52  ;;  %v4175_v14 = vmax.f32 %v3887_v48, %v3943_v19  ;;  %v1987_v13 = vrot.slane %v1973_v17, %v7131_v0  ;;  %v1990_v2 = vcombine.high %v8400_v51, %v8400_v51  ;;  %v8426_v10 = vpop.f32.mrb[0].mxu1 }
 0x357   :  { %v1988_v1 = vcombine.high %v1980_v34, %v1980_v34  ;;  %v4000_v53 = vsel %vm2263_vm0, %v1980_v34, -inf  ;;  %v1953_v27 = vrot.slane %v1939_v30, %v7131_v0  ;;  %v1954_v29 = vcombine.high %v1946_v47, %v1946_v47  ;;  %v8428_v34 = vpop.f32.mrb[1].mxu1 }
 0x358   :  { %v4461_v16 = vsel %vm4360_vm5, %v4173_v25, %v4460_v55  ;;  %v1989_v7 = vcombine.high %v1987_v13, %v1987_v13  ;;  %v4001_v4 = vrot.slane %v4000_v53, 4  ;;  %v4014_v24 = vsel %vm2263_vm0, %v1987_v13, -inf  ;;  %v8430_v13 = vpop.f32.mrb[2].mxu1 }
 0x359   :  { %v4462_v38 = vsel %vm4362_vm6, %v4174_v58, %v4461_v16  ;;  %v4007_v39 = vsel %vm2263_vm0, %v1988_v1, -inf  ;;  %v4015_v33 = vrot.slane %v4014_v24, 4  ;;  %v1955_v21 = vcombine.high %v1953_v27, %v1953_v27  ;;  %v8434_v16 = vpop.f32.mrb[3].mxu1 }
 0x35a   :  { %v8418_v44 = vsel %vm4364_vm7, %v4175_v14, %v4462_v38  ;;  %v4002_v18 = vmax.f32 %v4000_v53, %v4001_v4  ;;  %v4008_v37 = vrot.slane %v4007_v39, 4  ;;  %v4021_v52 = vsel %vm2263_vm0, %v1989_v7, -inf }
 0x35b   :  { %4502 = vst [vmem:[#allocation2 + $0x111] sm:$0xff] %v8418_v44  ;;  %v4016_v59 = vmax.f32 %v4014_v24, %v4015_v33  ;;  %v4022_v23 = vrot.slane %v4021_v52, 4  ;;  %v3944_v60 = vsel %vm2263_vm0, %v1946_v47, -inf  ;;  %v3951_v19 = vsel %vm2263_vm0, %v1954_v29, -inf }
 0x35c   :  { %v4003_v49 = vrot.slane %v4002_v18, 2  ;;  %v4009_v22 = vmax.f32 %v4007_v39, %v4008_v37  ;;  %v3945_v56 = vrot.slane %v3944_v60, 4  ;;  %v3952_v11 = vrot.slane %v3951_v19, 4 }
 0x35d   :  { %v4017_v9 = vrot.slane %v4016_v59, 2  ;;  %v4023_v50 = vmax.f32 %v4021_v52, %v4022_v23  ;;  %v3958_v26 = vsel %vm2263_vm0, %v1953_v27, -inf  ;;  %v3965_v6 = vsel %vm2263_vm0, %v1955_v21, -inf }
 0x35e   :  { %v4004_v62 = vmax.f32 %v4002_v18, %v4003_v49  ;;  %v4010_v36 = vrot.slane %v4009_v22, 2  ;;  %v3946_v45 = vmax.f32 %v3944_v60, %v3945_v56  ;;  %v3953_v5 = vmax.f32 %v3951_v19, %v3952_v11 }
 0x35f   :  { %v4018_v40 = vmax.f32 %v4016_v59, %v4017_v9  ;;  %v4024_v32 = vrot.slane %v4023_v50, 2  ;;  %v3959_v63 = vrot.slane %v3958_v26, 4  ;;  %v3966_v57 = vrot.slane %v3965_v6, 4 }
 0x360   :  { %v4005_v61 = vrot.slane %v4004_v62, 1  ;;  %v4011_v28 = vmax.f32 %v4009_v22, %v4010_v36  ;;  %v3947_v41 = vrot.slane %v3946_v45, 2  ;;  %v3954_v8 = vrot.slane %v3953_v5, 2  ;;  %v8448_v36 = vld [vmem:[#allocation2 + $0xd0] sm:$0xff] }
 0x361   :  { %v4019_v15 = vrot.slane %v4018_v40, 1  ;;  %v4025_v46 = vmax.f32 %v4023_v50, %v4024_v32  ;;  %v3960_v3 = vmax.f32 %v3958_v26, %v3959_v63  ;;  %v3967_v12 = vmax.f32 %v3965_v6, %v3966_v57 }
 0x362   :  { %v4006_v48 = vmax.f32 %v4004_v62, %v4005_v61  ;;  %v4012_v58 = vrot.slane %v4011_v28, 1  ;;  %v3948_v17 = vmax.f32 %v3946_v45, %v3947_v41  ;;  %v3955_v55 = vmax.f32 %v3953_v5, %v3954_v8 }
 0x363   :  { %v4020_v30 = vmax.f32 %v4018_v40, %v4019_v15  ;;  %v4026_v47 = vrot.slane %v4025_v46, 1  ;;  %v3961_v25 = vrot.slane %v3960_v3, 2  ;;  %v3968_v14 = vrot.slane %v3967_v12, 2  ;;  %v8455_v15 = vld [vmem:[#allocation2 + $0xc0] sm:$0xff] }
 0x364   :  { %v4013_v1 = vmax.f32 %v4011_v28, %v4012_v58  ;;  %v3949_v53 = vrot.slane %v3948_v17, 1  ;;  %v3956_v27 = vrot.slane %v3955_v55, 1  ;;  %v1997_v29 = vrot.slane %v8400_v51, %v7131_v0 }
 0x365   :  { %v4027_v7 = vmax.f32 %v4025_v46, %v4026_v47  ;;  %v3962_v4 = vmax.f32 %v3960_v3, %v3961_v25  ;;  %v3969_v24 = vmax.f32 %v3967_v12, %v3968_v14  ;;  %v2004_v38 = vrot.slane %v1990_v2, %v7131_v0  ;;  %v8443_v2 = vpop.f32.mrb[64].mxu0 }
 0x366   :  { %v3950_v39 = vmax.f32 %v3948_v17, %v3949_v53  ;;  %v3957_v33 = vmax.f32 %v3955_v55, %v3956_v27  ;;  %v2005_v21 = vcombine.high %v1997_v29, %v1997_v29  ;;  %v4028_v18 = vsel %vm2263_vm0, %v1997_v29, -inf  ;;  %v8450_v45 = vpop.f32.mrb[65].mxu0  ;;  %v8470_v27 = vld [vmem:[#allocation2 + $0xe2] sm:$0xff] }
 0x367   :  { %v3963_v37 = vrot.slane %v3962_v4, 1  ;;  %v3970_v52 = vrot.slane %v3969_v24, 1  ;;  %v2006_v59 = vcombine.high %v2004_v38, %v2004_v38  ;;  %v4029_v23 = vrot.slane %v4028_v18, 4  ;;  %v8452_v57 = vpop.f32.mrb[66].mxu0 }
 0x368   :  { %v4176_v60 = vmax.f32 %v3950_v39, %v4006_v48  ;;  %v4177_v19 = vmax.f32 %v3957_v33, %v4013_v1  ;;  %v4035_v49 = vsel %vm2263_vm0, %v2005_v21, -inf  ;;  %v4042_v22 = vsel %vm2263_vm0, %v2004_v38, -inf  ;;  %v8457_v46 = vpop.f32.mrb[67].mxu0  ;;  %v8476_v39 = vld [vmem:[#allocation2 + $0xd2] sm:$0xff]  ;;  %v4579_v33 = vld [vmem:[#allocation2 + $0xe1] sm:$0xff] }
 0x369   :  { %v3964_v56 = vmax.f32 %v3962_v4, %v3963_v37  ;;  %v3971_v11 = vmax.f32 %v3969_v24, %v3970_v52  ;;  %v4030_v9 = vmax.f32 %v4028_v18, %v4029_v23  ;;  %v4036_v51 = vrot.slane %v4035_v49, 4  ;;  %v8478_v21 = vld [vmem:[#allocation2 + $0xf1] sm:$0xff] }
 0x36a   :  { %v4464_v50 = vsel %vm4352_vm1, %v4177_v19, %v4176_v60  ;;  %v4043_v26 = vrot.slane %v4042_v22, 4  ;;  %v4049_v6 = vsel %vm2263_vm0, %v2006_v59, -inf  ;;  %v852_v62 = vmax.f32 %v8403_v54, 0.0  ;;  %v8485_v60 = vld [vmem:[#allocation2 + $0xf0] sm:$0xff] }
 0x36b   :  { %v4178_v5 = vmax.f32 %v3964_v56, %v4020_v30  ;;  %v4179_v40 = vmax.f32 %v3971_v11, %v4027_v7  ;;  %v4031_v32 = vrot.slane %v4030_v9, 2  ;;  %v4037_v63 = vmax.f32 %v4035_v49, %v4036_v51 }
 0x36c   :  { %v4044_v61 = vmax.f32 %v4042_v22, %v4043_v26  ;;  %v4050_v28 = vrot.slane %v4049_v6, 4  ;;  %v1956_v41 = vcombine.high %v852_v62, %v852_v62  ;;  %v1963_v8 = vrot.slane %v852_v62, %v7131_v0 }
 0x36d   :  { %v4465_v54 = vsel %vm4354_vm2, %v4178_v5, %v4464_v50  ;;  %v8462_v3 = vpack.c.bf16 %v8448_v36, %v8455_v15  ;;  %v4038_v12 = vrot.slane %v4037_v63, 2  ;;  %v4032_v25 = vmax.f32 %v4030_v9, %v4031_v32  ;;  %v8489_v9 = vld [vmem:[#allocation2 + $0x102] sm:$0xff] }
 0x36e   :  { %v4051_v48 = vmax.f32 %v4049_v6, %v4050_v28  ;;  %v1970_v58 = vrot.slane %v1956_v41, %v7131_v0  ;;  %v1971_v17 = vcombine.high %v1963_v8, %v1963_v8  ;;  %v4045_v55 = vrot.slane %v4044_v61, 2  ;;  %v8474_v0 = vpop.f32.mrb[4].mxu1  ;;  %v8497_v5 = vld [vmem:[#allocation2 + $0xe0] sm:$0xff]  ;;  %v8503_v28 = vld [vmem:[#allocation2 + $0xf2] sm:$0xff] }
 0x36f   :  { %v3972_v30 = vsel %vm2263_vm0, %v1963_v8, -inf  ;;  %v8467_v47 = vsel %vm4356_vm3, %v4179_v40, %v4465_v54  ;;  %5370 = vmatmul.mubr.bf16.gmra.mrb[20].mxu1 %v8462_v3  ;;  %v4039_v4 = vmax.f32 %v4037_v63, %v4038_v12  ;;  %v8480_v18 = vpop.f32.mrb[5].mxu1  ;;  %v4699_v23 = vpack.c.bf16 %v8470_v27, %v8476_v39 }
 0x370   :  { %v4052_v14 = vrot.slane %v4051_v48, 2  ;;  %v1972_v1 = vcombine.high %v1970_v58, %v1970_v58  ;;  %v3973_v53 = vrot.slane %v3972_v30, 4  ;;  %v3979_v29 = vsel %vm2263_vm0, %v1971_v17, -inf  ;;  %v8487_v19 = vpop.f32.mrb[6].mxu1 }
 0x371   :  { %v3986_v7 = vsel %vm2263_vm0, %v1970_v58, -inf  ;;  %v3980_v38 = vrot.slane %v3979_v29, 4  ;;  %v4046_v37 = vmax.f32 %v4044_v61, %v4045_v55  ;;  %v4033_v49 = vrot.slane %v4032_v25, 1  ;;  %v8491_v51 = vpop.f32.mrb[7].mxu1  ;;  %5563 = vmatprep.mubr.bf16.mxu0 %v4699_v23 }
 0x372   :  { %v3974_v24 = vmax.f32 %v3972_v30, %v3973_v53  ;;  %v3987_v52 = vrot.slane %v3986_v7, 4  ;;  %v3993_v59 = vsel %vm2263_vm0, %v1972_v1, -inf  ;;  %v4053_v22 = vmax.f32 %v4051_v48, %v4052_v14  ;;  %v8511_v1 = vld [vmem:[#allocation2 + $0x110] sm:$0xff]  ;;  %v6445_v53 = vpop.f32.mrb[68].mxu0 }
 0x373   :  { %v3981_v11 = vmax.f32 %v3979_v29, %v3980_v38  ;;  %v3994_v26 = vrot.slane %v3993_v59, 4  ;;  %v4698_v6 = vpack.c.bf16 %v4579_v33, %v8381_v31  ;;  %v8495_v62 = vpack.c.bf16 %v8478_v21, %v4579_v33  ;;  %v6446_v38 = vpop.f32.mrb[69].mxu0 }
 0x374   :  { %v3975_v56 = vrot.slane %v3974_v24, 2  ;;  %v3988_v50 = vmax.f32 %v3986_v7, %v3987_v52  ;;  %v4040_v40 = vrot.slane %v4039_v4, 1  ;;  %v8501_v61 = vpack.c.bf16 %v8485_v60, %v8497_v5  ;;  %v6448_v23 = vpop.f32.mrb[70].mxu0 }
 0x375   :  { %v3982_v63 = vrot.slane %v3981_v11, 2  ;;  %v4047_v41 = vrot.slane %v4046_v37, 1  ;;  %v3995_v54 = vmax.f32 %v3993_v59, %v3994_v26  ;;  %5564 = vmatmul.mubr.bf16.gmra.mrb[84].mxu0 %v4698_v6  ;;  %5377 = vmatprep.mubr.bf16.mxu1 %v8495_v62  ;;  %v4708_v31 = vpack.c.bf16 %v8489_v9, %v8503_v28  ;;  %v8513_v59 = vld [vmem:[#allocation2 + $0x100] sm:$0xff]  ;;  %v6449_v26 = vpop.f32.mrb[71].mxu0 }
 0x376   :  { %v3976_v32 = vmax.f32 %v3974_v24, %v3975_v56  ;;  %v3989_v8 = vrot.slane %v3988_v50, 2  ;;  %v4034_v12 = vmax.f32 %v4032_v25, %v4033_v49  ;;  %v4713_v17 = vpack.c.bf16 %v8418_v44, %v8344_v35 }
 0x377   :  { %v3983_v58 = vmax.f32 %v3981_v11, %v3982_v63  ;;  %5378 = vmatmul.mubr.bf16.gmra.mrb[24].mxu1 %v8501_v61  ;;  %v4054_v55 = vrot.slane %v4053_v22, 1  ;;  %v3996_v14 = vrot.slane %v3995_v54, 2  ;;  %5571 = vmatprep.mubr.bf16.mxu0 %v4708_v31  ;;  %v4041_v29 = vmax.f32 %v4039_v4, %v4040_v40 }
 0x378   :  { %v3977_v48 = vrot.slane %v3976_v32, 1  ;;  %v3990_v30 = vmax.f32 %v3988_v50, %v3989_v8  ;;  %5385 = vmatprep.mubr.bf16.mxu1 %v4713_v17  ;;  %v4048_v25 = vmax.f32 %v4046_v37, %v4047_v41  ;;  %v8517_v11 = vpack.c.bf16 %v8511_v1, %v8513_v59  ;;  %v8519_v50 = vld [vmem:[#allocation2 + $0x20] sm:$0xff]  ;;  %v4552_v41 = vld [vmem:[#allocation2 + $0x10] sm:$0xff] }
 0x379   :  { %v3984_v24 = vrot.slane %v3983_v58, 1  ;;  %v3997_v52 = vmax.f32 %v3995_v54, %v3996_v14  ;;  %v4055_v4 = vmax.f32 %v4053_v22, %v4054_v55  ;;  %v4707_v37 = vpack.c.bf16 %v8344_v35, %v8478_v21  ;;  %v6323_v22 = vpop.f32.mrb[8].mxu1  ;;  %v4536_v17 = vld [vmem:[#allocation2 + $0x2] sm:$0xff]  ;;  %v4537_v55 = vld [vmem:[#allocation2 + $0x12] sm:$0xff] }
 0x37a   :  { %v3978_v7 = vmax.f32 %v3976_v32, %v3977_v48  ;;  %v3991_v33 = vrot.slane %v3990_v30, 1  ;;  %v4652_v31 = vpack.c.bf16 %v8519_v50, %v4552_v41  ;;  %v6324_v35 = vpop.f32.mrb[9].mxu1 }
 0x37b   :  { %v3985_v49 = vmax.f32 %v3983_v58, %v3984_v24  ;;  %v3998_v40 = vrot.slane %v3997_v52, 1 }
 0x37c   :  { %v4180_v56 = vmax.f32 %v3978_v7, %v4034_v12  ;;  %v3992_v6 = vmax.f32 %v3990_v30, %v3991_v33  ;;  %v8538_v7 = vadd.f32 %v8434_v16, %v8430_v13  ;;  %v4651_v13 = vpack.c.bf16 %v4537_v55, %v4536_v17  ;;  %v6836_v16 = vld [vmem:[%s8969_s4 + $0x180] sm:$0xff]  }
 0x37d   :  { %v4181_v32 = vmax.f32 %v3985_v49, %v4041_v29  ;;  %v3999_v8 = vmax.f32 %v3997_v52, %v3998_v40  ;;  %5572 = vmatmul.mubr.bf16.gmra.mrb[88].mxu0 %v4707_v37  ;;  %v8534_v29 = vadd.f32 %v8428_v34, %v8426_v10  ;;  %v8543_v52 = vld [vmem:[#allocation2 + $0x40] sm:$0xff]  ;;  %v8547_v49 = vadd.f32 %v8450_v45, %v8443_v2  ;;  %v8566_v45 = vld [vmem:[#allocation2 + $0x30] sm:$0xff] }
 0x37e   :  { %v4467_v63 = vsel %vm4358_vm4, %v4180_v56, %v8467_v47  ;;  %v4182_v54 = vmax.f32 %v3992_v6, %v4048_v25  ;;  %v6326_v47 = vpop.f32.mrb[10].mxu1  ;;  %v8551_v10 = vadd.f32 %v8457_v46, %v8452_v57  ;;  %v8558_v56 = vadd.f32 %v8480_v18, %v8474_v0  ;;  %v6839_v57 = vld [vmem:[%s8969_s4 + $0x1c8] sm:$0xff]   ;;  %v8595_v37 = vld [vmem:[#allocation2 + $0x60] sm:$0xff] }
 0x37f   :  { %v4468_v12 = vsel %vm4360_vm5, %v4181_v32, %v4467_v63  ;;  %5386 = vmatmul.mubr.bf16.gmra.mrb[28].mxu1 %v8517_v11  ;;  %v4183_v48 = vmax.f32 %v3999_v8, %v4055_v4  ;;  %v6327_v24 = vpop.f32.mrb[11].mxu1  ;;  %v8564_v2 = vadd.f32 %v6446_v38, %v6445_v53  ;;  %v8571_v46 = vadd.f32 %v6449_v26, %v6448_v23  ;;  %v6841_v53 = vld [vmem:[%s8969_s4 + $0x1d0] sm:$0xff]   ;;  %v4633_v32 = vld [vmem:[#allocation2 + $0x22] sm:$0xff] }
 0x380   :  { %v4469_v58 = vsel %vm4362_vm6, %v4182_v54, %v4468_v12  ;;  %5426 = vmatprep.mubr.bf16.mxu1 %v4652_v31  ;;  %v8573_v4 = vadd.f32 %v6324_v35, %v6323_v22  ;;  %v8575_v6 = vadd.f32 %v6327_v24, %v6326_v47  ;;  %v4661_v18 = vpack.c.bf16 %v8543_v52, %v8566_v45  ;;  %v8589_v38 = vld [vmem:[#allocation2 + $0x112] sm:$0xff]  ;;  %v4635_v35 = vld [vmem:[#allocation2 + $0x42] sm:$0xff] }
 0x381   :  { %v6451_v21 = vpop.f32.mrb[72].mxu0  ;;  %v8530_v14 = vsel %vm4364_vm7, %v4183_v48, %v4469_v58  ;;  %v4634_v26 = vld [vmem:[#allocation2 + $0x32] sm:$0xff]  ;;  %v6845_v48 = vld [vmem:[%s8969_s4 + $0x1e0] sm:$0xff]  }
 0x382   :  { %v6452_v30 = vpop.f32.mrb[73].mxu0  ;;  %4503 = vst [vmem:[#allocation2 + $0x121] sm:$0xff] %v8530_v14  ;;  %v4716_v33 = vpack.c.bf16 %v8530_v14, %v8418_v44  ;;  %v8562_v44 = vadd.f32 %v8491_v51, %v8487_v19  ;;  %v6840_v51 = vld [vmem:[%s8969_s4 + $0x188] sm:$0xff]   ;;  %v6842_v63 = vld [vmem:[%s8969_s4 + $0x190] sm:$0xff]   ;;  %v4657_v41 = vpack.c.bf16 %v4634_v26, %v4633_v32  ;;  %v6843_v54 = vld [vmem:[%s8969_s4 + $0x1d8] sm:$0xff]  }
 0x383   :  { %v6454_v25 = vpop.f32.mrb[74].mxu0  ;;  %v8577_v0 = vadd.f32 %v6452_v30, %v6451_v21  ;;  %v8600_v8 = vld [vmem:[#allocation2 + $0x50] sm:$0xff]  ;;  %v6844_v12 = vld [vmem:[%s8969_s4 + $0x198] sm:$0xff]   ;;  %v8613_v21 = vld [vmem:[#allocation2 + $0x80] sm:$0xff] }
 0x384   :  { %v6455_v34 = vpop.f32.mrb[75].mxu0  ;;  %v4670_v31 = vpack.c.bf16 %v8595_v37, %v8600_v8  ;;  %v4636_v22 = vld [vmem:[#allocation2 + $0x52] sm:$0xff]  ;;  %v4637_v55 = vld [vmem:[#allocation2 + $0x62] sm:$0xff] }
 0x385   :  { %v8581_v19 = vadd.f32 %v6455_v34, %v6454_v25  ;;  %v4638_v58 = vld [vmem:[#allocation2 + $0x72] sm:$0xff]  ;;  %v4666_v17 = vpack.c.bf16 %v4636_v22, %v4635_v35  ;;  %v6846_v47 = vld [vmem:[%s8969_s4 + $0x1a0] sm:$0xff]   ;;  %v6847_v25 = vld [vmem:[%s8969_s4 + $0x1e8] sm:$0xff]  }
 0x386   :  { %v4675_v30 = vpack.c.bf16 %v4638_v58, %v4637_v55  ;;  %v8618_v24 = vld [vmem:[#allocation2 + $0x70] sm:$0xff]  ;;  %v6848_v34 = vld [vmem:[%s8969_s4 + $0x1a8] sm:$0xff]   ;;  %v4706_v58 = vpack.c.bf16 %v8513_v59, %v8485_v60  ;;  %v4664_v59 = vpack.c.bf16 %v8600_v8, %v8543_v52 }
 0x387   :  { %5427 = vmatmul.mubr.bf16.vlgmr.msra.gmra.mrb[32].mxu1 %v4651_v13  ;;  %v4639_v13 = vld [vmem:[#allocation2 + $0x82] sm:$0xff]  ;;  %v4560_v26 = vld [vmem:[#allocation2 + $0xb0] sm:$0xff] }
 0x388   :  { %6488 = vmatpush3.bf16.msra.mxu1 %v6836_v16  ;;  %5434 = vmatprep.mubr.bf16.mxu1 %v4661_v18  ;;  %v4640_v16 = vld [vmem:[#allocation2 + $0x92] sm:$0xff]  ;;  %v4688_v32 = vpack.c.bf16 %v8455_v15, %v4560_v26  ;;  %v8648_v15 = vld [vmem:[#allocation2] sm:$0xff] }
 0x389   :  { %6489 = vmatprep.subr.bf16.mxu1 %v6839_v57  ;;  %v8591_v23 = vld [vmem:[#allocation2 + $0x122] sm:$0xff]  ;;  %v6849_v57 = vld [vmem:[%s8969_s4 + $0x1f0] sm:$0xff]   ;;  %v4684_v18 = vpack.c.bf16 %v4640_v16, %v4639_v13  ;;  %v4682_v52 = vpack.c.bf16 %v8648_v15, %v8613_v21 }
 0x38a   :  { %v4717_v40 = vpack.c.bf16 %v8591_v23, %v8589_v38  ;;  %v4618_v35 = vld [vmem:[#allocation2 + $0x31] sm:$0xff] }
 0x38b   :  { %v4620_v55 = vld [vmem:[#allocation2 + $0x51] sm:$0xff] }
 0x38c   :  { %6490 = vmatpush3.bf16.msra.mxu1 %v6840_v51  ;;  %5579 = vmatprep.mubr.bf16.mxu0 %v4717_v40  ;;  %v6850_v51 = vld [vmem:[%s8969_s4 + $0x1b0] sm:$0xff]   ;;  %v6851_v40 = vld [vmem:[%s8969_s4 + $0x1f8] sm:$0xff]  }
 0x38d   :  { %6491 = vmatprep.subr.bf16.mxu1 %v6841_v53  ;;  %5580 = vmatmul.mubr.bf16.gmra.mrb[92].mxu0 %v4716_v33  ;;  %v4679_v33 = vpack.c.bf16 %v8613_v21, %v8618_v24  ;;  %v4693_v53 = vpack.c.bf16 %v8476_v39, %v8365_v43  ;;  %v4702_v43 = vpack.c.bf16 %v8503_v28, %v8470_v27  ;;  %v4622_v60 = vld [vmem:[#allocation2 + $0x71] sm:$0xff] }
 0x38e   :  { %6681 = vmatprep.mubr.bf16.mxu0 %v4657_v41  ;;  %v4711_v39 = vpack.c.bf16 %v8589_v38, %v8489_v9  ;;  %v4630_v8 = vld [vmem:[#allocation2 + $0x111] sm:$0xff] }
 0x38f   :  { %5435 = vmatmul.mubr.bf16.gmra.mrb[36].mxu1 %v4657_v41  ;;  %v4544_v41 = vld [vmem:[#allocation2 + $0xa2] sm:$0xff] }
 0x390   :  { %5442 = vmatprep.mubr.bf16.mxu1 %v4670_v31  ;;  %6492 = vmatpush3.bf16.msra.mxu1 %v6842_v63  ;;  %v6852_v63 = vld [vmem:[%s8969_s4 + $0x1b8] sm:$0xff]   ;;  %v4697_v31 = vpack.c.bf16 %v8497_v5, %v8448_v36  ;;  %v4567_v36 = vld [vmem:[#allocation2 + $0x120] sm:$0xff] }
 0x391   :  { %6493 = vmatprep.subr.bf16.mxu1 %v6843_v54  ;;  %v4687_v54 = vpack.c.bf16 %v8371_v42, %v4544_v41  ;;  %v4715_v5 = vpack.c.bf16 %v4567_v36, %v8511_v1  ;;  %v4621_v1 = vld [vmem:[#allocation2 + $0x61] sm:$0xff] }
 0x394   :  { %6494 = vmatpush3.bf16.msra.mxu1 %v6844_v12  ;;  %v4648_v12 = vld [vmem:[#allocation2 + $0x132] sm:$0xff] }
 0x395   :  { %6495 = vmatprep.subr.bf16.mxu1 %v6845_v48  ;;  %6682 = vmatmul.mubr.bf16.vlgmr.msra.gmra.mrb[96].mxu0 %v4666_v17  ;;  %v4720_v28 = vpack.c.bf16 %v4648_v12, %v8591_v23 }
 0x396   :  { %6685 = vmatprep.mubr.bf16.mxu0 %v4675_v30 }
 0x397   :  { %5443 = vmatmul.mubr.bf16.gmra.mrb[40].mxu1 %v4666_v17  ;;  %v4617_v17 = vld [vmem:[#allocation2 + $0x21] sm:$0xff] }
 0x398   :  { %5450 = vmatprep.mubr.bf16.mxu1 %v4679_v33  ;;  %6496 = vmatpush3.bf16.msra.mxu1 %v6846_v47  ;;  %v4656_v23 = vpack.c.bf16 %v4618_v35, %v4617_v17  ;;  %v4655_v47 = vpack.c.bf16 %v8566_v45, %v8519_v50  ;;  %v4674_v33 = vpack.c.bf16 %v4622_v60, %v4621_v1  ;;  %v6853_v1 = vld [vmem:[%s8972_s7] sm:$0xff]  }
 0x399   :  { %6497 = vmatprep.subr.bf16.mxu1 %v6847_v25 }
 0x39c   :  { %6498 = vmatpush3.bf16.msra.mxu1 %v6848_v34 }
 0x39d   :  { %6499 = vmatprep.subr.bf16.mxu1 %v6849_v57  ;;  %6686 = vmatmul.mubr.bf16.gmra.mrb[100].mxu0 %v4684_v18  ;;  %v4623_v18 = vld [vmem:[#allocation2 + $0x81] sm:$0xff] }
 0x39e   :  { %6689 = vmatprep.mubr.bf16.mxu0 %v4693_v53 }
 0x39f   :  { %5451 = vmatmul.mubr.bf16.gmra.mrb[44].mxu1 %v4675_v30  ;;  %v4619_v30 = vld [vmem:[#allocation2 + $0x41] sm:$0xff] }
 0x3a0   :  { %5458 = vmatprep.mubr.bf16.mxu1 %v4688_v32  ;;  %6500 = vmatpush3.bf16.msra.mxu1 %v6850_v51  ;;  %v4665_v25 = vpack.c.bf16 %v4620_v55, %v4619_v30  ;;  %v4624_v51 = vld [vmem:[#allocation2 + $0x91] sm:$0xff] }
 0x3a1   :  { %6501 = vmatprep.subr.bf16.mxu1 %v6851_v40  ;;  %v4683_v26 = vpack.c.bf16 %v4624_v51, %v4623_v18  ;;  %v4629_v40 = vld [vmem:[#allocation2 + $0x101] sm:$0xff] }
 0x3a2   :  { %v4710_v32 = vpack.c.bf16 %v4630_v8, %v4629_v40 }
 0x3a4   :  { %6502 = vmatpush3.bf16.msra.mxu1 %v6852_v63 }
 0x3a5   :  { %6697 = vmatprep.subr.bf16.mxu1 %v8648_v15  ;;  %6690 = vmatmul.mubr.bf16.gmra.mrb[104].mxu0 %v4702_v43 }
 0x3a6   :  { %6693 = vmatprep.mubr.bf16.mxu0 %v4711_v39 }
 0x3a7   :  { %5459 = vmatmul.mubr.bf16.gmra.mrb[48].mxu1 %v4687_v54 }
 0x3a8   :  { %5466 = vmatprep.mubr.bf16.mxu1 %v4697_v31 }
 0x3a9   :  { %v6329_v22 = vpop.f32.mrb[12].mxu1 }
 0x3aa   :  { %v6330_v27 = vpop.f32.mrb[13].mxu1 }
 0x3ab   :  { %v8654_v48 = vadd.f32 %v6330_v27, %v6329_v22  ;;  %v6332_v9 = vpop.f32.mrb[14].mxu1 }
 0x3ac   :  { %v6333_v42 = vpop.f32.mrb[15].mxu1 }
 0x3ad   :  { %v8656_v38 = vadd.f32 %v6333_v42, %v6332_v9  ;;  %6694 = vmatmul.mubr.bf16.gmra.mrb[108].mxu0 %v4720_v28 }
 0x3ae   :  { %6733 = vmatprep.mubr.msk.bf16.mxu0 %vm6906_vm8, %v8648_v15 }
 0x3af   :  { %5467 = vmatmul.mubr.bf16.gmra.mrb[52].mxu1 %v4693_v53  ;;  %v4673_v53 = vpack.c.bf16 %v8618_v24, %v8595_v37  ;;  %v4632_v37 = vld [vmem:[#allocation2 + $0x131] sm:$0xff] }
 0x3b0   :  { %5474 = vmatprep.mubr.bf16.mxu1 %v4706_v58  ;;  %v4719_v24 = vpack.c.bf16 %v4632_v37, %v8530_v14  ;;  %v6855_v37 = vld [vmem:[%s8972_s7 + $0x10] sm:$0xff]  }
 0x3b7   :  { %5475 = vmatmul.mubr.bf16.gmra.mrb[56].mxu1 %v4702_v43 }
 0x3b8   :  { %5482 = vmatprep.mubr.bf16.mxu1 %v4715_v5 }
 0x3bf   :  { %5483 = vmatmul.mubr.bf16.gmra.mrb[60].mxu1 %v4711_v39 }
 0x3c0   :  { %5620 = vmatprep.mubr.bf16.mxu1 %v4656_v23 }
 0x3c7   :  { %5621 = vmatmul.mubr.bf16.vlgmr.msra.gmra.mrb[64].mxu1 %v4655_v47 }
 0x3c8   :  { %5628 = vmatprep.mubr.bf16.mxu1 %v4665_v25  ;;  %6698 = vmatpush3.bf16.msra.mxu1 %v6853_v1 }
 0x3c9   :  { %6699 = vmatprep.subr.bf16.mxu1 %v8648_v15 }
 0x3cf   :  { %5629 = vmatmul.mubr.bf16.gmra.mrb[68].mxu1 %v4664_v59 }
 0x3d0   :  { %5636 = vmatprep.mubr.bf16.mxu1 %v4674_v33 }
 0x3d1   :  { %v6457_v34 = vpop.f32.mrb[76].mxu0 }
 0x3d2   :  { %v6458_v13 = vpop.f32.mrb[77].mxu0 }
 0x3d3   :  { %v8665_v16 = vadd.f32 %v6458_v13, %v6457_v34  ;;  %v6460_v57 = vpop.f32.mrb[78].mxu0 }
 0x3d4   :  { %v6461_v50 = vpop.f32.mrb[79].mxu0 }
 0x3d5   :  { %v8667_v45 = vadd.f32 %v6461_v50, %v6460_v57  ;;  %v6854_v57 = vld [vmem:[%s8972_s7 + $0x8] sm:$0xff]  }
 0x3d6   :  { %6700 = vmatpush3.bf16.msra.mxu1 %v6854_v57 }
 0x3d7   :  { %5637 = vmatmul.mubr.bf16.gmra.mrb[72].mxu1 %v4673_v53  ;;  %6701 = vmatprep.subr.bf16.mxu1 %v8648_v15 }
 0x3d8   :  { %5644 = vmatprep.mubr.bf16.mxu1 %v4683_v26 }
 0x3da   :  { %6702 = vmatpush3.bf16.msra.mxu1 %v6855_v37 }
 0x3db   :  { %6703 = vmatprep.subr.bf16.mxu1 %v8648_v15 }
 0x3df   :  { %5645 = vmatmul.mubr.bf16.gmra.mrb[76].mxu1 %v4682_v52 }
 0x3e0   :  { %5652 = vmatprep.mubr.bf16.mxu1 %v8392_v20 }
 0x3e7   :  { %5653 = vmatmul.mubr.bf16.gmra.mrb[80].mxu1 %v8462_v3  ;;  %v4718_v3 = vpack.c.bf16 %v8648_v15, %v4567_v36 }
 0x3e8   :  { %5660 = vmatprep.mubr.bf16.mxu1 %v8495_v62 }
 0x3ef   :  { %5661 = vmatmul.mubr.bf16.gmra.mrb[84].mxu1 %v8501_v61 }
 0x3f0   :  { %5668 = vmatprep.mubr.bf16.mxu1 %v4710_v32 }
 0x3f7   :  { %5669 = vmatmul.mubr.bf16.gmra.mrb[88].mxu1 %v8517_v11 }
 0x3f8   :  { %5676 = vmatprep.mubr.bf16.mxu1 %v4719_v24 }
 0x3fb   :  { %v6335_v21 = vpop.f32.mrb[16].mxu1 }
 0x3fc   :  { %v6336_v63 = vpop.f32.mrb[17].mxu1 }
 0x3fd   :  { %v8679_v41 = vadd.f32 %v6336_v63, %v6335_v21  ;;  %v6338_v20 = vpop.f32.mrb[18].mxu1  ;;  %v6856_v21 = vld [vmem:[%s8972_s7 + $0x18] sm:$0xff]  }
 0x3fe   :  { %v6339_v62 = vpop.f32.mrb[19].mxu1  ;;  %6704 = vmatpush3.bf16.msra.mxu1 %v6856_v21 }
 0x3ff   :  { %v8682_v43 = vadd.f32 %v6339_v62, %v6338_v20  ;;  %5677 = vmatmul.mubr.bf16.gmra.mrb[92].mxu1 %v4718_v3  ;;  %6705 = vmatprep.subr.bf16.mxu1 %v8648_v15 }
 0x400   :  { %6713 = vmatprep.mubr.msk.bf16.mxu1 %vm6906_vm8, %v8648_v15 }
 0x422   :  { %v6463_v39 = vpop.f32.mrb[80].mxu0 }
 0x423   :  { %v6464_v61 = vpop.f32.mrb[81].mxu0 }
 0x424   :  { %v8684_v54 = vadd.f32 %v6464_v61, %v6463_v39  ;;  %v6466_v31 = vpop.f32.mrb[82].mxu0 }
 0x425   :  { %v6467_v14 = vpop.f32.mrb[83].mxu0 }
 0x426   :  { %v8686_v12 = vadd.f32 %v6467_v14, %v6466_v31 }
 0x442   :  { %v6341_v11 = vpop.f32.mrb[20].mxu1 }
 0x443   :  { %v6342_v22 = vpop.f32.mrb[21].mxu1 }
 0x444   :  { %v8688_v27 = vadd.f32 %v6342_v22, %v6341_v11  ;;  %v6344_v28 = vpop.f32.mrb[22].mxu1 }
 0x445   :  { %v6345_v9 = vpop.f32.mrb[23].mxu1 }
 0x446   :  { %v8690_v42 = vadd.f32 %v6345_v9, %v6344_v28 }
 0x448   :  { %v6469_v58 = vpop.f32.mrb[84].mxu0 }
 0x449   :  { %v6470_v36 = vpop.f32.mrb[85].mxu0 }
 0x44a   :  { %v6347_v5 = vpop.f32.mrb[24].mxu1  ;;  %v8692_v35 = vadd.f32 %v6470_v36, %v6469_v58  ;;  %v6472_v17 = vpop.f32.mrb[86].mxu0 }
 0x44b   :  { %v6348_v23 = vpop.f32.mrb[25].mxu1  ;;  %v6473_v55 = vpop.f32.mrb[87].mxu0 }
 0x44c   :  { %v8694_v47 = vadd.f32 %v6348_v23, %v6347_v5  ;;  %v6350_v30 = vpop.f32.mrb[26].mxu1  ;;  %v8696_v25 = vadd.f32 %v6473_v55, %v6472_v17 }
 0x44d   :  { %v6351_v60 = vpop.f32.mrb[27].mxu1 }
 0x44e   :  { %v8698_v59 = vadd.f32 %v6351_v60, %v6350_v30 }
 0x450   :  { %v6475_v33 = vpop.f32.mrb[88].mxu0 }
 0x451   :  { %v6476_v34 = vpop.f32.mrb[89].mxu0 }
 0x452   :  { %v6353_v13 = vpop.f32.mrb[28].mxu1  ;;  %v8706_v18 = vadd.f32 %v6476_v34, %v6475_v33  ;;  %v6478_v51 = vpop.f32.mrb[90].mxu0 }
 0x453   :  { %v6354_v50 = vpop.f32.mrb[29].mxu1  ;;  %v6479_v53 = vpop.f32.mrb[91].mxu0 }
 0x454   :  { %v8709_v26 = vadd.f32 %v6354_v50, %v6353_v13  ;;  %v6356_v52 = vpop.f32.mrb[30].mxu1  ;;  %v8711_v8 = vadd.f32 %v6479_v53, %v6478_v51 }
 0x455   :  { %v6357_v40 = vpop.f32.mrb[31].mxu1 }
 0x456   :  { %v8713_v32 = vadd.f32 %v6357_v40, %v6356_v52 }
 0x45a   :  { %v6375_v24 = vpop.f32.mrb[32].mxu1 }
 0x45b   :  { %v6376_v63 = vpop.f32.mrb[33].mxu1 }
 0x45c   :  { %v6377_v20 = vadd.f32 %v6376_v63, %v6375_v24  ;;  %v6378_v3 = vpop.f32.mrb[34].mxu1 }
 0x45d   :  { %v6379_v62 = vpop.f32.mrb[35].mxu1 }
 0x45e   :  { %v5429_v39 = vadd.f32 %v6377_v20, %v8534_v29  ;;  %v6380_v61 = vadd.f32 %v6379_v62, %v6378_v3 }
 0x460   :  { %v5432_v31 = vadd.f32 %v6380_v61, %v8538_v7  ;;  %v8727_v14 = vadd.f32 %v8547_v49, %v5429_v39  ;;  %v6481_v11 = vpop.f32.mrb[92].mxu0 }
 0x461   :  { %v6482_v22 = vpop.f32.mrb[93].mxu0 }
 0x462   :  { %v6381_v28 = vpop.f32.mrb[36].mxu1  ;;  %v8730_v9 = vadd.f32 %v8551_v10, %v5432_v31  ;;  %v8732_v58 = vadd.f32 %v6482_v22, %v6481_v11  ;;  %v6484_v36 = vpop.f32.mrb[94].mxu0 }
 0x463   :  { %v6382_v5 = vpop.f32.mrb[37].mxu1  ;;  %v6485_v29 = vpop.f32.mrb[95].mxu0 }
 0x464   :  { %v6383_v17 = vadd.f32 %v6382_v5, %v6381_v28  ;;  %v6384_v23 = vpop.f32.mrb[38].mxu1  ;;  %v8734_v55 = vadd.f32 %v6485_v29, %v6484_v36  ;;  %v6861_v5 = vld [vmem:[%s8974_s9] sm:$0xff]  }
 0x465   :  { %v6385_v30 = vpop.f32.mrb[39].mxu1  ;;  %6718 = vmatpush3.bf16.msra.mxu0 %v6861_v5 }
 0x466   :  { %v5437_v7 = vadd.f32 %v6383_v17, %v8558_v56  ;;  %v6386_v49 = vadd.f32 %v6385_v30, %v6384_v23  ;;  %v6862_v30 = vld [vmem:[%s8974_s9 + $0x8] sm:$0xff]   ;;  %6719 = vmatprep.subr.bf16.mxu0 %v8648_v15 }
 0x468   :  { %v5440_v60 = vadd.f32 %v6386_v49, %v8562_v44  ;;  %v8739_v1 = vadd.f32 %v8564_v2, %v5437_v7  ;;  %v8741_v10 = vpop.f32.mrb[96].mxu0 }
 0x469   :  { %v8743_v33 = vpop.f32.mrb[97].mxu0  ;;  %6720 = vmatpush3.bf16.msra.mxu0 %v6862_v30 }
 0x46a   :  { %v6387_v34 = vpop.f32.mrb[40].mxu1  ;;  %v8746_v13 = vadd.f32 %v8571_v46, %v5440_v60  ;;  %v8748_v57 = vpop.f32.mrb[98].mxu0  ;;  %v6857_v46 = vld [vmem:[%s8972_s7 + $0x20] sm:$0xff]   ;;  %6721 = vmatprep.subr.bf16.mxu0 %v8648_v15 }
 0x46b   :  { %v6388_v51 = vpop.f32.mrb[41].mxu1  ;;  %v8750_v50 = vpop.f32.mrb[99].mxu0  ;;  %6706 = vmatpush3.bf16.msra.mxu1 %v6857_v46 }
 0x46c   :  { %v6389_v56 = vadd.f32 %v6388_v51, %v6387_v34  ;;  %v6390_v53 = vpop.f32.mrb[42].mxu1  ;;  %6707 = vmatprep.subr.bf16.mxu1 %v8648_v15 }
 0x46d   :  { %v6391_v52 = vpop.f32.mrb[43].mxu1 }
 0x46e   :  { %v5445_v44 = vadd.f32 %v6389_v56, %v8573_v4  ;;  %v6392_v2 = vadd.f32 %v6391_v52, %v6390_v53  ;;  %v6863_v56 = vld [vmem:[%s8974_s9 + $0x10] sm:$0xff]  }
 0x46f   :  { %6722 = vmatpush3.bf16.msra.mxu0 %v6863_v56 }
 0x470   :  { %v5448_v40 = vadd.f32 %v6392_v2, %v8575_v6  ;;  %v8755_v37 = vadd.f32 %v8577_v0, %v5445_v44  ;;  %v8760_v24 = vpop.f32.mrb[100].mxu0  ;;  %v6858_v6 = vld [vmem:[%s8972_s7 + $0x28] sm:$0xff]   ;;  %6723 = vmatprep.subr.bf16.mxu0 %v8648_v15 }
 0x471   :  { %v8764_v21 = vpop.f32.mrb[101].mxu0  ;;  %6708 = vmatpush3.bf16.msra.mxu1 %v6858_v6 }
 0x472   :  { %v6393_v4 = vpop.f32.mrb[44].mxu1  ;;  %v8767_v63 = vadd.f32 %v8581_v19, %v5448_v40  ;;  %v8772_v0 = vpop.f32.mrb[102].mxu0  ;;  %v6859_v19 = vld [vmem:[%s8972_s7 + $0x30] sm:$0xff]   ;;  %6709 = vmatprep.subr.bf16.mxu1 %v8648_v15 }
 0x473   :  { %v6394_v20 = vpop.f32.mrb[45].mxu1  ;;  %v8775_v3 = vpop.f32.mrb[103].mxu0 }
 0x474   :  { %v6395_v62 = vadd.f32 %v6394_v20, %v6393_v4  ;;  %v6396_v39 = vpop.f32.mrb[46].mxu1 }
 0x475   :  { %v6397_v61 = vpop.f32.mrb[47].mxu1  ;;  %6710 = vmatpush3.bf16.msra.mxu1 %v6859_v19 }
 0x476   :  { %v5453_v31 = vadd.f32 %v6395_v62, %v8654_v48  ;;  %v6398_v11 = vadd.f32 %v6397_v61, %v6396_v39  ;;  %6711 = vmatprep.subr.bf16.mxu1 %v8648_v15 }
 0x478   :  { %v5456_v22 = vadd.f32 %v6398_v11, %v8656_v38  ;;  %v8784_v28 = vadd.f32 %v8665_v16, %v5453_v31  ;;  %v8786_v36 = vpop.f32.mrb[104].mxu0  ;;  %v6860_v38 = vld [vmem:[%s8972_s7 + $0x38] sm:$0xff]  }
 0x479   :  { %v8791_v48 = vpop.f32.mrb[105].mxu0  ;;  %6712 = vmatpush3.bf16.msra.mxu1 %v6860_v38 }
 0x47a   :  { %v6399_v29 = vpop.f32.mrb[48].mxu1  ;;  %v8794_v17 = vadd.f32 %v8667_v45, %v5456_v22  ;;  %v8799_v23 = vpop.f32.mrb[106].mxu0 }
 0x47b   :  { %v6400_v16 = vpop.f32.mrb[49].mxu1  ;;  %v8805_v7 = vpop.f32.mrb[107].mxu0 }
 0x47c   :  { %v6401_v49 = vadd.f32 %v6400_v16, %v6399_v29  ;;  %v6402_v45 = vpop.f32.mrb[50].mxu1 }
 0x47d   :  { %v6403_v60 = vpop.f32.mrb[51].mxu1 }
 0x47e   :  { %v5461_v34 = vadd.f32 %v6401_v49, %v8679_v41  ;;  %v6404_v51 = vadd.f32 %v6403_v60, %v6402_v45 }
 0x480   :  { %v5464_v53 = vadd.f32 %v6404_v51, %v8682_v43  ;;  %v8814_v52 = vadd.f32 %v8684_v54, %v5461_v34  ;;  %v8817_v44 = vpop.f32.mrb[108].mxu0  ;;  %v6864_v43 = vld [vmem:[%s8974_s9 + $0x18] sm:$0xff]  }
 0x481   :  { %v8819_v40 = vpop.f32.mrb[109].mxu0  ;;  %6724 = vmatpush3.bf16.msra.mxu0 %v6864_v43 }
 0x482   :  { %v6405_v2 = vpop.f32.mrb[52].mxu1  ;;  %v8822_v41 = vadd.f32 %v8686_v12, %v5464_v53  ;;  %v8824_v4 = vpop.f32.mrb[110].mxu0  ;;  %v6865_v12 = vld [vmem:[%s8974_s9 + $0x20] sm:$0xff]   ;;  %6725 = vmatprep.subr.bf16.mxu0 %v8648_v15 }
 0x483   :  { %v6406_v46 = vpop.f32.mrb[53].mxu1  ;;  %v8829_v20 = vpop.f32.mrb[111].mxu0 }
 0x484   :  { %v6407_v54 = vadd.f32 %v6406_v46, %v6405_v2  ;;  %v6408_v6 = vpop.f32.mrb[54].mxu1 }
 0x485   :  { %v6409_v62 = vpop.f32.mrb[55].mxu1  ;;  %6726 = vmatpush3.bf16.msra.mxu0 %v6865_v12 }
 0x486   :  { %v5469_v39 = vadd.f32 %v6407_v54, %v8688_v27  ;;  %v6410_v61 = vadd.f32 %v6409_v62, %v6408_v6  ;;  %v6866_v27 = vld [vmem:[%s8974_s9 + $0x28] sm:$0xff]   ;;  %6727 = vmatprep.subr.bf16.mxu0 %v8648_v15 }
 0x488   :  { %v5472_v31 = vadd.f32 %v6410_v61, %v8690_v42  ;;  %v8838_v11 = vadd.f32 %v8692_v35, %v5469_v39 }
 0x489   :  { %6728 = vmatpush3.bf16.msra.mxu0 %v6866_v27 }
 0x48a   :  { %v6411_v19 = vpop.f32.mrb[56].mxu1  ;;  %v8842_v22 = vadd.f32 %v8696_v25, %v5472_v31  ;;  %v6867_v25 = vld [vmem:[%s8974_s9 + $0x30] sm:$0xff]   ;;  %6729 = vmatprep.subr.bf16.mxu0 %v8648_v15 }
 0x48b   :  { %v6412_v5 = vpop.f32.mrb[57].mxu1 }
 0x48c   :  { %v6413_v29 = vadd.f32 %v6412_v5, %v6411_v19  ;;  %v6414_v38 = vpop.f32.mrb[58].mxu1 }
 0x48d   :  { %v6415_v42 = vpop.f32.mrb[59].mxu1  ;;  %6730 = vmatpush3.bf16.msra.mxu0 %v6867_v25 }
 0x48e   :  { %v5477_v35 = vadd.f32 %v6413_v29, %v8694_v47  ;;  %v6416_v16 = vadd.f32 %v6415_v42, %v6414_v38  ;;  %6731 = vmatprep.subr.bf16.mxu0 %v8648_v15 }
 0x490   :  { %v5480_v30 = vadd.f32 %v6416_v16, %v8698_v59  ;;  %v8854_v49 = vadd.f32 %v8706_v18, %v5477_v35 }
 0x492   :  { %v6417_v45 = vpop.f32.mrb[60].mxu1  ;;  %v8858_v60 = vadd.f32 %v8711_v8, %v5480_v30 }
 0x493   :  { %v6418_v34 = vpop.f32.mrb[61].mxu1 }
 0x494   :  { %v6419_v47 = vadd.f32 %v6418_v34, %v6417_v45  ;;  %v6420_v51 = vpop.f32.mrb[62].mxu1 }
 0x495   :  { %v6421_v56 = vpop.f32.mrb[63].mxu1 }
 0x496   :  { %v5485_v53 = vadd.f32 %v6419_v47, %v8709_v26  ;;  %v6422_v2 = vadd.f32 %v6421_v56, %v6420_v51  ;;  %v8873_v26 = vld [vmem:[%s8970_s5] ss:$0 sm:$0xff] }
 0x498   :  { %v5488_v59 = vadd.f32 %v6422_v2, %v8713_v32  ;;  %v8864_v18 = vadd.f32 %v8732_v58, %v5485_v53 }
 0x49a   :  { %v6503_v46 = vpop.f32.mrb[64].mxu1  ;;  %v8867_v43 = vadd.f32 %v8734_v55, %v5488_v59  ;;  %v8880_v55 = vld [vmem:[%s8971_s6] ss:$0 sm:$0xff] }
 0x49b   :  { %v6504_v8 = vpop.f32.mrb[65].mxu1 }
 0x49c   :  { %v6505_v54 = vadd.f32 %v6504_v8, %v6503_v46  ;;  %v6506_v6 = vpop.f32.mrb[66].mxu1 }
 0x49d   :  { %v6507_v62 = vpop.f32.mrb[67].mxu1 }
 0x49e   :  { %v5623_v39 = vadd.f32 %v6505_v54, %v8727_v14  ;;  %v6508_v15 = vadd.f32 %v6507_v62, %v6506_v6 }
 0x4a0   :  { %v5720_v32 = vadd.f32 %v8743_v33, %v5623_v39  ;;  %v5626_v58 = vadd.f32 %v6508_v15, %v8730_v9 }
 0x4a2   :  { %v5789_v61 = vmul.f32 %v8873_v26, %v5720_v32  ;;  %v5723_v12 = vadd.f32 %v8750_v50, %v5626_v58  ;;  %v6509_v14 = vpop.f32.mrb[68].mxu1 }
 0x4a3   :  { %v6510_v31 = vpop.f32.mrb[69].mxu1 }
 0x4a4   :  { %v5812_v19 = vadd.f32 %v8880_v55, %v5789_v61  ;;  %v5790_v5 = vmul.f32 %v8873_v26, %v5723_v12  ;;  %v6511_v27 = vadd.f32 %v6510_v31, %v6509_v14  ;;  %v6512_v29 = vpop.f32.mrb[70].mxu1 }
 0x4a5   :  { %v6513_v33 = vpop.f32.mrb[71].mxu1 }
 0x4a6   :  { %v5813_v9 = vadd.f32 %v8880_v55, %v5790_v5  ;;  %v5631_v38 = vadd.f32 %v6511_v27, %v8739_v1  ;;  %v6514_v42 = vadd.f32 %v6513_v33, %v6512_v29  ;;  %v5828_v35 = vmax.f32 %v5812_v19, 0.0 }
 0x4a8   :  { %v5829_v16 = vmax.f32 %v5813_v9, 0.0  ;;  %v5728_v25 = vadd.f32 %v8741_v10, %v5631_v38  ;;  %v5634_v50 = vadd.f32 %v6514_v42, %v8746_v13 }
 0x4aa   :  { %v5844_v30 = vadd.f32 %v5829_v16, %v5828_v35  ;;  %v5791_v45 = vmul.f32 %v8873_v26, %v5728_v25  ;;  %v5731_v34 = vadd.f32 %v8748_v57, %v5634_v50  ;;  %v6515_v47 = vpop.f32.mrb[72].mxu1 }
 0x4ab   :  { %v6516_v51 = vpop.f32.mrb[73].mxu1 }
 0x4ac   :  { %v5814_v56 = vadd.f32 %v8880_v55, %v5791_v45  ;;  %v5792_v53 = vmul.f32 %v8873_v26, %v5731_v34  ;;  %v6517_v2 = vadd.f32 %v6516_v51, %v6515_v47  ;;  %v6518_v1 = vpop.f32.mrb[74].mxu1 }
 0x4ad   :  { %v6519_v59 = vpop.f32.mrb[75].mxu1 }
 0x4ae   :  { %v5830_v46 = vmax.f32 %v5814_v56, 0.0  ;;  %v5815_v8 = vadd.f32 %v8880_v55, %v5792_v53  ;;  %v5639_v10 = vadd.f32 %v6517_v2, %v8755_v37  ;;  %v6520_v13 = vadd.f32 %v6519_v59, %v6518_v1 }
 0x4b0   :  { %v5845_v54 = vadd.f32 %v5844_v30, %v5830_v46  ;;  %v5831_v6 = vmax.f32 %v5815_v8, 0.0  ;;  %v5736_v62 = vadd.f32 %v8764_v21, %v5639_v10  ;;  %v5642_v57 = vadd.f32 %v6520_v13, %v8767_v63 }
 0x4b2   :  { %v5846_v39 = vadd.f32 %v5845_v54, %v5831_v6  ;;  %v5793_v15 = vmul.f32 %v8873_v26, %v5736_v62  ;;  %v5739_v32 = vadd.f32 %v8775_v3, %v5642_v57  ;;  %v6521_v58 = vpop.f32.mrb[76].mxu1 }
 0x4b3   :  { %v6522_v61 = vpop.f32.mrb[77].mxu1 }
 0x4b4   :  { %v5816_v12 = vadd.f32 %v8880_v55, %v5793_v15  ;;  %v5794_v14 = vmul.f32 %v8873_v26, %v5739_v32  ;;  %v6523_v31 = vadd.f32 %v6522_v61, %v6521_v58  ;;  %v6524_v37 = vpop.f32.mrb[78].mxu1 }
 0x4b5   :  { %v6525_v19 = vpop.f32.mrb[79].mxu1 }
 0x4b6   :  { %v5832_v5 = vmax.f32 %v5816_v12, 0.0  ;;  %v5817_v27 = vadd.f32 %v8880_v55, %v5794_v14  ;;  %v5647_v21 = vadd.f32 %v6523_v31, %v8784_v28  ;;  %v6526_v63 = vadd.f32 %v6525_v19, %v6524_v37 }
 0x4b8   :  { %v5847_v29 = vadd.f32 %v5846_v39, %v5832_v5  ;;  %v5833_v33 = vmax.f32 %v5817_v27, 0.0  ;;  %v5744_v9 = vadd.f32 %v8760_v24, %v5647_v21  ;;  %v5650_v3 = vadd.f32 %v6526_v63, %v8794_v17 }
 0x4ba   :  { %v5848_v38 = vadd.f32 %v5847_v29, %v5833_v33  ;;  %v5795_v42 = vmul.f32 %v8873_v26, %v5744_v9  ;;  %v5747_v35 = vadd.f32 %v8772_v0, %v5650_v3  ;;  %v6527_v16 = vpop.f32.mrb[80].mxu1 }
 0x4bb   :  { %v6528_v25 = vpop.f32.mrb[81].mxu1 }
 0x4bc   :  { %v5818_v50 = vadd.f32 %v8880_v55, %v5795_v42  ;;  %v5796_v30 = vmul.f32 %v8873_v26, %v5747_v35  ;;  %v6529_v45 = vadd.f32 %v6528_v25, %v6527_v16  ;;  %v6530_v28 = vpop.f32.mrb[82].mxu1 }
 0x4bd   :  { %v6531_v34 = vpop.f32.mrb[83].mxu1 }
 0x4be   :  { %v5834_v47 = vmax.f32 %v5818_v50, 0.0  ;;  %v5819_v51 = vadd.f32 %v8880_v55, %v5796_v30  ;;  %v5655_v24 = vadd.f32 %v6529_v45, %v8814_v52  ;;  %v6532_v17 = vadd.f32 %v6531_v34, %v6530_v28 }
 0x4c0   :  { %v5849_v56 = vadd.f32 %v5848_v38, %v5834_v47  ;;  %v5835_v53 = vmax.f32 %v5819_v51, 0.0  ;;  %v5752_v2 = vadd.f32 %v8791_v48, %v5655_v24  ;;  %v5658_v0 = vadd.f32 %v6532_v17, %v8822_v41 }
 0x4c2   :  { %v5850_v1 = vadd.f32 %v5849_v56, %v5835_v53  ;;  %v5797_v59 = vmul.f32 %v8873_v26, %v5752_v2  ;;  %v5755_v46 = vadd.f32 %v8805_v7, %v5658_v0  ;;  %v6533_v8 = vpop.f32.mrb[84].mxu1 }
 0x4c3   :  { %v6534_v10 = vpop.f32.mrb[85].mxu1 }
 0x4c4   :  { %v5820_v13 = vadd.f32 %v8880_v55, %v5797_v59  ;;  %v5798_v54 = vmul.f32 %v8873_v26, %v5755_v46  ;;  %v6535_v6 = vadd.f32 %v6534_v10, %v6533_v8  ;;  %v6536_v52 = vpop.f32.mrb[86].mxu1  ;;  %v5851_v35 = vrot.slane %v5850_v1, 4 }
 0x4c5   :  { %v6537_v62 = vpop.f32.mrb[87].mxu1 }
 0x4c6   :  { %v5821_v57 = vadd.f32 %v8880_v55, %v5798_v54  ;;  %v5663_v48 = vadd.f32 %v6535_v6, %v8838_v11  ;;  %v6538_v39 = vadd.f32 %v6537_v62, %v6536_v52  ;;  %v5836_v41 = vmax.f32 %v5820_v13, 0.0 }
 0x4c7   :  { %v5852_v51 = vadd.f32 %v5851_v35, %v5850_v1 }
 0x4c8   :  { %v5837_v15 = vmax.f32 %v5821_v57, 0.0  ;;  %v5760_v32 = vadd.f32 %v8786_v36, %v5663_v48  ;;  %v5666_v7 = vadd.f32 %v6538_v39, %v8842_v22 }
 0x4c9   :  { %v5853_v59 = vrot.slane %v5852_v51, 2 }
 0x4ca   :  { %v5857_v58 = vadd.f32 %v5837_v15, %v5836_v41  ;;  %v5799_v61 = vmul.f32 %v8873_v26, %v5760_v32  ;;  %v6539_v12 = vpop.f32.mrb[88].mxu1  ;;  %v5763_v14 = vadd.f32 %v8799_v23, %v5666_v7 }
 0x4cb   :  { %v6540_v31 = vpop.f32.mrb[89].mxu1  ;;  %v5854_v1 = vadd.f32 %v5853_v59, %v5852_v51 }
 0x4cc   :  { %v5822_v37 = vadd.f32 %v8880_v55, %v5799_v61  ;;  %v6541_v19 = vadd.f32 %v6540_v31, %v6539_v12  ;;  %v6542_v5 = vpop.f32.mrb[90].mxu1  ;;  %v5800_v11 = vmul.f32 %v8873_v26, %v5763_v14  ;;  %v6868_v12 = vld [vmem:[%s8974_s9 + $0x38] sm:$0xff]   ;;  %v6237_v14 = vld [vmem:[%s8973_s8] ss:$0 sm:$0xff]  ;;  %s6880_s8 = scalar_lea.vmem %s6114_s18, 32 }
 0x4cd   :  { %v6543_v27 = vpop.f32.mrb[91].mxu1  ;;  %6732 = vmatpush3.bf16.msra.mxu0 %v6868_v12  ;;  %p6881_p0 = scmp.ne.s32.totalorder %s6114_s18, %s6880_s8  ;;  %p6886_p2 = scmp.lt.s32.totalorder %s6880_s8, %s6880_s8 }
 0x4ce   :  { %v5838_v21 = vmax.f32 %v5822_v37, 0.0  ;;  %v5671_v63 = vadd.f32 %v6541_v19, %v8854_v49  ;;  %v6544_v36 = vadd.f32 %v6543_v27, %v6542_v5  ;;  %v5823_v22 = vadd.f32 %v8880_v55, %v5800_v11 }
 0x4cf   :  { %p6887_p3 = por %p6886_p2, %p6885_p1 }
 0x4d0   :  { %v5858_v29 = vadd.f32 %v5857_v58, %v5838_v21  ;;  %v5768_v33 = vadd.f32 %v8819_v40, %v5671_v63  ;;  %v5674_v9 = vadd.f32 %v6544_v36, %v8858_v60  ;;  %v5839_v23 = vmax.f32 %v5823_v22, 0.0  ;;  %v6246_v63 = vld [vmem:[%s8975_s10] ss:$0 sm:$0xff] }
 0x4d1   :  { %p6888_p4 = pnand %p6887_p3, %p6881_p0 }
 0x4d2   :  { %v5801_v3 = vmul.f32 %v8873_v26, %v5768_v33  ;;  %v5771_v38 = vadd.f32 %v8829_v20, %v5674_v9  ;;  %v6545_v42 = vpop.f32.mrb[92].mxu1  ;;  %v5859_v16 = vadd.f32 %v5858_v29, %v5839_v23 }
 0x4d3   :  { %v6546_v25 = vpop.f32.mrb[93].mxu1 }
 0x4d4   :  { %v5824_v50 = vadd.f32 %v8880_v55, %v5801_v3  ;;  %v5802_v49 = vmul.f32 %v8873_v26, %v5771_v38  ;;  %v6547_v30 = vadd.f32 %v6546_v25, %v6545_v42  ;;  %v6548_v45 = vpop.f32.mrb[94].mxu1 }
 0x4d5   :  { %v6549_v28 = vpop.f32.mrb[95].mxu1 }
 0x4d6   :  { %v5840_v34 = vmax.f32 %v5824_v50, 0.0  ;;  %v5825_v40 = vadd.f32 %v8880_v55, %v5802_v49  ;;  %v5679_v60 = vadd.f32 %v6547_v30, %v8864_v18  ;;  %v6550_v47 = vadd.f32 %v6549_v28, %v6548_v45 }
 0x4d8   :  { %v5860_v24 = vadd.f32 %v5859_v16, %v5840_v34  ;;  %v5841_v20 = vmax.f32 %v5825_v40, 0.0  ;;  %v5776_v17 = vadd.f32 %v8817_v44, %v5679_v60  ;;  %v5682_v56 = vadd.f32 %v6550_v47, %v8867_v43 }
 0x4d9   :  { %v5855_v44 = vrot.slane %v5854_v1, 1 }
 0x4da   :  { %v5861_v53 = vadd.f32 %v5860_v24, %v5841_v20  ;;  %v5803_v2 = vmul.f32 %v8873_v26, %v5776_v17  ;;  %v5779_v0 = vadd.f32 %v8824_v4, %v5682_v56 }
 0x4db   :  { %v5856_v62 = vadd.f32 %v5855_v44, %v5854_v1 }
 0x4dc   :  { %v5826_v46 = vadd.f32 %v8880_v55, %v5803_v2  ;;  %v5804_v8 = vmul.f32 %v8873_v26, %v5779_v0 }
 0x4dd   :  { %v5871_v39 = vmul.f32 0.015625, %v5856_v62 }
 0x4de   :  { %v5842_v10 = vmax.f32 %v5826_v46, 0.0  ;;  %v5827_v18 = vadd.f32 %v8880_v55, %v5804_v8 }
 0x4df   :  { %v5873_v32 = vpack.c.bf16 %v5871_v39, %v5871_v39 }
 0x4e0   :  { %v5862_v13 = vadd.f32 %v5861_v53, %v5842_v10  ;;  %v5843_v54 = vmax.f32 %v5827_v18, 0.0 }
 0x4e1   :  { %v5900_v26 = vunpack.c.l.b16 %v5873_v32 }
 0x4e2   :  { %v5863_v6 = vadd.f32 %v5862_v13, %v5843_v54 }
 0x4e4   :  { %v5864_v52 = vrot.slane %v5863_v6, 4 }
 0x4e6   :  { %v5865_v43 = vadd.f32 %v5864_v52, %v5863_v6 }
 0x4e8   :  { %v5866_v57 = vrot.slane %v5865_v43, 2 }
 0x4ea   :  { %v5867_v48 = vadd.f32 %v5866_v57, %v5865_v43 }
 0x4ec   :  { %v5868_v4 = vrot.slane %v5867_v48, 1 }
 0x4ee   :  { %v5869_v41 = vadd.f32 %v5868_v4, %v5867_v48 }
 0x4f0   :  { %v5872_v15 = vmul.f32 0.015625, %v5869_v41 }
 0x4f2   :  { %v5874_v7 = vpack.c.bf16 %v5872_v15, %v5872_v15 }
 0x4f4   :  { %v5901_v58 = vunpack.c.l.b16 %v5874_v7 }
 0x4f6   :  { %v5902_v55 = vsel %vm4352_vm1, %v5901_v58, %v5900_v26 }
 0x4f7   :  { %v5903_v61 = vpack.c.b16 %v5902_v55, %v5902_v55 }
 0x4f9   :  { %6714 = vmatmul.mubr.bf16.vlgmr.msra.gmra.mrb[96].mxu1 %v5903_v61 }
 0x5cc   :  { %v5987_v31 = vpop.f32.mrb[96].mxu1 }
 0x5cd   :  { %v5988_v37 = vadd.f32 %v6237_v14, %v5987_v31  ;;  %v6715_v19 = vpop.f32.mrb[97].mxu1 }
 0x5ce   :  { %v5990_v5 = vpop.f32.mrb[98].mxu1 }
 0x5cf   :  { %v5993_v11 = vmax.f32 %v5988_v37, 0.0  ;;  %v6716_v27 = vpop.f32.mrb[99].mxu1 }
 0x5d1   :  { %v5994_v21 = vpack.c.bf16 %v5993_v11, %v5993_v11 }
 0x5d3   :  { %6734 = vmatmul.mubr.bf16.vlgmr.msra.gmra.mrb[112].mxu0 %v5994_v21 }
 0x6a6   :  { %v6100_v36 = vpop.f32.mrb[112].mxu0 }
 0x6a7   :  { %v6101_v22 = vadd.f32 %v6246_v63, %v6100_v36  ;;  %v6735_v29 = vpop.f32.mrb[113].mxu0 }
 0x6a8   :  { %v6103_v33 = vpop.f32.mrb[114].mxu0 }
 0x6a9   :  { %6106 = vst [vmem:[#allocation3] sm:$0x3] %v6101_v22  ;;  %v6736_v9 = vpop.f32.mrb[115].mxu0 }
 0x6aa   :  { %6891 = shalt.err (!%p6888_p4)
}
 0x6ab   :  { %s6892_s10 = scalar_lea.hbm %s8976_s11, 32 }
 0x6ac   :  { %p6893_p5 = scmp.ne.s32.totalorder %s8976_s11, %s6892_s10  ;;  %p6896_p6 = scmp.lt.u32.totalorder %s6892_s10, %s8976_s11 }
 0x6ae   :  { %p6898_p7 = pnand %p6896_p6, %p6893_p5 }
 0x6b0   :  { %6901 = shalt.err (!%p6898_p7)
}
 0x6b1   :  { %6116 = dma.vmem_to_hbm [thread:$0]  %s6114_s18, 32, %s8976_s11, [#allocation4]  }
 0x6b2   :  { %6902 = dma.done.wait [#allocation4], 32  }
 0x6b3   :  { %6903 = vsyncadd [#allocation4], 4294967264 }
 0x6b4   :  { %6120 = vsyncpa [#allocation4], 1 }

</bundles_post_ra>
